<compile_context>
chip_gen: v5e
topology: v5e:2x2
jax: 0.10.0
libtpu: 0.0.40
codegen_flags: <defaults>
</compile_context>

<pallas_src>
import functools
import math

import jax
import jax.numpy as jnp
from jax import lax
from jax.experimental import pallas as pl
from jax.experimental.pallas import tpu as pltpu

MAX_REL_POS = 20


# ----------------------------------------------------------------------------
# In-kernel math helpers (f32)
# ----------------------------------------------------------------------------

def _gelu_tanh(x):
    c = math.sqrt(2.0 / math.pi)
    return 0.5 * x * (1.0 + jnp.tanh(c * (x + 0.044715 * x * x * x)))


def _layernorm(x, gamma, beta, eps=1e-5):
    mean = jnp.mean(x, axis=-1, keepdims=True)
    var = jnp.mean((x - mean) ** 2, axis=-1, keepdims=True)
    return (x - mean) * lax.rsqrt(var + eps) * gamma + beta


# ----------------------------------------------------------------------------
# Fused EncoderLayer kernel: grid = (batch, query-tile)
# ----------------------------------------------------------------------------

def _make_encoder_layer_kernel(num_heads, head_dim, embed_dim, seq_len, q_tile,
                               rel_radius):
    H, D, E, S, TQ, RB = num_heads, head_dim, embed_dim, seq_len, q_tile, rel_radius
    NR = 2 * RB + 1
    inv_scale = 1.0 / math.sqrt(D)
    bf16 = jnp.bfloat16

    def kernel(xq_ref, xkv_ref, wqkv_ref, bqkv_ref, rkT_ref, rv_ref,
               wo_ref, bo_ref, g1_ref, be1_ref, wf1_ref, bf1_ref,
               wf2_ref, bf2_ref, g2_ref, be2_ref,
               y_ref, attn_ref, q3_ref, k3_ref, v3_ref):
        qi = pl.program_id(1)

        # ---- once per batch element: packed QKV projection (single MXU matmul),
        #      stored head-major in bf16 scratch that persists over query tiles.
        @pl.when(qi == 0)
        def _():
            xf = xkv_ref[...].astype(bf16)                             # (S, E)
            qkv = jnp.dot(xf, wqkv_ref[...],
                          preferred_element_type=jnp.float32) + bqkv_ref[...]

            def heads(lo):                                             # -> (H, S, D)
                return jnp.stack(
                    [qkv[:, lo + h * D: lo + (h + 1) * D] for h in range(H)],
                    axis=0)

            q3_ref[...] = heads(0 * E).astype(bf16)
            k3_ref[...] = heads(1 * E).astype(bf16)
            v3_ref[...] = heads(2 * E).astype(bf16)

        q_start = pl.multiple_of(qi * TQ, TQ)
        q3t = q3_ref[:, pl.ds(q_start, TQ), :]                         # (H, TQ, D) bf16
        k3 = k3_ref[...]                                               # (H, S, D)  bf16
        v3 = v3_ref[...]                                               # (H, S, D)  bf16

        # ---- content-content scores: batched-over-heads MXU matmul ----------
        attn1 = jnp.einsum('hqd,hkd->hqk', q3t, k3,
                           preferred_element_type=jnp.float32)          # (H,TQ,S)

        # ---- content-position scores via the NR-row table (no (S,S,D) tensor):
        #      one dense (H*TQ,D)@(D,NR) MXU matmul ...
        q2 = q3t.reshape(H * TQ, D)
        qt = jnp.dot(q2, rkT_ref[...],
                     preferred_element_type=jnp.float32).reshape(H, TQ, NR)

        # ... then skewed onto (TQ,S) with iota masks over the clipped offsets.
        row = lax.broadcasted_iota(jnp.int32, (TQ, S), 0) + qi * TQ
        col = lax.broadcasted_iota(jnp.int32, (TQ, S), 1)
        roff = jnp.clip(col - row, -RB, RB) + RB                        # in [0, NR)

        attn2 = jnp.zeros((H, TQ, S), jnp.float32)
        for r in range(NR):
            band = (roff == r).astype(jnp.float32)                      # (TQ, S)
            attn2 = attn2 + qt[:, :, r:r + 1] * band[None, :, :]

        # TODO(synk): attention_mask (masked_fill) path not implemented here.
        logits = (attn1 + attn2) * inv_scale
        mx = jnp.max(logits, axis=-1, keepdims=True)
        ex = jnp.exp(logits - mx)
        # exact normalization (p is returned to the caller as attention weights)
        p = ex * (1.0 / jnp.sum(ex, axis=-1, keepdims=True))
        attn_ref[...] = p.astype(attn_ref.dtype)

        # ---- context: p @ v (batched MXU) + band-summed p @ rel_v table -----
        p_b = p.astype(bf16)
        ctx = jnp.einsum('hqk,hkd->hqd', p_b, v3,
                         preferred_element_type=jnp.float32)             # (H,TQ,D)

        pb = jnp.concatenate(
            [jnp.sum(p * (roff == r).astype(jnp.float32)[None, :, :],
                     axis=-1, keepdims=True) for r in range(NR)],
            axis=-1)                                                     # (H,TQ,NR)
        ctx = ctx + jnp.dot(pb.reshape(H * TQ, NR).astype(bf16), rv_ref[...],
                            preferred_element_type=jnp.float32).reshape(H, TQ, D)

        # ---- merge heads (head-major cols) + single (TQ,E)@(E,E) output proj -
        ctx2 = jnp.concatenate([ctx[h] for h in range(H)], axis=-1)      # (TQ, E)
        attn_out = jnp.dot(ctx2.astype(bf16), wo_ref[...],
                           preferred_element_type=jnp.float32) + bo_ref[...]

        # ---- residual + LayerNorm (attention) --------------------------------
        h1 = _layernorm(xq_ref[...] + attn_out, g1_ref[...], be1_ref[...])

        # ---- FFN: GELU-tanh, (TQ,F) intermediate stays in VMEM ---------------
        ffh = _gelu_tanh(jnp.dot(h1.astype(bf16), wf1_ref[...],
                                 preferred_element_type=jnp.float32) + bf1_ref[...])
        ffo = jnp.dot(ffh.astype(bf16), wf2_ref[...],
                      preferred_element_type=jnp.float32) + bf2_ref[...]

        # ---- residual + final LayerNorm --------------------------------------
        # TODO(synk): fp16 overflow clamp branch not implemented (float32 path).
        y = _layernorm(h1 + ffo, g2_ref[...], be2_ref[...])
        y_ref[...] = y.astype(y_ref.dtype)

    return kernel


# ----------------------------------------------------------------------------
# Wrapper: single pallas_call for the whole layer
# ----------------------------------------------------------------------------

def _pick_q_tile(seq_len):
    if seq_len <= 256:
        return seq_len
    for tq in (256, 128, 64, 32, 16, 8):
        if seq_len % tq == 0:
            return tq
    return seq_len


def _vmem_limit_bytes():
    # v5e/v6e: raise well above the scoped default; v7x (64 MiB physical): ~54 MiB.
    try:
        cap = pltpu.get_tpu_info().vmem_capacity_bytes
        return min(int(cap * 0.85), 96 * 1024 * 1024)
    except Exception:
        return 64 * 1024 * 1024


def encoder_layer_forward(params, hidden_states, num_heads, *, weight_buffers=1):
    B, S, E = hidden_states.shape
    H = num_heads
    D = E // H
    F = params["ffn_w1"].shape[1]
    TQ = _pick_q_tile(S)
    NQ = S // TQ
    RB = min(MAX_REL_POS, S - 1)
    NR = 2 * RB + 1
    bf16 = jnp.bfloat16

    # bf16 MXU feeds for all weight matrices (biases / LN params stay f32).
    w_qkv = params["w_qkv"].astype(bf16)
    w_o = params["w_o"].astype(bf16)
    ffn_w1 = params["ffn_w1"].astype(bf16)
    ffn_w2 = params["ffn_w2"].astype(bf16)
    # Only the relative offsets that can occur for this S; key table pre-transposed
    # so the kernel does a plain (H*TQ,D)@(D,NR) matmul.
    lo, hi = MAX_REL_POS - RB, MAX_REL_POS + RB + 1
    rel_k_t = params["rel_k_table"][lo:hi].T.astype(bf16)    # (D, NR)
    rel_v = params["rel_v_table"][lo:hi].astype(bf16)        # (NR, D)

    sq = pl.Squeezed()

    def bcast_spec(shape):
        idx = lambda b, qi: (0,) * len(shape)
        if weight_buffers is None:
            return pl.BlockSpec(shape, idx)
        # Constant-index weights never change across the grid -> single-buffer.
        return pl.BlockSpec(shape, idx, pipeline_mode=pl.Buffered(weight_buffers))

    in_specs = [
        pl.BlockSpec((sq, TQ, E), lambda b, qi: (b, qi, 0)),   # x (query tile / residual)
        pl.BlockSpec((sq, S, E), lambda b, qi: (b, 0, 0)),     # x (full sequence for K/V)
        bcast_spec((E, 3 * E)),                                # packed Wqkv (bf16)
        bcast_spec((1, 3 * E)),                                # packed bqkv
        bcast_spec((D, NR)),                                   # rel-K table (transposed)
        bcast_spec((NR, D)),                                   # rel-V table
        bcast_spec((E, E)),                                    # Wo
        bcast_spec((1, E)),                                    # bo
        bcast_spec((1, E)),                                    # LN1 gamma
        bcast_spec((1, E)),                                    # LN1 beta
        bcast_spec((E, F)),                                    # FFN W1
        bcast_spec((1, F)),                                    # FFN b1
        bcast_spec((F, E)),                                    # FFN W2
        bcast_spec((1, E)),                                    # FFN b2
        bcast_spec((1, E)),                                    # LN2 gamma
        bcast_spec((1, E)),                                    # LN2 beta
    ]
    out_specs = (
        pl.BlockSpec((sq, TQ, E), lambda b, qi: (b, qi, 0)),
        pl.BlockSpec((sq, H, TQ, S), lambda b, qi: (b, 0, qi, 0)),
    )
    scratch_shapes = [
        pltpu.VMEM((H, S, D), bf16),   # Q (head-major), persists across query tiles
        pltpu.VMEM((H, S, D), bf16),   # K
        pltpu.VMEM((H, S, D), bf16),   # V
    ]

    kernel = _make_encoder_layer_kernel(H, D, E, S, TQ, RB)

    y, attn = pl.pallas_call(
        kernel,
        out_shape=(
            jax.ShapeDtypeStruct((B, S, E), hidden_states.dtype),
            jax.ShapeDtypeStruct((B, H, S, S), hidden_states.dtype),
        ),
        grid=(B, NQ),
        in_specs=in_specs,
        out_specs=out_specs,
        scratch_shapes=scratch_shapes,
        compiler_params=pltpu.CompilerParams(
            dimension_semantics=("parallel", "arbitrary"),
            vmem_limit_bytes=_vmem_limit_bytes(),
        ),
    )(
        hidden_states, hidden_states,
        w_qkv, params["b_qkv"].reshape(1, 3 * E),
        rel_k_t, rel_v,
        w_o, params["b_o"].reshape(1, E),
        params["ln1_gamma"].reshape(1, E), params["ln1_beta"].reshape(1, E),
        ffn_w1, params["ffn_b1"].reshape(1, F),
        ffn_w2, params["ffn_b2"].reshape(1, E),
        params["ln2_gamma"].reshape(1, E), params["ln2_beta"].reshape(1, E),
    )
    return y, attn


# ----------------------------------------------------------------------------
# Pure-JAX reference (mirrors the PyTorch forward) for a correctness check
# ----------------------------------------------------------------------------

def encoder_layer_reference(params, x, num_heads):
    B, S, E = x.shape
    D = E // num_heads
    r = jnp.arange(S)
    idx = jnp.clip(r[None, :] - r[:, None], -MAX_REL_POS, MAX_REL_POS) + MAX_REL_POS
    rel_k = params["rel_k_table"][idx]
    rel_v = params["rel_v_table"][idx]

    qkv = x.reshape(B * S, E) @ params["w_qkv"] + params["b_qkv"]
    q, k, v = jnp.split(qkv, 3, axis=-1)
    q = q.reshape(B, S, num_heads, D)
    k = k.reshape(B, S, num_heads, D)
    v = v.reshape(B, S, num_heads, D)

    attn1 = jnp.einsum('bihd,bjhd->bhij', q, k)
    attn2 = jnp.einsum('bihd,ijd->bhij', q, rel_k)
    p = jax.nn.softmax((attn1 + attn2) / math.sqrt(D), axis=-1)
    w1 = jnp.einsum('bhij,bjhd->bhid', p, v)
    w2 = jnp.einsum('bhij,ijd->bhid', p, rel_v)
    ctx = (w1 + w2).transpose(0, 2, 1, 3).reshape(B, S, E)
    attn_out = ctx @ params["w_o"] + params["b_o"]

    def ln(t, g, b):
        m = jnp.mean(t, -1, keepdims=True)
        var = jnp.mean((t - m) ** 2, -1, keepdims=True)
        return (t - m) / jnp.sqrt(var + 1e-5) * g + b

    h1 = ln(x + attn_out, params["ln1_gamma"], params["ln1_beta"])
    ff = _gelu_tanh(h1 @ params["ffn_w1"] + params["ffn_b1"]) @ params["ffn_w2"] + params["ffn_b2"]
    y = ln(h1 + ff, params["ln2_gamma"], params["ln2_beta"])
    return y, p


# ----------------------------------------------------------------------------
# Deterministic parameter init
# ----------------------------------------------------------------------------

def init_encoder_layer_params(key, embed_dim, num_heads, ffn_dim):
    head_dim = embed_dim // num_heads
    ks = jax.random.split(key, 6)
    std = 0.02
    return {
        "w_qkv": std * jax.random.normal(ks[0], (embed_dim, 3 * embed_dim), jnp.float32),
        "b_qkv": jnp.zeros((3 * embed_dim,), jnp.float32),
        "w_o": std * jax.random.normal(ks[1], (embed_dim, embed_dim), jnp.float32),
        "b_o": jnp.zeros((embed_dim,), jnp.float32),
        "rel_k_table": std * jax.random.normal(ks[2], (2 * MAX_REL_POS + 1, head_dim), jnp.float32),
        "rel_v_table": std * jax.random.normal(ks[3], (2 * MAX_REL_POS + 1, head_dim), jnp.float32),
        "ln1_gamma": jnp.ones((embed_dim,), jnp.float32),
        "ln1_beta": jnp.zeros((embed_dim,), jnp.float32),
        "ffn_w1": std * jax.random.normal(ks[4], (embed_dim, ffn_dim), jnp.float32),
        "ffn_b1": jnp.zeros((ffn_dim,), jnp.float32),
        "ffn_w2": std * jax.random.normal(ks[5], (ffn_dim, embed_dim), jnp.float32),
        "ffn_b2": jnp.zeros((embed_dim,), jnp.float32),
        "ln2_gamma": jnp.ones((embed_dim,), jnp.float32),
        "ln2_beta": jnp.zeros((embed_dim,), jnp.float32),
    }


# ----------------------------------------------------------------------------
# Main
# ----------------------------------------------------------------------------

if __name__ == "__main__":
    B, S, E, H, FFN = 2, 8, 32, 4, 64

    root = jax.random.PRNGKey(0)
    k_params, k_hidden = jax.random.split(root, 2)

    params = init_encoder_layer_params(k_params, E, H, FFN)
    hidden_states = jax.random.normal(k_hidden, (B, S, E), jnp.float32)

    try:
        fwd = jax.jit(functools.partial(encoder_layer_forward, num_heads=H,
                                        weight_buffers=1))
        out, attn_w = fwd(params, hidden_states)
        jax.block_until_ready((out, attn_w))
    except Exception:
        # Fallback if this JAX build rejects pl.Buffered(1) single-buffering.
        fwd = jax.jit(functools.partial(encoder_layer_forward, num_heads=H,
                                        weight_buffers=None))
        out, attn_w = fwd(params, hidden_states)
        jax.block_until_ready((out, attn_w))

    assert out.shape == (B, S, E)
    assert attn_w.shape == (B, H, S, S)
    assert bool(jnp.all(jnp.isfinite(out)))

    # correctness vs. pure-JAX f32 reference (kernel uses bf16 MXU feeds)
    ref_fwd = jax.jit(functools.partial(encoder_layer_reference, num_heads=H))
    ref_y, ref_attn = ref_fwd(params, hidden_states)
    jax.block_until_ready((ref_y, ref_attn))
    assert bool(jnp.allclose(out, ref_y, atol=5e-2, rtol=5e-2))
    assert bool(jnp.allclose(attn_w, ref_attn, atol=5e-2, rtol=5e-2))

    print("KERNEL_OK")
</pallas_src>

<mosaic_0001>
module attributes {stable_mosaic.version = 11 : i64} {
  func.func @kernel(%arg0: i32, %arg1: i32, %arg2: memref<1x8x32xf32, #tpu.memory_space<vmem>>, %arg3: memref<1x8x32xf32, #tpu.memory_space<vmem>>, %arg4: memref<32x96xbf16, #tpu.memory_space<vmem>>, %arg5: memref<1x96xf32, #tpu.memory_space<vmem>>, %arg6: memref<8x15xbf16, #tpu.memory_space<vmem>>, %arg7: memref<15x8xbf16, #tpu.memory_space<vmem>>, %arg8: memref<32x32xbf16, #tpu.memory_space<vmem>>, %arg9: memref<1x32xf32, #tpu.memory_space<vmem>>, %arg10: memref<1x32xf32, #tpu.memory_space<vmem>>, %arg11: memref<1x32xf32, #tpu.memory_space<vmem>>, %arg12: memref<32x64xbf16, #tpu.memory_space<vmem>>, %arg13: memref<1x64xf32, #tpu.memory_space<vmem>>, %arg14: memref<64x32xbf16, #tpu.memory_space<vmem>>, %arg15: memref<1x32xf32, #tpu.memory_space<vmem>>, %arg16: memref<1x32xf32, #tpu.memory_space<vmem>>, %arg17: memref<1x32xf32, #tpu.memory_space<vmem>>, %arg18: memref<1x8x32xf32, #tpu.memory_space<vmem>>, %arg19: memref<1x4x8x8xf32, #tpu.memory_space<vmem>>, %arg20: memref<4x8x8xbf16, #tpu.memory_space<vmem>>, %arg21: memref<4x8x8xbf16, #tpu.memory_space<vmem>>, %arg22: memref<4x8x8xbf16, #tpu.memory_space<vmem>>) attributes {dimension_semantics = [#tpu.dimension_semantics<parallel>, #tpu.dimension_semantics<arbitrary>], iteration_bounds = array<i64: 2, 1>, scalar_prefetch = 0 : i64, scratch_operands = 3 : i64, tpu.core_type = #tpu.core_type<tc>, window_params = [{transform_indices = @transform_0, window_bounds = array<i64: 1, 8, 32>}, {transform_indices = @transform_1, window_bounds = array<i64: 1, 8, 32>}, {pipeline_mode = #tpu.pipeline_mode<synchronous>, transform_indices = @transform_2, window_bounds = array<i64: 32, 96>}, {pipeline_mode = #tpu.pipeline_mode<synchronous>, transform_indices = @transform_3, window_bounds = array<i64: 1, 96>}, {pipeline_mode = #tpu.pipeline_mode<synchronous>, transform_indices = @transform_4, window_bounds = array<i64: 8, 15>}, {pipeline_mode = #tpu.pipeline_mode<synchronous>, transform_indices = @transform_5, window_bounds = array<i64: 15, 8>}, {pipeline_mode = #tpu.pipeline_mode<synchronous>, transform_indices = @transform_6, window_bounds = array<i64: 32, 32>}, {pipeline_mode = #tpu.pipeline_mode<synchronous>, transform_indices = @transform_7, window_bounds = array<i64: 1, 32>}, {pipeline_mode = #tpu.pipeline_mode<synchronous>, transform_indices = @transform_8, window_bounds = array<i64: 1, 32>}, {pipeline_mode = #tpu.pipeline_mode<synchronous>, transform_indices = @transform_9, window_bounds = array<i64: 1, 32>}, {pipeline_mode = #tpu.pipeline_mode<synchronous>, transform_indices = @transform_10, window_bounds = array<i64: 32, 64>}, {pipeline_mode = #tpu.pipeline_mode<synchronous>, transform_indices = @transform_11, window_bounds = array<i64: 1, 64>}, {pipeline_mode = #tpu.pipeline_mode<synchronous>, transform_indices = @transform_12, window_bounds = array<i64: 64, 32>}, {pipeline_mode = #tpu.pipeline_mode<synchronous>, transform_indices = @transform_13, window_bounds = array<i64: 1, 32>}, {pipeline_mode = #tpu.pipeline_mode<synchronous>, transform_indices = @transform_14, window_bounds = array<i64: 1, 32>}, {pipeline_mode = #tpu.pipeline_mode<synchronous>, transform_indices = @transform_15, window_bounds = array<i64: 1, 32>}, {transform_indices = @transform_16, window_bounds = array<i64: 1, 8, 32>}, {transform_indices = @transform_17, window_bounds = array<i64: 1, 4, 8, 8>}]} {
    %c0_i32 = arith.constant 0 : i32
    %0 = arith.cmpi eq, %arg1, %c0_i32 : i32
    %1 = arith.extui %0 : i1 to i32
    %c0_i32_0 = arith.constant 0 : i32
    %2 = arith.cmpi ne, %1, %c0_i32_0 : i32
    scf.if %2 {
      %c0_102 = arith.constant 0 : index
      %c0_103 = arith.constant 0 : index
      %c0_104 = arith.constant 0 : index
      %433 = vector.load %arg3[%c0_102, %c0_103, %c0_104] : memref<1x8x32xf32, #tpu.memory_space<vmem>>, vector<1x8x32xf32>
      %434 = vector.shape_cast %433 : vector<1x8x32xf32> to vector<8x32xf32>
      %435 = arith.truncf %434 : vector<8x32xf32> to vector<8x32xbf16>
      %c0_105 = arith.constant 0 : index
      %c0_106 = arith.constant 0 : index
      %436 = vector.load %arg4[%c0_105, %c0_106] : memref<32x96xbf16, #tpu.memory_space<vmem>>, vector<32x96xbf16>
      %cst_107 = arith.constant dense<0.000000e+00> : vector<8x96xf32>
      %437 = tpu.matmul %435, %436, %cst_107 {dimension_numbers = #tpu.dot_dimension_numbers<[1], [0], [0], [1], [0, 0, 1, 1], [], []>} : vector<8x32xbf16>, vector<32x96xbf16>, vector<8x96xf32> -> vector<8x96xf32>
      %c0_108 = arith.constant 0 : index
      %c0_109 = arith.constant 0 : index
      %438 = vector.load %arg5[%c0_108, %c0_109] : memref<1x96xf32, #tpu.memory_space<vmem>>, vector<1x96xf32>
      %439 = vector.broadcast %438 : vector<1x96xf32> to vector<8x96xf32>
      %440 = arith.addf %437, %439 : vector<8x96xf32>
      %441 = vector.extract_strided_slice %440 {offsets = [0, 0], sizes = [8, 8], strides = [1, 1]} : vector<8x96xf32> to vector<8x8xf32>
      %442 = vector.extract_strided_slice %440 {offsets = [0, 8], sizes = [8, 8], strides = [1, 1]} : vector<8x96xf32> to vector<8x8xf32>
      %443 = vector.extract_strided_slice %440 {offsets = [0, 16], sizes = [8, 8], strides = [1, 1]} : vector<8x96xf32> to vector<8x8xf32>
      %444 = vector.extract_strided_slice %440 {offsets = [0, 24], sizes = [8, 8], strides = [1, 1]} : vector<8x96xf32> to vector<8x8xf32>
      %445 = vector.shape_cast %441 : vector<8x8xf32> to vector<1x8x8xf32>
      %446 = vector.shape_cast %442 : vector<8x8xf32> to vector<1x8x8xf32>
      %447 = vector.shape_cast %443 : vector<8x8xf32> to vector<1x8x8xf32>
      %448 = vector.shape_cast %444 : vector<8x8xf32> to vector<1x8x8xf32>
      %449 = tpu.concatenate %445, %446, %447, %448 in 0 : vector<1x8x8xf32>, vector<1x8x8xf32>, vector<1x8x8xf32>, vector<1x8x8xf32> -> vector<4x8x8xf32>
      %450 = arith.truncf %449 : vector<4x8x8xf32> to vector<4x8x8xbf16>
      %c0_110 = arith.constant 0 : index
      %c0_111 = arith.constant 0 : index
      %c0_112 = arith.constant 0 : index
      %451 = vector.load %arg20[%c0_110, %c0_111, %c0_112] : memref<4x8x8xbf16, #tpu.memory_space<vmem>>, vector<4x8x8xbf16>
      tpu.vector_store %arg20[%c0_110, %c0_111, %c0_112], %450 {strides = array<i32>} : memref<4x8x8xbf16, #tpu.memory_space<vmem>>, vector<4x8x8xbf16>,
      %452 = vector.extract_strided_slice %440 {offsets = [0, 32], sizes = [8, 8], strides = [1, 1]} : vector<8x96xf32> to vector<8x8xf32>
      %453 = vector.extract_strided_slice %440 {offsets = [0, 40], sizes = [8, 8], strides = [1, 1]} : vector<8x96xf32> to vector<8x8xf32>
      %454 = vector.extract_strided_slice %440 {offsets = [0, 48], sizes = [8, 8], strides = [1, 1]} : vector<8x96xf32> to vector<8x8xf32>
      %455 = vector.extract_strided_slice %440 {offsets = [0, 56], sizes = [8, 8], strides = [1, 1]} : vector<8x96xf32> to vector<8x8xf32>
      %456 = vector.shape_cast %452 : vector<8x8xf32> to vector<1x8x8xf32>
      %457 = vector.shape_cast %453 : vector<8x8xf32> to vector<1x8x8xf32>
      %458 = vector.shape_cast %454 : vector<8x8xf32> to vector<1x8x8xf32>
      %459 = vector.shape_cast %455 : vector<8x8xf32> to vector<1x8x8xf32>
      %460 = tpu.concatenate %456, %457, %458, %459 in 0 : vector<1x8x8xf32>, vector<1x8x8xf32>, vector<1x8x8xf32>, vector<1x8x8xf32> -> vector<4x8x8xf32>
      %461 = arith.truncf %460 : vector<4x8x8xf32> to vector<4x8x8xbf16>
      %c0_113 = arith.constant 0 : index
      %c0_114 = arith.constant 0 : index
      %c0_115 = arith.constant 0 : index
      %462 = vector.load %arg21[%c0_113, %c0_114, %c0_115] : memref<4x8x8xbf16, #tpu.memory_space<vmem>>, vector<4x8x8xbf16>
      tpu.vector_store %arg21[%c0_113, %c0_114, %c0_115], %461 {strides = array<i32>} : memref<4x8x8xbf16, #tpu.memory_space<vmem>>, vector<4x8x8xbf16>,
      %463 = vector.extract_strided_slice %440 {offsets = [0, 64], sizes = [8, 8], strides = [1, 1]} : vector<8x96xf32> to vector<8x8xf32>
      %464 = vector.extract_strided_slice %440 {offsets = [0, 72], sizes = [8, 8], strides = [1, 1]} : vector<8x96xf32> to vector<8x8xf32>
      %465 = vector.extract_strided_slice %440 {offsets = [0, 80], sizes = [8, 8], strides = [1, 1]} : vector<8x96xf32> to vector<8x8xf32>
      %466 = vector.extract_strided_slice %440 {offsets = [0, 88], sizes = [8, 8], strides = [1, 1]} : vector<8x96xf32> to vector<8x8xf32>
      %467 = vector.shape_cast %463 : vector<8x8xf32> to vector<1x8x8xf32>
      %468 = vector.shape_cast %464 : vector<8x8xf32> to vector<1x8x8xf32>
      %469 = vector.shape_cast %465 : vector<8x8xf32> to vector<1x8x8xf32>
      %470 = vector.shape_cast %466 : vector<8x8xf32> to vector<1x8x8xf32>
      %471 = tpu.concatenate %467, %468, %469, %470 in 0 : vector<1x8x8xf32>, vector<1x8x8xf32>, vector<1x8x8xf32>, vector<1x8x8xf32> -> vector<4x8x8xf32>
      %472 = arith.truncf %471 : vector<4x8x8xf32> to vector<4x8x8xbf16>
      %c0_116 = arith.constant 0 : index
      %c0_117 = arith.constant 0 : index
      %c0_118 = arith.constant 0 : index
      %473 = vector.load %arg22[%c0_116, %c0_117, %c0_118] : memref<4x8x8xbf16, #tpu.memory_space<vmem>>, vector<4x8x8xbf16>
      tpu.vector_store %arg22[%c0_116, %c0_117, %c0_118], %472 {strides = array<i32>} : memref<4x8x8xbf16, #tpu.memory_space<vmem>>, vector<4x8x8xbf16>,
    } else {
    }
    %c8_i32 = arith.constant 8 : i32
    %3 = arith.muli %arg1, %c8_i32 : i32
    %4 = tpu.assume_multiple %3, 8 : i32
    %c0 = arith.constant 0 : index
    %5 = arith.index_cast %4 : i32 to index
    %c0_1 = arith.constant 0 : index
    %6 = vector.load %arg20[%c0, %5, %c0_1] : memref<4x8x8xbf16, #tpu.memory_space<vmem>>, vector<4x8x8xbf16>
    %c0_2 = arith.constant 0 : index
    %c0_3 = arith.constant 0 : index
    %c0_4 = arith.constant 0 : index
    %7 = vector.load %arg21[%c0_2, %c0_3, %c0_4] : memref<4x8x8xbf16, #tpu.memory_space<vmem>>, vector<4x8x8xbf16>
    %c0_5 = arith.constant 0 : index
    %c0_6 = arith.constant 0 : index
    %c0_7 = arith.constant 0 : index
    %8 = vector.load %arg22[%c0_5, %c0_6, %c0_7] : memref<4x8x8xbf16, #tpu.memory_space<vmem>>, vector<4x8x8xbf16>
    "tpu.trace_start"() <{level = 10 : i32, message = "hqd,hkd->hqk"}> : () -> ()
    %cst = arith.constant dense<0.000000e+00> : vector<4x8x8xf32>
    %9 = tpu.matmul %6, %7, %cst {dimension_numbers = #tpu.dot_dimension_numbers<[2], [2], [1], [1], [0, 0, 0, 1, 1, 1], [0], [0]>} : vector<4x8x8xbf16>, vector<4x8x8xbf16>, vector<4x8x8xf32> -> vector<4x8x8xf32>
    "tpu.trace_stop"() : () -> ()
    %10 = vector.shape_cast %6 : vector<4x8x8xbf16> to vector<32x8xbf16>
    %c0_8 = arith.constant 0 : index
    %c0_9 = arith.constant 0 : index
    %11 = vector.load %arg6[%c0_8, %c0_9] : memref<8x15xbf16, #tpu.memory_space<vmem>>, vector<8x15xbf16>
    %cst_10 = arith.constant dense<0.000000e+00> : vector<32x15xf32>
    %12 = tpu.matmul %10, %11, %cst_10 {dimension_numbers = #tpu.dot_dimension_numbers<[1], [0], [0], [1], [0, 0, 1, 1], [], []>} : vector<32x8xbf16>, vector<8x15xbf16>, vector<32x15xf32> -> vector<32x15xf32>
    %13 = vector.shape_cast %12 : vector<32x15xf32> to vector<4x8x15xf32>
    %14 = tpu.iota {dimensions = array<i32: 0>} : vector<8x8xi32>
    %c8_i32_11 = arith.constant 8 : i32
    %15 = arith.muli %arg1, %c8_i32_11 : i32
    %16 = vector.broadcast %15 : i32 to vector<8x8xi32>
    %17 = arith.addi %14, %16 : vector<8x8xi32>
    %18 = tpu.iota {dimensions = array<i32: 1>} : vector<8x8xi32>
    %19 = arith.subi %18, %17 : vector<8x8xi32>
    %c-7_i32 = arith.constant -7 : i32
    %c7_i32 = arith.constant 7 : i32
    %20 = vector.broadcast %c-7_i32 : i32 to vector<8x8xi32>
    %21 = arith.maxsi %20, %19 : vector<8x8xi32>
    %22 = vector.broadcast %c7_i32 : i32 to vector<8x8xi32>
    %23 = arith.minsi %22, %21 : vector<8x8xi32>
    %c7_i32_12 = arith.constant 7 : i32
    %24 = vector.broadcast %c7_i32_12 : i32 to vector<8x8xi32>
    %25 = arith.addi %23, %24 : vector<8x8xi32>
    %cst_13 = arith.constant 0.000000e+00 : f32
    %26 = vector.broadcast %cst_13 : f32 to vector<4x8x8xf32>
    %c0_i32_14 = arith.constant 0 : i32
    %27 = vector.broadcast %c0_i32_14 : i32 to vector<8x8xi32>
    %28 = arith.cmpi eq, %25, %27 : vector<8x8xi32>
    %29 = arith.extui %28 : vector<8x8xi1> to vector<8x8xi32>
    %30 = arith.sitofp %29 : vector<8x8xi32> to vector<8x8xf32>
    %31 = vector.extract_strided_slice %13 {offsets = [0, 0, 0], sizes = [4, 8, 1], strides = [1, 1, 1]} : vector<4x8x15xf32> to vector<4x8x1xf32>
    %32 = vector.shape_cast %30 : vector<8x8xf32> to vector<1x8x8xf32>
    %33 = vector.broadcast %31 : vector<4x8x1xf32> to vector<4x8x8xf32>
    %34 = vector.broadcast %32 : vector<1x8x8xf32> to vector<4x8x8xf32>
    %35 = arith.mulf %33, %34 : vector<4x8x8xf32>
    %36 = arith.addf %26, %35 : vector<4x8x8xf32>
    %c1_i32 = arith.constant 1 : i32
    %37 = vector.broadcast %c1_i32 : i32 to vector<8x8xi32>
    %38 = arith.cmpi eq, %25, %37 : vector<8x8xi32>
    %39 = arith.extui %38 : vector<8x8xi1> to vector<8x8xi32>
    %40 = arith.sitofp %39 : vector<8x8xi32> to vector<8x8xf32>
    %41 = vector.extract_strided_slice %13 {offsets = [0, 0, 1], sizes = [4, 8, 1], strides = [1, 1, 1]} : vector<4x8x15xf32> to vector<4x8x1xf32>
    %42 = vector.shape_cast %40 : vector<8x8xf32> to vector<1x8x8xf32>
    %43 = vector.broadcast %41 : vector<4x8x1xf32> to vector<4x8x8xf32>
    %44 = vector.broadcast %42 : vector<1x8x8xf32> to vector<4x8x8xf32>
    %45 = arith.mulf %43, %44 : vector<4x8x8xf32>
    %46 = arith.addf %36, %45 : vector<4x8x8xf32>
    %c2_i32 = arith.constant 2 : i32
    %47 = vector.broadcast %c2_i32 : i32 to vector<8x8xi32>
    %48 = arith.cmpi eq, %25, %47 : vector<8x8xi32>
    %49 = arith.extui %48 : vector<8x8xi1> to vector<8x8xi32>
    %50 = arith.sitofp %49 : vector<8x8xi32> to vector<8x8xf32>
    %51 = vector.extract_strided_slice %13 {offsets = [0, 0, 2], sizes = [4, 8, 1], strides = [1, 1, 1]} : vector<4x8x15xf32> to vector<4x8x1xf32>
    %52 = vector.shape_cast %50 : vector<8x8xf32> to vector<1x8x8xf32>
    %53 = vector.broadcast %51 : vector<4x8x1xf32> to vector<4x8x8xf32>
    %54 = vector.broadcast %52 : vector<1x8x8xf32> to vector<4x8x8xf32>
    %55 = arith.mulf %53, %54 : vector<4x8x8xf32>
    %56 = arith.addf %46, %55 : vector<4x8x8xf32>
    %c3_i32 = arith.constant 3 : i32
    %57 = vector.broadcast %c3_i32 : i32 to vector<8x8xi32>
    %58 = arith.cmpi eq, %25, %57 : vector<8x8xi32>
    %59 = arith.extui %58 : vector<8x8xi1> to vector<8x8xi32>
    %60 = arith.sitofp %59 : vector<8x8xi32> to vector<8x8xf32>
    %61 = vector.extract_strided_slice %13 {offsets = [0, 0, 3], sizes = [4, 8, 1], strides = [1, 1, 1]} : vector<4x8x15xf32> to vector<4x8x1xf32>
    %62 = vector.shape_cast %60 : vector<8x8xf32> to vector<1x8x8xf32>
    %63 = vector.broadcast %61 : vector<4x8x1xf32> to vector<4x8x8xf32>
    %64 = vector.broadcast %62 : vector<1x8x8xf32> to vector<4x8x8xf32>
    %65 = arith.mulf %63, %64 : vector<4x8x8xf32>
    %66 = arith.addf %56, %65 : vector<4x8x8xf32>
    %c4_i32 = arith.constant 4 : i32
    %67 = vector.broadcast %c4_i32 : i32 to vector<8x8xi32>
    %68 = arith.cmpi eq, %25, %67 : vector<8x8xi32>
    %69 = arith.extui %68 : vector<8x8xi1> to vector<8x8xi32>
    %70 = arith.sitofp %69 : vector<8x8xi32> to vector<8x8xf32>
    %71 = vector.extract_strided_slice %13 {offsets = [0, 0, 4], sizes = [4, 8, 1], strides = [1, 1, 1]} : vector<4x8x15xf32> to vector<4x8x1xf32>
    %72 = vector.shape_cast %70 : vector<8x8xf32> to vector<1x8x8xf32>
    %73 = vector.broadcast %71 : vector<4x8x1xf32> to vector<4x8x8xf32>
    %74 = vector.broadcast %72 : vector<1x8x8xf32> to vector<4x8x8xf32>
    %75 = arith.mulf %73, %74 : vector<4x8x8xf32>
    %76 = arith.addf %66, %75 : vector<4x8x8xf32>
    %c5_i32 = arith.constant 5 : i32
    %77 = vector.broadcast %c5_i32 : i32 to vector<8x8xi32>
    %78 = arith.cmpi eq, %25, %77 : vector<8x8xi32>
    %79 = arith.extui %78 : vector<8x8xi1> to vector<8x8xi32>
    %80 = arith.sitofp %79 : vector<8x8xi32> to vector<8x8xf32>
    %81 = vector.extract_strided_slice %13 {offsets = [0, 0, 5], sizes = [4, 8, 1], strides = [1, 1, 1]} : vector<4x8x15xf32> to vector<4x8x1xf32>
    %82 = vector.shape_cast %80 : vector<8x8xf32> to vector<1x8x8xf32>
    %83 = vector.broadcast %81 : vector<4x8x1xf32> to vector<4x8x8xf32>
    %84 = vector.broadcast %82 : vector<1x8x8xf32> to vector<4x8x8xf32>
    %85 = arith.mulf %83, %84 : vector<4x8x8xf32>
    %86 = arith.addf %76, %85 : vector<4x8x8xf32>
    %c6_i32 = arith.constant 6 : i32
    %87 = vector.broadcast %c6_i32 : i32 to vector<8x8xi32>
    %88 = arith.cmpi eq, %25, %87 : vector<8x8xi32>
    %89 = arith.extui %88 : vector<8x8xi1> to vector<8x8xi32>
    %90 = arith.sitofp %89 : vector<8x8xi32> to vector<8x8xf32>
    %91 = vector.extract_strided_slice %13 {offsets = [0, 0, 6], sizes = [4, 8, 1], strides = [1, 1, 1]} : vector<4x8x15xf32> to vector<4x8x1xf32>
    %92 = vector.shape_cast %90 : vector<8x8xf32> to vector<1x8x8xf32>
    %93 = vector.broadcast %91 : vector<4x8x1xf32> to vector<4x8x8xf32>
    %94 = vector.broadcast %92 : vector<1x8x8xf32> to vector<4x8x8xf32>
    %95 = arith.mulf %93, %94 : vector<4x8x8xf32>
    %96 = arith.addf %86, %95 : vector<4x8x8xf32>
    %c7_i32_15 = arith.constant 7 : i32
    %97 = vector.broadcast %c7_i32_15 : i32 to vector<8x8xi32>
    %98 = arith.cmpi eq, %25, %97 : vector<8x8xi32>
    %99 = arith.extui %98 : vector<8x8xi1> to vector<8x8xi32>
    %100 = arith.sitofp %99 : vector<8x8xi32> to vector<8x8xf32>
    %101 = vector.extract_strided_slice %13 {offsets = [0, 0, 7], sizes = [4, 8, 1], strides = [1, 1, 1]} : vector<4x8x15xf32> to vector<4x8x1xf32>
    %102 = vector.shape_cast %100 : vector<8x8xf32> to vector<1x8x8xf32>
    %103 = vector.broadcast %101 : vector<4x8x1xf32> to vector<4x8x8xf32>
    %104 = vector.broadcast %102 : vector<1x8x8xf32> to vector<4x8x8xf32>
    %105 = arith.mulf %103, %104 : vector<4x8x8xf32>
    %106 = arith.addf %96, %105 : vector<4x8x8xf32>
    %c8_i32_16 = arith.constant 8 : i32
    %107 = vector.broadcast %c8_i32_16 : i32 to vector<8x8xi32>
    %108 = arith.cmpi eq, %25, %107 : vector<8x8xi32>
    %109 = arith.extui %108 : vector<8x8xi1> to vector<8x8xi32>
    %110 = arith.sitofp %109 : vector<8x8xi32> to vector<8x8xf32>
    %111 = vector.extract_strided_slice %13 {offsets = [0, 0, 8], sizes = [4, 8, 1], strides = [1, 1, 1]} : vector<4x8x15xf32> to vector<4x8x1xf32>
    %112 = vector.shape_cast %110 : vector<8x8xf32> to vector<1x8x8xf32>
    %113 = vector.broadcast %111 : vector<4x8x1xf32> to vector<4x8x8xf32>
    %114 = vector.broadcast %112 : vector<1x8x8xf32> to vector<4x8x8xf32>
    %115 = arith.mulf %113, %114 : vector<4x8x8xf32>
    %116 = arith.addf %106, %115 : vector<4x8x8xf32>
    %c9_i32 = arith.constant 9 : i32
    %117 = vector.broadcast %c9_i32 : i32 to vector<8x8xi32>
    %118 = arith.cmpi eq, %25, %117 : vector<8x8xi32>
    %119 = arith.extui %118 : vector<8x8xi1> to vector<8x8xi32>
    %120 = arith.sitofp %119 : vector<8x8xi32> to vector<8x8xf32>
    %121 = vector.extract_strided_slice %13 {offsets = [0, 0, 9], sizes = [4, 8, 1], strides = [1, 1, 1]} : vector<4x8x15xf32> to vector<4x8x1xf32>
    %122 = vector.shape_cast %120 : vector<8x8xf32> to vector<1x8x8xf32>
    %123 = vector.broadcast %121 : vector<4x8x1xf32> to vector<4x8x8xf32>
    %124 = vector.broadcast %122 : vector<1x8x8xf32> to vector<4x8x8xf32>
    %125 = arith.mulf %123, %124 : vector<4x8x8xf32>
    %126 = arith.addf %116, %125 : vector<4x8x8xf32>
    %c10_i32 = arith.constant 10 : i32
    %127 = vector.broadcast %c10_i32 : i32 to vector<8x8xi32>
    %128 = arith.cmpi eq, %25, %127 : vector<8x8xi32>
    %129 = arith.extui %128 : vector<8x8xi1> to vector<8x8xi32>
    %130 = arith.sitofp %129 : vector<8x8xi32> to vector<8x8xf32>
    %131 = vector.extract_strided_slice %13 {offsets = [0, 0, 10], sizes = [4, 8, 1], strides = [1, 1, 1]} : vector<4x8x15xf32> to vector<4x8x1xf32>
    %132 = vector.shape_cast %130 : vector<8x8xf32> to vector<1x8x8xf32>
    %133 = vector.broadcast %131 : vector<4x8x1xf32> to vector<4x8x8xf32>
    %134 = vector.broadcast %132 : vector<1x8x8xf32> to vector<4x8x8xf32>
    %135 = arith.mulf %133, %134 : vector<4x8x8xf32>
    %136 = arith.addf %126, %135 : vector<4x8x8xf32>
    %c11_i32 = arith.constant 11 : i32
    %137 = vector.broadcast %c11_i32 : i32 to vector<8x8xi32>
    %138 = arith.cmpi eq, %25, %137 : vector<8x8xi32>
    %139 = arith.extui %138 : vector<8x8xi1> to vector<8x8xi32>
    %140 = arith.sitofp %139 : vector<8x8xi32> to vector<8x8xf32>
    %141 = vector.extract_strided_slice %13 {offsets = [0, 0, 11], sizes = [4, 8, 1], strides = [1, 1, 1]} : vector<4x8x15xf32> to vector<4x8x1xf32>
    %142 = vector.shape_cast %140 : vector<8x8xf32> to vector<1x8x8xf32>
    %143 = vector.broadcast %141 : vector<4x8x1xf32> to vector<4x8x8xf32>
    %144 = vector.broadcast %142 : vector<1x8x8xf32> to vector<4x8x8xf32>
    %145 = arith.mulf %143, %144 : vector<4x8x8xf32>
    %146 = arith.addf %136, %145 : vector<4x8x8xf32>
    %c12_i32 = arith.constant 12 : i32
    %147 = vector.broadcast %c12_i32 : i32 to vector<8x8xi32>
    %148 = arith.cmpi eq, %25, %147 : vector<8x8xi32>
    %149 = arith.extui %148 : vector<8x8xi1> to vector<8x8xi32>
    %150 = arith.sitofp %149 : vector<8x8xi32> to vector<8x8xf32>
    %151 = vector.extract_strided_slice %13 {offsets = [0, 0, 12], sizes = [4, 8, 1], strides = [1, 1, 1]} : vector<4x8x15xf32> to vector<4x8x1xf32>
    %152 = vector.shape_cast %150 : vector<8x8xf32> to vector<1x8x8xf32>
    %153 = vector.broadcast %151 : vector<4x8x1xf32> to vector<4x8x8xf32>
    %154 = vector.broadcast %152 : vector<1x8x8xf32> to vector<4x8x8xf32>
    %155 = arith.mulf %153, %154 : vector<4x8x8xf32>
    %156 = arith.addf %146, %155 : vector<4x8x8xf32>
    %c13_i32 = arith.constant 13 : i32
    %157 = vector.broadcast %c13_i32 : i32 to vector<8x8xi32>
    %158 = arith.cmpi eq, %25, %157 : vector<8x8xi32>
    %159 = arith.extui %158 : vector<8x8xi1> to vector<8x8xi32>
    %160 = arith.sitofp %159 : vector<8x8xi32> to vector<8x8xf32>
    %161 = vector.extract_strided_slice %13 {offsets = [0, 0, 13], sizes = [4, 8, 1], strides = [1, 1, 1]} : vector<4x8x15xf32> to vector<4x8x1xf32>
    %162 = vector.shape_cast %160 : vector<8x8xf32> to vector<1x8x8xf32>
    %163 = vector.broadcast %161 : vector<4x8x1xf32> to vector<4x8x8xf32>
    %164 = vector.broadcast %162 : vector<1x8x8xf32> to vector<4x8x8xf32>
    %165 = arith.mulf %163, %164 : vector<4x8x8xf32>
    %166 = arith.addf %156, %165 : vector<4x8x8xf32>
    %c14_i32 = arith.constant 14 : i32
    %167 = vector.broadcast %c14_i32 : i32 to vector<8x8xi32>
    %168 = arith.cmpi eq, %25, %167 : vector<8x8xi32>
    %169 = arith.extui %168 : vector<8x8xi1> to vector<8x8xi32>
    %170 = arith.sitofp %169 : vector<8x8xi32> to vector<8x8xf32>
    %171 = vector.extract_strided_slice %13 {offsets = [0, 0, 14], sizes = [4, 8, 1], strides = [1, 1, 1]} : vector<4x8x15xf32> to vector<4x8x1xf32>
    %172 = vector.shape_cast %170 : vector<8x8xf32> to vector<1x8x8xf32>
    %173 = vector.broadcast %171 : vector<4x8x1xf32> to vector<4x8x8xf32>
    %174 = vector.broadcast %172 : vector<1x8x8xf32> to vector<4x8x8xf32>
    %175 = arith.mulf %173, %174 : vector<4x8x8xf32>
    %176 = arith.addf %166, %175 : vector<4x8x8xf32>
    %177 = arith.addf %9, %176 : vector<4x8x8xf32>
    %cst_17 = arith.constant 0.353553385 : f32
    %178 = vector.broadcast %cst_17 : f32 to vector<4x8x8xf32>
    %179 = arith.mulf %177, %178 : vector<4x8x8xf32>
    %cst_18 = arith.constant dense<0xFF800000> : vector<4x8xf32>
    %180 = vector.multi_reduction <maximumf>, %179, %cst_18 [2] : vector<4x8x8xf32> to vector<4x8xf32>
    %181 = vector.shape_cast %180 : vector<4x8xf32> to vector<4x8x1xf32>
    %182 = vector.broadcast %181 : vector<4x8x1xf32> to vector<4x8x8xf32>
    %183 = arith.subf %179, %182 : vector<4x8x8xf32>
    %184 = math.exp %183 : vector<4x8x8xf32>
    %cst_19 = arith.constant dense<0.000000e+00> : vector<4x8xf32>
    %185 = vector.multi_reduction <add>, %184, %cst_19 [2] : vector<4x8x8xf32> to vector<4x8xf32>
    %186 = vector.shape_cast %185 : vector<4x8xf32> to vector<4x8x1xf32>
    %cst_20 = arith.constant 1.000000e+00 : f32
    %187 = vector.broadcast %cst_20 : f32 to vector<4x8x1xf32>
    %188 = arith.divf %187, %186 : vector<4x8x1xf32>
    %189 = vector.broadcast %188 : vector<4x8x1xf32> to vector<4x8x8xf32>
    %190 = arith.mulf %184, %189 : vector<4x8x8xf32>
    %c0_21 = arith.constant 0 : index
    %c0_22 = arith.constant 0 : index
    %c0_23 = arith.constant 0 : index
    %c0_24 = arith.constant 0 : index
    %191 = vector.load %arg19[%c0_21, %c0_22, %c0_23, %c0_24] : memref<1x4x8x8xf32, #tpu.memory_space<vmem>>, vector<1x4x8x8xf32>
    %192 = vector.shape_cast %191 : vector<1x4x8x8xf32> to vector<4x8x8xf32>
    %193 = vector.shape_cast %190 : vector<4x8x8xf32> to vector<1x4x8x8xf32>
    tpu.vector_store %arg19[%c0_21, %c0_22, %c0_23, %c0_24], %193 {strides = array<i32>} : memref<1x4x8x8xf32, #tpu.memory_space<vmem>>, vector<1x4x8x8xf32>,
    %194 = arith.truncf %190 : vector<4x8x8xf32> to vector<4x8x8xbf16>
    "tpu.trace_start"() <{level = 10 : i32, message = "hqk,hkd->hqd"}> : () -> ()
    %cst_25 = arith.constant dense<0.000000e+00> : vector<4x8x8xf32>
    %195 = tpu.matmul %194, %8, %cst_25 {dimension_numbers = #tpu.dot_dimension_numbers<[2], [1], [1], [2], [0, 0, 0, 1, 1, 2], [0], [0]>} : vector<4x8x8xbf16>, vector<4x8x8xbf16>, vector<4x8x8xf32> -> vector<4x8x8xf32>
    %c0_i32_26 = arith.constant 0 : i32
    "tpu.trace_stop"() : () -> ()
    %196 = vector.broadcast %c0_i32_26 : i32 to vector<8x8xi32>
    %197 = arith.cmpi eq, %25, %196 : vector<8x8xi32>
    %198 = arith.extui %197 : vector<8x8xi1> to vector<8x8xi32>
    %199 = arith.sitofp %198 : vector<8x8xi32> to vector<8x8xf32>
    %200 = vector.shape_cast %199 : vector<8x8xf32> to vector<1x8x8xf32>
    %201 = vector.broadcast %200 : vector<1x8x8xf32> to vector<4x8x8xf32>
    %202 = arith.mulf %190, %201 : vector<4x8x8xf32>
    %cst_27 = arith.constant dense<0.000000e+00> : vector<4x8xf32>
    %203 = vector.multi_reduction <add>, %202, %cst_27 [2] : vector<4x8x8xf32> to vector<4x8xf32>
    %204 = vector.shape_cast %203 : vector<4x8xf32> to vector<4x8x1xf32>
    %c1_i32_28 = arith.constant 1 : i32
    %205 = vector.broadcast %c1_i32_28 : i32 to vector<8x8xi32>
    %206 = arith.cmpi eq, %25, %205 : vector<8x8xi32>
    %207 = arith.extui %206 : vector<8x8xi1> to vector<8x8xi32>
    %208 = arith.sitofp %207 : vector<8x8xi32> to vector<8x8xf32>
    %209 = vector.shape_cast %208 : vector<8x8xf32> to vector<1x8x8xf32>
    %210 = vector.broadcast %209 : vector<1x8x8xf32> to vector<4x8x8xf32>
    %211 = arith.mulf %190, %210 : vector<4x8x8xf32>
    %cst_29 = arith.constant dense<0.000000e+00> : vector<4x8xf32>
    %212 = vector.multi_reduction <add>, %211, %cst_29 [2] : vector<4x8x8xf32> to vector<4x8xf32>
    %213 = vector.shape_cast %212 : vector<4x8xf32> to vector<4x8x1xf32>
    %c2_i32_30 = arith.constant 2 : i32
    %214 = vector.broadcast %c2_i32_30 : i32 to vector<8x8xi32>
    %215 = arith.cmpi eq, %25, %214 : vector<8x8xi32>
    %216 = arith.extui %215 : vector<8x8xi1> to vector<8x8xi32>
    %217 = arith.sitofp %216 : vector<8x8xi32> to vector<8x8xf32>
    %218 = vector.shape_cast %217 : vector<8x8xf32> to vector<1x8x8xf32>
    %219 = vector.broadcast %218 : vector<1x8x8xf32> to vector<4x8x8xf32>
    %220 = arith.mulf %190, %219 : vector<4x8x8xf32>
    %cst_31 = arith.constant dense<0.000000e+00> : vector<4x8xf32>
    %221 = vector.multi_reduction <add>, %220, %cst_31 [2] : vector<4x8x8xf32> to vector<4x8xf32>
    %222 = vector.shape_cast %221 : vector<4x8xf32> to vector<4x8x1xf32>
    %c3_i32_32 = arith.constant 3 : i32
    %223 = vector.broadcast %c3_i32_32 : i32 to vector<8x8xi32>
    %224 = arith.cmpi eq, %25, %223 : vector<8x8xi32>
    %225 = arith.extui %224 : vector<8x8xi1> to vector<8x8xi32>
    %226 = arith.sitofp %225 : vector<8x8xi32> to vector<8x8xf32>
    %227 = vector.shape_cast %226 : vector<8x8xf32> to vector<1x8x8xf32>
    %228 = vector.broadcast %227 : vector<1x8x8xf32> to vector<4x8x8xf32>
    %229 = arith.mulf %190, %228 : vector<4x8x8xf32>
    %cst_33 = arith.constant dense<0.000000e+00> : vector<4x8xf32>
    %230 = vector.multi_reduction <add>, %229, %cst_33 [2] : vector<4x8x8xf32> to vector<4x8xf32>
    %231 = vector.shape_cast %230 : vector<4x8xf32> to vector<4x8x1xf32>
    %c4_i32_34 = arith.constant 4 : i32
    %232 = vector.broadcast %c4_i32_34 : i32 to vector<8x8xi32>
    %233 = arith.cmpi eq, %25, %232 : vector<8x8xi32>
    %234 = arith.extui %233 : vector<8x8xi1> to vector<8x8xi32>
    %235 = arith.sitofp %234 : vector<8x8xi32> to vector<8x8xf32>
    %236 = vector.shape_cast %235 : vector<8x8xf32> to vector<1x8x8xf32>
    %237 = vector.broadcast %236 : vector<1x8x8xf32> to vector<4x8x8xf32>
    %238 = arith.mulf %190, %237 : vector<4x8x8xf32>
    %cst_35 = arith.constant dense<0.000000e+00> : vector<4x8xf32>
    %239 = vector.multi_reduction <add>, %238, %cst_35 [2] : vector<4x8x8xf32> to vector<4x8xf32>
    %240 = vector.shape_cast %239 : vector<4x8xf32> to vector<4x8x1xf32>
    %c5_i32_36 = arith.constant 5 : i32
    %241 = vector.broadcast %c5_i32_36 : i32 to vector<8x8xi32>
    %242 = arith.cmpi eq, %25, %241 : vector<8x8xi32>
    %243 = arith.extui %242 : vector<8x8xi1> to vector<8x8xi32>
    %244 = arith.sitofp %243 : vector<8x8xi32> to vector<8x8xf32>
    %245 = vector.shape_cast %244 : vector<8x8xf32> to vector<1x8x8xf32>
    %246 = vector.broadcast %245 : vector<1x8x8xf32> to vector<4x8x8xf32>
    %247 = arith.mulf %190, %246 : vector<4x8x8xf32>
    %cst_37 = arith.constant dense<0.000000e+00> : vector<4x8xf32>
    %248 = vector.multi_reduction <add>, %247, %cst_37 [2] : vector<4x8x8xf32> to vector<4x8xf32>
    %249 = vector.shape_cast %248 : vector<4x8xf32> to vector<4x8x1xf32>
    %c6_i32_38 = arith.constant 6 : i32
    %250 = vector.broadcast %c6_i32_38 : i32 to vector<8x8xi32>
    %251 = arith.cmpi eq, %25, %250 : vector<8x8xi32>
    %252 = arith.extui %251 : vector<8x8xi1> to vector<8x8xi32>
    %253 = arith.sitofp %252 : vector<8x8xi32> to vector<8x8xf32>
    %254 = vector.shape_cast %253 : vector<8x8xf32> to vector<1x8x8xf32>
    %255 = vector.broadcast %254 : vector<1x8x8xf32> to vector<4x8x8xf32>
    %256 = arith.mulf %190, %255 : vector<4x8x8xf32>
    %cst_39 = arith.constant dense<0.000000e+00> : vector<4x8xf32>
    %257 = vector.multi_reduction <add>, %256, %cst_39 [2] : vector<4x8x8xf32> to vector<4x8xf32>
    %258 = vector.shape_cast %257 : vector<4x8xf32> to vector<4x8x1xf32>
    %c7_i32_40 = arith.constant 7 : i32
    %259 = vector.broadcast %c7_i32_40 : i32 to vector<8x8xi32>
    %260 = arith.cmpi eq, %25, %259 : vector<8x8xi32>
    %261 = arith.extui %260 : vector<8x8xi1> to vector<8x8xi32>
    %262 = arith.sitofp %261 : vector<8x8xi32> to vector<8x8xf32>
    %263 = vector.shape_cast %262 : vector<8x8xf32> to vector<1x8x8xf32>
    %264 = vector.broadcast %263 : vector<1x8x8xf32> to vector<4x8x8xf32>
    %265 = arith.mulf %190, %264 : vector<4x8x8xf32>
    %cst_41 = arith.constant dense<0.000000e+00> : vector<4x8xf32>
    %266 = vector.multi_reduction <add>, %265, %cst_41 [2] : vector<4x8x8xf32> to vector<4x8xf32>
    %267 = vector.shape_cast %266 : vector<4x8xf32> to vector<4x8x1xf32>
    %c8_i32_42 = arith.constant 8 : i32
    %268 = vector.broadcast %c8_i32_42 : i32 to vector<8x8xi32>
    %269 = arith.cmpi eq, %25, %268 : vector<8x8xi32>
    %270 = arith.extui %269 : vector<8x8xi1> to vector<8x8xi32>
    %271 = arith.sitofp %270 : vector<8x8xi32> to vector<8x8xf32>
    %272 = vector.shape_cast %271 : vector<8x8xf32> to vector<1x8x8xf32>
    %273 = vector.broadcast %272 : vector<1x8x8xf32> to vector<4x8x8xf32>
    %274 = arith.mulf %190, %273 : vector<4x8x8xf32>
    %cst_43 = arith.constant dense<0.000000e+00> : vector<4x8xf32>
    %275 = vector.multi_reduction <add>, %274, %cst_43 [2] : vector<4x8x8xf32> to vector<4x8xf32>
    %276 = vector.shape_cast %275 : vector<4x8xf32> to vector<4x8x1xf32>
    %c9_i32_44 = arith.constant 9 : i32
    %277 = vector.broadcast %c9_i32_44 : i32 to vector<8x8xi32>
    %278 = arith.cmpi eq, %25, %277 : vector<8x8xi32>
    %279 = arith.extui %278 : vector<8x8xi1> to vector<8x8xi32>
    %280 = arith.sitofp %279 : vector<8x8xi32> to vector<8x8xf32>
    %281 = vector.shape_cast %280 : vector<8x8xf32> to vector<1x8x8xf32>
    %282 = vector.broadcast %281 : vector<1x8x8xf32> to vector<4x8x8xf32>
    %283 = arith.mulf %190, %282 : vector<4x8x8xf32>
    %cst_45 = arith.constant dense<0.000000e+00> : vector<4x8xf32>
    %284 = vector.multi_reduction <add>, %283, %cst_45 [2] : vector<4x8x8xf32> to vector<4x8xf32>
    %285 = vector.shape_cast %284 : vector<4x8xf32> to vector<4x8x1xf32>
    %c10_i32_46 = arith.constant 10 : i32
    %286 = vector.broadcast %c10_i32_46 : i32 to vector<8x8xi32>
    %287 = arith.cmpi eq, %25, %286 : vector<8x8xi32>
    %288 = arith.extui %287 : vector<8x8xi1> to vector<8x8xi32>
    %289 = arith.sitofp %288 : vector<8x8xi32> to vector<8x8xf32>
    %290 = vector.shape_cast %289 : vector<8x8xf32> to vector<1x8x8xf32>
    %291 = vector.broadcast %290 : vector<1x8x8xf32> to vector<4x8x8xf32>
    %292 = arith.mulf %190, %291 : vector<4x8x8xf32>
    %cst_47 = arith.constant dense<0.000000e+00> : vector<4x8xf32>
    %293 = vector.multi_reduction <add>, %292, %cst_47 [2] : vector<4x8x8xf32> to vector<4x8xf32>
    %294 = vector.shape_cast %293 : vector<4x8xf32> to vector<4x8x1xf32>
    %c11_i32_48 = arith.constant 11 : i32
    %295 = vector.broadcast %c11_i32_48 : i32 to vector<8x8xi32>
    %296 = arith.cmpi eq, %25, %295 : vector<8x8xi32>
    %297 = arith.extui %296 : vector<8x8xi1> to vector<8x8xi32>
    %298 = arith.sitofp %297 : vector<8x8xi32> to vector<8x8xf32>
    %299 = vector.shape_cast %298 : vector<8x8xf32> to vector<1x8x8xf32>
    %300 = vector.broadcast %299 : vector<1x8x8xf32> to vector<4x8x8xf32>
    %301 = arith.mulf %190, %300 : vector<4x8x8xf32>
    %cst_49 = arith.constant dense<0.000000e+00> : vector<4x8xf32>
    %302 = vector.multi_reduction <add>, %301, %cst_49 [2] : vector<4x8x8xf32> to vector<4x8xf32>
    %303 = vector.shape_cast %302 : vector<4x8xf32> to vector<4x8x1xf32>
    %c12_i32_50 = arith.constant 12 : i32
    %304 = vector.broadcast %c12_i32_50 : i32 to vector<8x8xi32>
    %305 = arith.cmpi eq, %25, %304 : vector<8x8xi32>
    %306 = arith.extui %305 : vector<8x8xi1> to vector<8x8xi32>
    %307 = arith.sitofp %306 : vector<8x8xi32> to vector<8x8xf32>
    %308 = vector.shape_cast %307 : vector<8x8xf32> to vector<1x8x8xf32>
    %309 = vector.broadcast %308 : vector<1x8x8xf32> to vector<4x8x8xf32>
    %310 = arith.mulf %190, %309 : vector<4x8x8xf32>
    %cst_51 = arith.constant dense<0.000000e+00> : vector<4x8xf32>
    %311 = vector.multi_reduction <add>, %310, %cst_51 [2] : vector<4x8x8xf32> to vector<4x8xf32>
    %312 = vector.shape_cast %311 : vector<4x8xf32> to vector<4x8x1xf32>
    %c13_i32_52 = arith.constant 13 : i32
    %313 = vector.broadcast %c13_i32_52 : i32 to vector<8x8xi32>
    %314 = arith.cmpi eq, %25, %313 : vector<8x8xi32>
    %315 = arith.extui %314 : vector<8x8xi1> to vector<8x8xi32>
    %316 = arith.sitofp %315 : vector<8x8xi32> to vector<8x8xf32>
    %317 = vector.shape_cast %316 : vector<8x8xf32> to vector<1x8x8xf32>
    %318 = vector.broadcast %317 : vector<1x8x8xf32> to vector<4x8x8xf32>
    %319 = arith.mulf %190, %318 : vector<4x8x8xf32>
    %cst_53 = arith.constant dense<0.000000e+00> : vector<4x8xf32>
    %320 = vector.multi_reduction <add>, %319, %cst_53 [2] : vector<4x8x8xf32> to vector<4x8xf32>
    %321 = vector.shape_cast %320 : vector<4x8xf32> to vector<4x8x1xf32>
    %c14_i32_54 = arith.constant 14 : i32
    %322 = vector.broadcast %c14_i32_54 : i32 to vector<8x8xi32>
    %323 = arith.cmpi eq, %25, %322 : vector<8x8xi32>
    %324 = arith.extui %323 : vector<8x8xi1> to vector<8x8xi32>
    %325 = arith.sitofp %324 : vector<8x8xi32> to vector<8x8xf32>
    %326 = vector.shape_cast %325 : vector<8x8xf32> to vector<1x8x8xf32>
    %327 = vector.broadcast %326 : vector<1x8x8xf32> to vector<4x8x8xf32>
    %328 = arith.mulf %190, %327 : vector<4x8x8xf32>
    %cst_55 = arith.constant dense<0.000000e+00> : vector<4x8xf32>
    %329 = vector.multi_reduction <add>, %328, %cst_55 [2] : vector<4x8x8xf32> to vector<4x8xf32>
    %330 = vector.shape_cast %329 : vector<4x8xf32> to vector<4x8x1xf32>
    %331 = tpu.concatenate %204, %213, %222, %231, %240, %249, %258, %267, %276, %285, %294, %303, %312, %321, %330 in 2 : vector<4x8x1xf32>, vector<4x8x1xf32>, vector<4x8x1xf32>, vector<4x8x1xf32>, vector<4x8x1xf32>, vector<4x8x1xf32>, vector<4x8x1xf32>, vector<4x8x1xf32>, vector<4x8x1xf32>, vector<4x8x1xf32>, vector<4x8x1xf32>, vector<4x8x1xf32>, vector<4x8x1xf32>, vector<4x8x1xf32>, vector<4x8x1xf32> -> vector<4x8x15xf32>
    %332 = vector.shape_cast %331 : vector<4x8x15xf32> to vector<32x15xf32>
    %333 = arith.truncf %332 : vector<32x15xf32> to vector<32x15xbf16>
    %c0_56 = arith.constant 0 : index
    %c0_57 = arith.constant 0 : index
    %334 = vector.load %arg7[%c0_56, %c0_57] : memref<15x8xbf16, #tpu.memory_space<vmem>>, vector<15x8xbf16>
    %cst_58 = arith.constant dense<0.000000e+00> : vector<32x8xf32>
    %335 = tpu.matmul %333, %334, %cst_58 {dimension_numbers = #tpu.dot_dimension_numbers<[1], [0], [0], [1], [0, 0, 1, 1], [], []>} : vector<32x15xbf16>, vector<15x8xbf16>, vector<32x8xf32> -> vector<32x8xf32>
    %336 = vector.shape_cast %335 : vector<32x8xf32> to vector<4x8x8xf32>
    %337 = arith.addf %195, %336 : vector<4x8x8xf32>
    %338 = vector.extract_strided_slice %337 {offsets = [0, 0, 0], sizes = [1, 8, 8], strides = [1, 1, 1]} : vector<4x8x8xf32> to vector<1x8x8xf32>
    %339 = vector.shape_cast %338 : vector<1x8x8xf32> to vector<8x8xf32>
    %340 = vector.extract_strided_slice %337 {offsets = [1, 0, 0], sizes = [1, 8, 8], strides = [1, 1, 1]} : vector<4x8x8xf32> to vector<1x8x8xf32>
    %341 = vector.shape_cast %340 : vector<1x8x8xf32> to vector<8x8xf32>
    %342 = vector.extract_strided_slice %337 {offsets = [2, 0, 0], sizes = [1, 8, 8], strides = [1, 1, 1]} : vector<4x8x8xf32> to vector<1x8x8xf32>
    %343 = vector.shape_cast %342 : vector<1x8x8xf32> to vector<8x8xf32>
    %344 = vector.extract_strided_slice %337 {offsets = [3, 0, 0], sizes = [1, 8, 8], strides = [1, 1, 1]} : vector<4x8x8xf32> to vector<1x8x8xf32>
    %345 = vector.shape_cast %344 : vector<1x8x8xf32> to vector<8x8xf32>
    %346 = tpu.concatenate %339, %341, %343, %345 in 1 : vector<8x8xf32>, vector<8x8xf32>, vector<8x8xf32>, vector<8x8xf32> -> vector<8x32xf32>
    %347 = arith.truncf %346 : vector<8x32xf32> to vector<8x32xbf16>
    %c0_59 = arith.constant 0 : index
    %c0_60 = arith.constant 0 : index
    %348 = vector.load %arg8[%c0_59, %c0_60] : memref<32x32xbf16, #tpu.memory_space<vmem>>, vector<32x32xbf16>
    %cst_61 = arith.constant dense<0.000000e+00> : vector<8x32xf32>
    %349 = tpu.matmul %347, %348, %cst_61 {dimension_numbers = #tpu.dot_dimension_numbers<[1], [0], [0], [1], [0, 0, 1, 1], [], []>} : vector<8x32xbf16>, vector<32x32xbf16>, vector<8x32xf32> -> vector<8x32xf32>
    %c0_62 = arith.constant 0 : index
    %c0_63 = arith.constant 0 : index
    %350 = vector.load %arg9[%c0_62, %c0_63] : memref<1x32xf32, #tpu.memory_space<vmem>>, vector<1x32xf32>
    %351 = vector.broadcast %350 : vector<1x32xf32> to vector<8x32xf32>
    %352 = arith.addf %349, %351 : vector<8x32xf32>
    %c0_64 = arith.constant 0 : index
    %c0_65 = arith.constant 0 : index
    %c0_66 = arith.constant 0 : index
    %353 = vector.load %arg2[%c0_64, %c0_65, %c0_66] : memref<1x8x32xf32, #tpu.memory_space<vmem>>, vector<1x8x32xf32>
    %354 = vector.shape_cast %353 : vector<1x8x32xf32> to vector<8x32xf32>
    %355 = arith.addf %354, %352 : vector<8x32xf32>
    %c0_67 = arith.constant 0 : index
    %c0_68 = arith.constant 0 : index
    %356 = vector.load %arg10[%c0_67, %c0_68] : memref<1x32xf32, #tpu.memory_space<vmem>>, vector<1x32xf32>
    %c0_69 = arith.constant 0 : index
    %c0_70 = arith.constant 0 : index
    %357 = vector.load %arg11[%c0_69, %c0_70] : memref<1x32xf32, #tpu.memory_space<vmem>>, vector<1x32xf32>
    %cst_71 = arith.constant dense<0.000000e+00> : vector<8xf32>
    %358 = vector.multi_reduction <add>, %355, %cst_71 [1] : vector<8x32xf32> to vector<8xf32>
    %359 = vector.shape_cast %358 : vector<8xf32> to vector<8x1xf32>
    %cst_72 = arith.constant 3.200000e+01 : f32
    %360 = vector.broadcast %cst_72 : f32 to vector<8x1xf32>
    %361 = arith.divf %359, %360 : vector<8x1xf32>
    %362 = vector.broadcast %361 : vector<8x1xf32> to vector<8x32xf32>
    %363 = arith.subf %355, %362 : vector<8x32xf32>
    %364 = arith.mulf %363, %363 : vector<8x32xf32>
    %cst_73 = arith.constant dense<0.000000e+00> : vector<8xf32>
    %365 = vector.multi_reduction <add>, %364, %cst_73 [1] : vector<8x32xf32> to vector<8xf32>
    %366 = vector.shape_cast %365 : vector<8xf32> to vector<8x1xf32>
    %cst_74 = arith.constant 3.200000e+01 : f32
    %367 = vector.broadcast %cst_74 : f32 to vector<8x1xf32>
    %368 = arith.divf %366, %367 : vector<8x1xf32>
    %369 = vector.broadcast %361 : vector<8x1xf32> to vector<8x32xf32>
    %370 = arith.subf %355, %369 : vector<8x32xf32>
    %cst_75 = arith.constant 9.99999974E-6 : f32
    %371 = vector.broadcast %cst_75 : f32 to vector<8x1xf32>
    %372 = arith.addf %368, %371 : vector<8x1xf32>
    %373 = math.rsqrt %372 : vector<8x1xf32>
    %374 = vector.broadcast %373 : vector<8x1xf32> to vector<8x32xf32>
    %375 = arith.mulf %370, %374 : vector<8x32xf32>
    %376 = vector.broadcast %356 : vector<1x32xf32> to vector<8x32xf32>
    %377 = arith.mulf %375, %376 : vector<8x32xf32>
    %378 = vector.broadcast %357 : vector<1x32xf32> to vector<8x32xf32>
    %379 = arith.addf %377, %378 : vector<8x32xf32>
    %380 = arith.truncf %379 : vector<8x32xf32> to vector<8x32xbf16>
    %c0_76 = arith.constant 0 : index
    %c0_77 = arith.constant 0 : index
    %381 = vector.load %arg12[%c0_76, %c0_77] : memref<32x64xbf16, #tpu.memory_space<vmem>>, vector<32x64xbf16>
    %cst_78 = arith.constant dense<0.000000e+00> : vector<8x64xf32>
    %382 = tpu.matmul %380, %381, %cst_78 {dimension_numbers = #tpu.dot_dimension_numbers<[1], [0], [0], [1], [0, 0, 1, 1], [], []>} : vector<8x32xbf16>, vector<32x64xbf16>, vector<8x64xf32> -> vector<8x64xf32>
    %c0_79 = arith.constant 0 : index
    %c0_80 = arith.constant 0 : index
    %383 = vector.load %arg13[%c0_79, %c0_80] : memref<1x64xf32, #tpu.memory_space<vmem>>, vector<1x64xf32>
    %384 = vector.broadcast %383 : vector<1x64xf32> to vector<8x64xf32>
    %385 = arith.addf %382, %384 : vector<8x64xf32>
    %cst_81 = arith.constant 5.000000e-01 : f32
    %386 = vector.broadcast %cst_81 : f32 to vector<8x64xf32>
    %387 = arith.mulf %386, %385 : vector<8x64xf32>
    %cst_82 = arith.constant 4.471500e-02 : f32
    %388 = vector.broadcast %cst_82 : f32 to vector<8x64xf32>
    %389 = arith.mulf %388, %385 : vector<8x64xf32>
    %390 = arith.mulf %389, %385 : vector<8x64xf32>
    %391 = arith.mulf %390, %385 : vector<8x64xf32>
    %392 = arith.addf %385, %391 : vector<8x64xf32>
    %cst_83 = arith.constant 0.797884583 : f32
    %393 = vector.broadcast %cst_83 : f32 to vector<8x64xf32>
    %394 = arith.mulf %393, %392 : vector<8x64xf32>
    %395 = math.tanh %394 : vector<8x64xf32>
    %cst_84 = arith.constant 1.000000e+00 : f32
    %396 = vector.broadcast %cst_84 : f32 to vector<8x64xf32>
    %397 = arith.addf %396, %395 : vector<8x64xf32>
    %398 = arith.mulf %387, %397 : vector<8x64xf32>
    %399 = arith.truncf %398 : vector<8x64xf32> to vector<8x64xbf16>
    %c0_85 = arith.constant 0 : index
    %c0_86 = arith.constant 0 : index
    %400 = vector.load %arg14[%c0_85, %c0_86] : memref<64x32xbf16, #tpu.memory_space<vmem>>, vector<64x32xbf16>
    %cst_87 = arith.constant dense<0.000000e+00> : vector<8x32xf32>
    %401 = tpu.matmul %399, %400, %cst_87 {dimension_numbers = #tpu.dot_dimension_numbers<[1], [0], [0], [1], [0, 0, 1, 1], [], []>} : vector<8x64xbf16>, vector<64x32xbf16>, vector<8x32xf32> -> vector<8x32xf32>
    %c0_88 = arith.constant 0 : index
    %c0_89 = arith.constant 0 : index
    %402 = vector.load %arg15[%c0_88, %c0_89] : memref<1x32xf32, #tpu.memory_space<vmem>>, vector<1x32xf32>
    %403 = vector.broadcast %402 : vector<1x32xf32> to vector<8x32xf32>
    %404 = arith.addf %401, %403 : vector<8x32xf32>
    %405 = arith.addf %379, %404 : vector<8x32xf32>
    %c0_90 = arith.constant 0 : index
    %c0_91 = arith.constant 0 : index
    %406 = vector.load %arg16[%c0_90, %c0_91] : memref<1x32xf32, #tpu.memory_space<vmem>>, vector<1x32xf32>
    %c0_92 = arith.constant 0 : index
    %c0_93 = arith.constant 0 : index
    %407 = vector.load %arg17[%c0_92, %c0_93] : memref<1x32xf32, #tpu.memory_space<vmem>>, vector<1x32xf32>
    %cst_94 = arith.constant dense<0.000000e+00> : vector<8xf32>
    %408 = vector.multi_reduction <add>, %405, %cst_94 [1] : vector<8x32xf32> to vector<8xf32>
    %409 = vector.shape_cast %408 : vector<8xf32> to vector<8x1xf32>
    %cst_95 = arith.constant 3.200000e+01 : f32
    %410 = vector.broadcast %cst_95 : f32 to vector<8x1xf32>
    %411 = arith.divf %409, %410 : vector<8x1xf32>
    %412 = vector.broadcast %411 : vector<8x1xf32> to vector<8x32xf32>
    %413 = arith.subf %405, %412 : vector<8x32xf32>
    %414 = arith.mulf %413, %413 : vector<8x32xf32>
    %cst_96 = arith.constant dense<0.000000e+00> : vector<8xf32>
    %415 = vector.multi_reduction <add>, %414, %cst_96 [1] : vector<8x32xf32> to vector<8xf32>
    %416 = vector.shape_cast %415 : vector<8xf32> to vector<8x1xf32>
    %cst_97 = arith.constant 3.200000e+01 : f32
    %417 = vector.broadcast %cst_97 : f32 to vector<8x1xf32>
    %418 = arith.divf %416, %417 : vector<8x1xf32>
    %419 = vector.broadcast %411 : vector<8x1xf32> to vector<8x32xf32>
    %420 = arith.subf %405, %419 : vector<8x32xf32>
    %cst_98 = arith.constant 9.99999974E-6 : f32
    %421 = vector.broadcast %cst_98 : f32 to vector<8x1xf32>
    %422 = arith.addf %418, %421 : vector<8x1xf32>
    %423 = math.rsqrt %422 : vector<8x1xf32>
    %424 = vector.broadcast %423 : vector<8x1xf32> to vector<8x32xf32>
    %425 = arith.mulf %420, %424 : vector<8x32xf32>
    %426 = vector.broadcast %406 : vector<1x32xf32> to vector<8x32xf32>
    %427 = arith.mulf %425, %426 : vector<8x32xf32>
    %428 = vector.broadcast %407 : vector<1x32xf32> to vector<8x32xf32>
    %429 = arith.addf %427, %428 : vector<8x32xf32>
    %c0_99 = arith.constant 0 : index
    %c0_100 = arith.constant 0 : index
    %c0_101 = arith.constant 0 : index
    %430 = vector.load %arg18[%c0_99, %c0_100, %c0_101] : memref<1x8x32xf32, #tpu.memory_space<vmem>>, vector<1x8x32xf32>
    %431 = vector.shape_cast %430 : vector<1x8x32xf32> to vector<8x32xf32>
    %432 = vector.shape_cast %429 : vector<8x32xf32> to vector<1x8x32xf32>
    tpu.vector_store %arg18[%c0_99, %c0_100, %c0_101], %432 {strides = array<i32>} : memref<1x8x32xf32, #tpu.memory_space<vmem>>, vector<1x8x32xf32>,
    return
  }
  func.func @transform_0(%arg0: i32, %arg1: i32) -> (i32, i32, i32) {
    %c0_i32 = arith.constant 0 : i32
    %c0_i32_0 = arith.constant 0 : i32
    return %arg0, %arg1, %c0_i32 : i32, i32, i32
  }
  func.func @transform_1(%arg0: i32, %arg1: i32) -> (i32, i32, i32) {
    %c0_i32 = arith.constant 0 : i32
    %c0_i32_0 = arith.constant 0 : i32
    %c0_i32_1 = arith.constant 0 : i32
    return %arg0, %c0_i32, %c0_i32_0 : i32, i32, i32
  }
  func.func @transform_2(%arg0: i32, %arg1: i32) -> (i32, i32) {
    %c0_i32 = arith.constant 0 : i32
    %c0_i32_0 = arith.constant 0 : i32
    %c0_i32_1 = arith.constant 0 : i32
    return %c0_i32, %c0_i32_0 : i32, i32
  }
  func.func @transform_3(%arg0: i32, %arg1: i32) -> (i32, i32) {
    %c0_i32 = arith.constant 0 : i32
    %c0_i32_0 = arith.constant 0 : i32
    %c0_i32_1 = arith.constant 0 : i32
    return %c0_i32, %c0_i32_0 : i32, i32
  }
  func.func @transform_4(%arg0: i32, %arg1: i32) -> (i32, i32) {
    %c0_i32 = arith.constant 0 : i32
    %c0_i32_0 = arith.constant 0 : i32
    %c0_i32_1 = arith.constant 0 : i32
    return %c0_i32, %c0_i32_0 : i32, i32
  }
  func.func @transform_5(%arg0: i32, %arg1: i32) -> (i32, i32) {
    %c0_i32 = arith.constant 0 : i32
    %c0_i32_0 = arith.constant 0 : i32
    %c0_i32_1 = arith.constant 0 : i32
    return %c0_i32, %c0_i32_0 : i32, i32
  }
  func.func @transform_6(%arg0: i32, %arg1: i32) -> (i32, i32) {
    %c0_i32 = arith.constant 0 : i32
    %c0_i32_0 = arith.constant 0 : i32
    %c0_i32_1 = arith.constant 0 : i32
    return %c0_i32, %c0_i32_0 : i32, i32
  }
  func.func @transform_7(%arg0: i32, %arg1: i32) -> (i32, i32) {
    %c0_i32 = arith.constant 0 : i32
    %c0_i32_0 = arith.constant 0 : i32
    %c0_i32_1 = arith.constant 0 : i32
    return %c0_i32, %c0_i32_0 : i32, i32
  }
  func.func @transform_8(%arg0: i32, %arg1: i32) -> (i32, i32) {
    %c0_i32 = arith.constant 0 : i32
    %c0_i32_0 = arith.constant 0 : i32
    %c0_i32_1 = arith.constant 0 : i32
    return %c0_i32, %c0_i32_0 : i32, i32
  }
  func.func @transform_9(%arg0: i32, %arg1: i32) -> (i32, i32) {
    %c0_i32 = arith.constant 0 : i32
    %c0_i32_0 = arith.constant 0 : i32
    %c0_i32_1 = arith.constant 0 : i32
    return %c0_i32, %c0_i32_0 : i32, i32
  }
  func.func @transform_10(%arg0: i32, %arg1: i32) -> (i32, i32) {
    %c0_i32 = arith.constant 0 : i32
    %c0_i32_0 = arith.constant 0 : i32
    %c0_i32_1 = arith.constant 0 : i32
    return %c0_i32, %c0_i32_0 : i32, i32
  }
  func.func @transform_11(%arg0: i32, %arg1: i32) -> (i32, i32) {
    %c0_i32 = arith.constant 0 : i32
    %c0_i32_0 = arith.constant 0 : i32
    %c0_i32_1 = arith.constant 0 : i32
    return %c0_i32, %c0_i32_0 : i32, i32
  }
  func.func @transform_12(%arg0: i32, %arg1: i32) -> (i32, i32) {
    %c0_i32 = arith.constant 0 : i32
    %c0_i32_0 = arith.constant 0 : i32
    %c0_i32_1 = arith.constant 0 : i32
    return %c0_i32, %c0_i32_0 : i32, i32
  }
  func.func @transform_13(%arg0: i32, %arg1: i32) -> (i32, i32) {
    %c0_i32 = arith.constant 0 : i32
    %c0_i32_0 = arith.constant 0 : i32
    %c0_i32_1 = arith.constant 0 : i32
    return %c0_i32, %c0_i32_0 : i32, i32
  }
  func.func @transform_14(%arg0: i32, %arg1: i32) -> (i32, i32) {
    %c0_i32 = arith.constant 0 : i32
    %c0_i32_0 = arith.constant 0 : i32
    %c0_i32_1 = arith.constant 0 : i32
    return %c0_i32, %c0_i32_0 : i32, i32
  }
  func.func @transform_15(%arg0: i32, %arg1: i32) -> (i32, i32) {
    %c0_i32 = arith.constant 0 : i32
    %c0_i32_0 = arith.constant 0 : i32
    %c0_i32_1 = arith.constant 0 : i32
    return %c0_i32, %c0_i32_0 : i32, i32
  }
  func.func @transform_16(%arg0: i32, %arg1: i32) -> (i32, i32, i32) {
    %c0_i32 = arith.constant 0 : i32
    %c0_i32_0 = arith.constant 0 : i32
    return %arg0, %arg1, %c0_i32 : i32, i32, i32
  }
  func.func @transform_17(%arg0: i32, %arg1: i32) -> (i32, i32, i32, i32) {
    %c0_i32 = arith.constant 0 : i32
    %c0_i32_0 = arith.constant 0 : i32
    %c0_i32_1 = arith.constant 0 : i32
    return %arg0, %c0_i32, %arg1, %c0_i32_0 : i32, i32, i32, i32
  }
}

module attributes {stable_mosaic.version = 11 : i64} {
  func.func @kernel(%arg0: i32, %arg1: i32, %arg2: memref<1x8x32xf32, #tpu.memory_space<vmem>>, %arg3: memref<1x8x32xf32, #tpu.memory_space<vmem>>, %arg4: memref<32x96xbf16, #tpu.memory_space<vmem>>, %arg5: memref<1x96xf32, #tpu.memory_space<vmem>>, %arg6: memref<8x15xbf16, #tpu.memory_space<vmem>>, %arg7: memref<15x8xbf16, #tpu.memory_space<vmem>>, %arg8: memref<32x32xbf16, #tpu.memory_space<vmem>>, %arg9: memref<1x32xf32, #tpu.memory_space<vmem>>, %arg10: memref<1x32xf32, #tpu.memory_space<vmem>>, %arg11: memref<1x32xf32, #tpu.memory_space<vmem>>, %arg12: memref<32x64xbf16, #tpu.memory_space<vmem>>, %arg13: memref<1x64xf32, #tpu.memory_space<vmem>>, %arg14: memref<64x32xbf16, #tpu.memory_space<vmem>>, %arg15: memref<1x32xf32, #tpu.memory_space<vmem>>, %arg16: memref<1x32xf32, #tpu.memory_space<vmem>>, %arg17: memref<1x32xf32, #tpu.memory_space<vmem>>, %arg18: memref<1x8x32xf32, #tpu.memory_space<vmem>>, %arg19: memref<1x4x8x8xf32, #tpu.memory_space<vmem>>, %arg20: memref<4x8x8xbf16, #tpu.memory_space<vmem>>, %arg21: memref<4x8x8xbf16, #tpu.memory_space<vmem>>, %arg22: memref<4x8x8xbf16, #tpu.memory_space<vmem>>) attributes {dimension_semantics = [#tpu.dimension_semantics<parallel>, #tpu.dimension_semantics<arbitrary>], iteration_bounds = array<i64: 2, 1>, scalar_prefetch = 0 : i64, scratch_operands = 3 : i64, tpu.core_type = #tpu.core_type<tc>, window_params = [{transform_indices = @transform_0, window_bounds = array<i64: 1, 8, 32>}, {transform_indices = @transform_1, window_bounds = array<i64: 1, 8, 32>}, {pipeline_mode = #tpu.pipeline_mode<synchronous>, transform_indices = @transform_2, window_bounds = array<i64: 32, 96>}, {pipeline_mode = #tpu.pipeline_mode<synchronous>, transform_indices = @transform_3, window_bounds = array<i64: 1, 96>}, {pipeline_mode = #tpu.pipeline_mode<synchronous>, transform_indices = @transform_4, window_bounds = array<i64: 8, 15>}, {pipeline_mode = #tpu.pipeline_mode<synchronous>, transform_indices = @transform_5, window_bounds = array<i64: 15, 8>}, {pipeline_mode = #tpu.pipeline_mode<synchronous>, transform_indices = @transform_6, window_bounds = array<i64: 32, 32>}, {pipeline_mode = #tpu.pipeline_mode<synchronous>, transform_indices = @transform_7, window_bounds = array<i64: 1, 32>}, {pipeline_mode = #tpu.pipeline_mode<synchronous>, transform_indices = @transform_8, window_bounds = array<i64: 1, 32>}, {pipeline_mode = #tpu.pipeline_mode<synchronous>, transform_indices = @transform_9, window_bounds = array<i64: 1, 32>}, {pipeline_mode = #tpu.pipeline_mode<synchronous>, transform_indices = @transform_10, window_bounds = array<i64: 32, 64>}, {pipeline_mode = #tpu.pipeline_mode<synchronous>, transform_indices = @transform_11, window_bounds = array<i64: 1, 64>}, {pipeline_mode = #tpu.pipeline_mode<synchronous>, transform_indices = @transform_12, window_bounds = array<i64: 64, 32>}, {pipeline_mode = #tpu.pipeline_mode<synchronous>, transform_indices = @transform_13, window_bounds = array<i64: 1, 32>}, {pipeline_mode = #tpu.pipeline_mode<synchronous>, transform_indices = @transform_14, window_bounds = array<i64: 1, 32>}, {pipeline_mode = #tpu.pipeline_mode<synchronous>, transform_indices = @transform_15, window_bounds = array<i64: 1, 32>}, {transform_indices = @transform_16, window_bounds = array<i64: 1, 8, 32>}, {transform_indices = @transform_17, window_bounds = array<i64: 1, 4, 8, 8>}]} {
    %c0_i32 = arith.constant 0 : i32
    %0 = arith.cmpi eq, %arg1, %c0_i32 : i32
    %1 = arith.extui %0 : i1 to i32
    %c0_i32_0 = arith.constant 0 : i32
    %2 = arith.cmpi ne, %1, %c0_i32_0 : i32
    scf.if %2 {
      %c0_102 = arith.constant 0 : index
      %c0_103 = arith.constant 0 : index
      %c0_104 = arith.constant 0 : index
      %433 = vector.load %arg3[%c0_102, %c0_103, %c0_104] : memref<1x8x32xf32, #tpu.memory_space<vmem>>, vector<1x8x32xf32>
      %434 = vector.shape_cast %433 : vector<1x8x32xf32> to vector<8x32xf32>
      %435 = arith.truncf %434 : vector<8x32xf32> to vector<8x32xbf16>
      %c0_105 = arith.constant 0 : index
      %c0_106 = arith.constant 0 : index
      %436 = vector.load %arg4[%c0_105, %c0_106] : memref<32x96xbf16, #tpu.memory_space<vmem>>, vector<32x96xbf16>
      %cst_107 = arith.constant dense<0.000000e+00> : vector<8x96xf32>
      %437 = tpu.matmul %435, %436, %cst_107 {dimension_numbers = #tpu.dot_dimension_numbers<[1], [0], [0], [1], [0, 0, 1, 1], [], []>} : vector<8x32xbf16>, vector<32x96xbf16>, vector<8x96xf32> -> vector<8x96xf32>
      %c0_108 = arith.constant 0 : index
      %c0_109 = arith.constant 0 : index
      %438 = vector.load %arg5[%c0_108, %c0_109] : memref<1x96xf32, #tpu.memory_space<vmem>>, vector<1x96xf32>
      %439 = vector.broadcast %438 : vector<1x96xf32> to vector<8x96xf32>
      %440 = arith.addf %437, %439 : vector<8x96xf32>
      %441 = vector.extract_strided_slice %440 {offsets = [0, 0], sizes = [8, 8], strides = [1, 1]} : vector<8x96xf32> to vector<8x8xf32>
      %442 = vector.extract_strided_slice %440 {offsets = [0, 8], sizes = [8, 8], strides = [1, 1]} : vector<8x96xf32> to vector<8x8xf32>
      %443 = vector.extract_strided_slice %440 {offsets = [0, 16], sizes = [8, 8], strides = [1, 1]} : vector<8x96xf32> to vector<8x8xf32>
      %444 = vector.extract_strided_slice %440 {offsets = [0, 24], sizes = [8, 8], strides = [1, 1]} : vector<8x96xf32> to vector<8x8xf32>
      %445 = vector.shape_cast %441 : vector<8x8xf32> to vector<1x8x8xf32>
      %446 = vector.shape_cast %442 : vector<8x8xf32> to vector<1x8x8xf32>
      %447 = vector.shape_cast %443 : vector<8x8xf32> to vector<1x8x8xf32>
      %448 = vector.shape_cast %444 : vector<8x8xf32> to vector<1x8x8xf32>
      %449 = tpu.concatenate %445, %446, %447, %448 in 0 : vector<1x8x8xf32>, vector<1x8x8xf32>, vector<1x8x8xf32>, vector<1x8x8xf32> -> vector<4x8x8xf32>
      %450 = arith.truncf %449 : vector<4x8x8xf32> to vector<4x8x8xbf16>
      %c0_110 = arith.constant 0 : index
      %c0_111 = arith.constant 0 : index
      %c0_112 = arith.constant 0 : index
      %451 = vector.load %arg20[%c0_110, %c0_111, %c0_112] : memref<4x8x8xbf16, #tpu.memory_space<vmem>>, vector<4x8x8xbf16>
      tpu.vector_store %arg20[%c0_110, %c0_111, %c0_112], %450 {strides = array<i32>} : memref<4x8x8xbf16, #tpu.memory_space<vmem>>, vector<4x8x8xbf16>,
      %452 = vector.extract_strided_slice %440 {offsets = [0, 32], sizes = [8, 8], strides = [1, 1]} : vector<8x96xf32> to vector<8x8xf32>
      %453 = vector.extract_strided_slice %440 {offsets = [0, 40], sizes = [8, 8], strides = [1, 1]} : vector<8x96xf32> to vector<8x8xf32>
      %454 = vector.extract_strided_slice %440 {offsets = [0, 48], sizes = [8, 8], strides = [1, 1]} : vector<8x96xf32> to vector<8x8xf32>
      %455 = vector.extract_strided_slice %440 {offsets = [0, 56], sizes = [8, 8], strides = [1, 1]} : vector<8x96xf32> to vector<8x8xf32>
      %456 = vector.shape_cast %452 : vector<8x8xf32> to vector<1x8x8xf32>
      %457 = vector.shape_cast %453 : vector<8x8xf32> to vector<1x8x8xf32>
      %458 = vector.shape_cast %454 : vector<8x8xf32> to vector<1x8x8xf32>
      %459 = vector.shape_cast %455 : vector<8x8xf32> to vector<1x8x8xf32>
      %460 = tpu.concatenate %456, %457, %458, %459 in 0 : vector<1x8x8xf32>, vector<1x8x8xf32>, vector<1x8x8xf32>, vector<1x8x8xf32> -> vector<4x8x8xf32>
      %461 = arith.truncf %460 : vector<4x8x8xf32> to vector<4x8x8xbf16>
      %c0_113 = arith.constant 0 : index
      %c0_114 = arith.constant 0 : index
      %c0_115 = arith.constant 0 : index
      %462 = vector.load %arg21[%c0_113, %c0_114, %c0_115] : memref<4x8x8xbf16, #tpu.memory_space<vmem>>, vector<4x8x8xbf16>
      tpu.vector_store %arg21[%c0_113, %c0_114, %c0_115], %461 {strides = array<i32>} : memref<4x8x8xbf16, #tpu.memory_space<vmem>>, vector<4x8x8xbf16>,
      %463 = vector.extract_strided_slice %440 {offsets = [0, 64], sizes = [8, 8], strides = [1, 1]} : vector<8x96xf32> to vector<8x8xf32>
      %464 = vector.extract_strided_slice %440 {offsets = [0, 72], sizes = [8, 8], strides = [1, 1]} : vector<8x96xf32> to vector<8x8xf32>
      %465 = vector.extract_strided_slice %440 {offsets = [0, 80], sizes = [8, 8], strides = [1, 1]} : vector<8x96xf32> to vector<8x8xf32>
      %466 = vector.extract_strided_slice %440 {offsets = [0, 88], sizes = [8, 8], strides = [1, 1]} : vector<8x96xf32> to vector<8x8xf32>
      %467 = vector.shape_cast %463 : vector<8x8xf32> to vector<1x8x8xf32>
      %468 = vector.shape_cast %464 : vector<8x8xf32> to vector<1x8x8xf32>
      %469 = vector.shape_cast %465 : vector<8x8xf32> to vector<1x8x8xf32>
      %470 = vector.shape_cast %466 : vector<8x8xf32> to vector<1x8x8xf32>
      %471 = tpu.concatenate %467, %468, %469, %470 in 0 : vector<1x8x8xf32>, vector<1x8x8xf32>, vector<1x8x8xf32>, vector<1x8x8xf32> -> vector<4x8x8xf32>
      %472 = arith.truncf %471 : vector<4x8x8xf32> to vector<4x8x8xbf16>
      %c0_116 = arith.constant 0 : index
      %c0_117 = arith.constant 0 : index
      %c0_118 = arith.constant 0 : index
      %473 = vector.load %arg22[%c0_116, %c0_117, %c0_118] : memref<4x8x8xbf16, #tpu.memory_space<vmem>>, vector<4x8x8xbf16>
      tpu.vector_store %arg22[%c0_116, %c0_117, %c0_118], %472 {strides = array<i32>} : memref<4x8x8xbf16, #tpu.memory_space<vmem>>, vector<4x8x8xbf16>,
    } else {
    }
    %c8_i32 = arith.constant 8 : i32
    %3 = arith.muli %arg1, %c8_i32 : i32
    %4 = tpu.assume_multiple %3, 8 : i32
    %c0 = arith.constant 0 : index
    %5 = arith.index_cast %4 : i32 to index
    %c0_1 = arith.constant 0 : index
    %6 = vector.load %arg20[%c0, %5, %c0_1] : memref<4x8x8xbf16, #tpu.memory_space<vmem>>, vector<4x8x8xbf16>
    %c0_2 = arith.constant 0 : index
    %c0_3 = arith.constant 0 : index
    %c0_4 = arith.constant 0 : index
    %7 = vector.load %arg21[%c0_2, %c0_3, %c0_4] : memref<4x8x8xbf16, #tpu.memory_space<vmem>>, vector<4x8x8xbf16>
    %c0_5 = arith.constant 0 : index
    %c0_6 = arith.constant 0 : index
    %c0_7 = arith.constant 0 : index
    %8 = vector.load %arg22[%c0_5, %c0_6, %c0_7] : memref<4x8x8xbf16, #tpu.memory_space<vmem>>, vector<4x8x8xbf16>
    "tpu.trace_start"() <{level = 10 : i32, message = "hqd,hkd->hqk"}> : () -> ()
    %cst = arith.constant dense<0.000000e+00> : vector<4x8x8xf32>
    %9 = tpu.matmul %6, %7, %cst {dimension_numbers = #tpu.dot_dimension_numbers<[2], [2], [1], [1], [0, 0, 0, 1, 1, 1], [0], [0]>} : vector<4x8x8xbf16>, vector<4x8x8xbf16>, vector<4x8x8xf32> -> vector<4x8x8xf32>
    "tpu.trace_stop"() : () -> ()
    %10 = vector.shape_cast %6 : vector<4x8x8xbf16> to vector<32x8xbf16>
    %c0_8 = arith.constant 0 : index
    %c0_9 = arith.constant 0 : index
    %11 = vector.load %arg6[%c0_8, %c0_9] : memref<8x15xbf16, #tpu.memory_space<vmem>>, vector<8x15xbf16>
    %cst_10 = arith.constant dense<0.000000e+00> : vector<32x15xf32>
    %12 = tpu.matmul %10, %11, %cst_10 {dimension_numbers = #tpu.dot_dimension_numbers<[1], [0], [0], [1], [0, 0, 1, 1], [], []>} : vector<32x8xbf16>, vector<8x15xbf16>, vector<32x15xf32> -> vector<32x15xf32>
    %13 = vector.shape_cast %12 : vector<32x15xf32> to vector<4x8x15xf32>
    %14 = tpu.iota {dimensions = array<i32: 0>} : vector<8x8xi32>
    %c8_i32_11 = arith.constant 8 : i32
    %15 = arith.muli %arg1, %c8_i32_11 : i32
    %16 = vector.broadcast %15 : i32 to vector<8x8xi32>
    %17 = arith.addi %14, %16 : vector<8x8xi32>
    %18 = tpu.iota {dimensions = array<i32: 1>} : vector<8x8xi32>
    %19 = arith.subi %18, %17 : vector<8x8xi32>
    %c-7_i32 = arith.constant -7 : i32
    %c7_i32 = arith.constant 7 : i32
    %20 = vector.broadcast %c-7_i32 : i32 to vector<8x8xi32>
    %21 = arith.maxsi %20, %19 : vector<8x8xi32>
    %22 = vector.broadcast %c7_i32 : i32 to vector<8x8xi32>
    %23 = arith.minsi %22, %21 : vector<8x8xi32>
    %c7_i32_12 = arith.constant 7 : i32
    %24 = vector.broadcast %c7_i32_12 : i32 to vector<8x8xi32>
    %25 = arith.addi %23, %24 : vector<8x8xi32>
    %cst_13 = arith.constant 0.000000e+00 : f32
    %26 = vector.broadcast %cst_13 : f32 to vector<4x8x8xf32>
    %c0_i32_14 = arith.constant 0 : i32
    %27 = vector.broadcast %c0_i32_14 : i32 to vector<8x8xi32>
    %28 = arith.cmpi eq, %25, %27 : vector<8x8xi32>
    %29 = arith.extui %28 : vector<8x8xi1> to vector<8x8xi32>
    %30 = arith.sitofp %29 : vector<8x8xi32> to vector<8x8xf32>
    %31 = vector.extract_strided_slice %13 {offsets = [0, 0, 0], sizes = [4, 8, 1], strides = [1, 1, 1]} : vector<4x8x15xf32> to vector<4x8x1xf32>
    %32 = vector.shape_cast %30 : vector<8x8xf32> to vector<1x8x8xf32>
    %33 = vector.broadcast %31 : vector<4x8x1xf32> to vector<4x8x8xf32>
    %34 = vector.broadcast %32 : vector<1x8x8xf32> to vector<4x8x8xf32>
    %35 = arith.mulf %33, %34 : vector<4x8x8xf32>
    %36 = arith.addf %26, %35 : vector<4x8x8xf32>
    %c1_i32 = arith.constant 1 : i32
    %37 = vector.broadcast %c1_i32 : i32 to vector<8x8xi32>
    %38 = arith.cmpi eq, %25, %37 : vector<8x8xi32>
    %39 = arith.extui %38 : vector<8x8xi1> to vector<8x8xi32>
    %40 = arith.sitofp %39 : vector<8x8xi32> to vector<8x8xf32>
    %41 = vector.extract_strided_slice %13 {offsets = [0, 0, 1], sizes = [4, 8, 1], strides = [1, 1, 1]} : vector<4x8x15xf32> to vector<4x8x1xf32>
    %42 = vector.shape_cast %40 : vector<8x8xf32> to vector<1x8x8xf32>
    %43 = vector.broadcast %41 : vector<4x8x1xf32> to vector<4x8x8xf32>
    %44 = vector.broadcast %42 : vector<1x8x8xf32> to vector<4x8x8xf32>
    %45 = arith.mulf %43, %44 : vector<4x8x8xf32>
    %46 = arith.addf %36, %45 : vector<4x8x8xf32>
    %c2_i32 = arith.constant 2 : i32
    %47 = vector.broadcast %c2_i32 : i32 to vector<8x8xi32>
    %48 = arith.cmpi eq, %25, %47 : vector<8x8xi32>
    %49 = arith.extui %48 : vector<8x8xi1> to vector<8x8xi32>
    %50 = arith.sitofp %49 : vector<8x8xi32> to vector<8x8xf32>
    %51 = vector.extract_strided_slice %13 {offsets = [0, 0, 2], sizes = [4, 8, 1], strides = [1, 1, 1]} : vector<4x8x15xf32> to vector<4x8x1xf32>
    %52 = vector.shape_cast %50 : vector<8x8xf32> to vector<1x8x8xf32>
    %53 = vector.broadcast %51 : vector<4x8x1xf32> to vector<4x8x8xf32>
    %54 = vector.broadcast %52 : vector<1x8x8xf32> to vector<4x8x8xf32>
    %55 = arith.mulf %53, %54 : vector<4x8x8xf32>
    %56 = arith.addf %46, %55 : vector<4x8x8xf32>
    %c3_i32 = arith.constant 3 : i32
    %57 = vector.broadcast %c3_i32 : i32 to vector<8x8xi32>
    %58 = arith.cmpi eq, %25, %57 : vector<8x8xi32>
    %59 = arith.extui %58 : vector<8x8xi1> to vector<8x8xi32>
    %60 = arith.sitofp %59 : vector<8x8xi32> to vector<8x8xf32>
    %61 = vector.extract_strided_slice %13 {offsets = [0, 0, 3], sizes = [4, 8, 1], strides = [1, 1, 1]} : vector<4x8x15xf32> to vector<4x8x1xf32>
    %62 = vector.shape_cast %60 : vector<8x8xf32> to vector<1x8x8xf32>
    %63 = vector.broadcast %61 : vector<4x8x1xf32> to vector<4x8x8xf32>
    %64 = vector.broadcast %62 : vector<1x8x8xf32> to vector<4x8x8xf32>
    %65 = arith.mulf %63, %64 : vector<4x8x8xf32>
    %66 = arith.addf %56, %65 : vector<4x8x8xf32>
    %c4_i32 = arith.constant 4 : i32
    %67 = vector.broadcast %c4_i32 : i32 to vector<8x8xi32>
    %68 = arith.cmpi eq, %25, %67 : vector<8x8xi32>
    %69 = arith.extui %68 : vector<8x8xi1> to vector<8x8xi32>
    %70 = arith.sitofp %69 : vector<8x8xi32> to vector<8x8xf32>
    %71 = vector.extract_strided_slice %13 {offsets = [0, 0, 4], sizes = [4, 8, 1], strides = [1, 1, 1]} : vector<4x8x15xf32> to vector<4x8x1xf32>
    %72 = vector.shape_cast %70 : vector<8x8xf32> to vector<1x8x8xf32>
    %73 = vector.broadcast %71 : vector<4x8x1xf32> to vector<4x8x8xf32>
    %74 = vector.broadcast %72 : vector<1x8x8xf32> to vector<4x8x8xf32>
    %75 = arith.mulf %73, %74 : vector<4x8x8xf32>
    %76 = arith.addf %66, %75 : vector<4x8x8xf32>
    %c5_i32 = arith.constant 5 : i32
    %77 = vector.broadcast %c5_i32 : i32 to vector<8x8xi32>
    %78 = arith.cmpi eq, %25, %77 : vector<8x8xi32>
    %79 = arith.extui %78 : vector<8x8xi1> to vector<8x8xi32>
    %80 = arith.sitofp %79 : vector<8x8xi32> to vector<8x8xf32>
    %81 = vector.extract_strided_slice %13 {offsets = [0, 0, 5], sizes = [4, 8, 1], strides = [1, 1, 1]} : vector<4x8x15xf32> to vector<4x8x1xf32>
    %82 = vector.shape_cast %80 : vector<8x8xf32> to vector<1x8x8xf32>
    %83 = vector.broadcast %81 : vector<4x8x1xf32> to vector<4x8x8xf32>
    %84 = vector.broadcast %82 : vector<1x8x8xf32> to vector<4x8x8xf32>
    %85 = arith.mulf %83, %84 : vector<4x8x8xf32>
    %86 = arith.addf %76, %85 : vector<4x8x8xf32>
    %c6_i32 = arith.constant 6 : i32
    %87 = vector.broadcast %c6_i32 : i32 to vector<8x8xi32>
    %88 = arith.cmpi eq, %25, %87 : vector<8x8xi32>
    %89 = arith.extui %88 : vector<8x8xi1> to vector<8x8xi32>
    %90 = arith.sitofp %89 : vector<8x8xi32> to vector<8x8xf32>
    %91 = vector.extract_strided_slice %13 {offsets = [0, 0, 6], sizes = [4, 8, 1], strides = [1, 1, 1]} : vector<4x8x15xf32> to vector<4x8x1xf32>
    %92 = vector.shape_cast %90 : vector<8x8xf32> to vector<1x8x8xf32>
    %93 = vector.broadcast %91 : vector<4x8x1xf32> to vector<4x8x8xf32>
    %94 = vector.broadcast %92 : vector<1x8x8xf32> to vector<4x8x8xf32>
    %95 = arith.mulf %93, %94 : vector<4x8x8xf32>
    %96 = arith.addf %86, %95 : vector<4x8x8xf32>
    %c7_i32_15 = arith.constant 7 : i32
    %97 = vector.broadcast %c7_i32_15 : i32 to vector<8x8xi32>
    %98 = arith.cmpi eq, %25, %97 : vector<8x8xi32>
    %99 = arith.extui %98 : vector<8x8xi1> to vector<8x8xi32>
    %100 = arith.sitofp %99 : vector<8x8xi32> to vector<8x8xf32>
    %101 = vector.extract_strided_slice %13 {offsets = [0, 0, 7], sizes = [4, 8, 1], strides = [1, 1, 1]} : vector<4x8x15xf32> to vector<4x8x1xf32>
    %102 = vector.shape_cast %100 : vector<8x8xf32> to vector<1x8x8xf32>
    %103 = vector.broadcast %101 : vector<4x8x1xf32> to vector<4x8x8xf32>
    %104 = vector.broadcast %102 : vector<1x8x8xf32> to vector<4x8x8xf32>
    %105 = arith.mulf %103, %104 : vector<4x8x8xf32>
    %106 = arith.addf %96, %105 : vector<4x8x8xf32>
    %c8_i32_16 = arith.constant 8 : i32
    %107 = vector.broadcast %c8_i32_16 : i32 to vector<8x8xi32>
    %108 = arith.cmpi eq, %25, %107 : vector<8x8xi32>
    %109 = arith.extui %108 : vector<8x8xi1> to vector<8x8xi32>
    %110 = arith.sitofp %109 : vector<8x8xi32> to vector<8x8xf32>
    %111 = vector.extract_strided_slice %13 {offsets = [0, 0, 8], sizes = [4, 8, 1], strides = [1, 1, 1]} : vector<4x8x15xf32> to vector<4x8x1xf32>
    %112 = vector.shape_cast %110 : vector<8x8xf32> to vector<1x8x8xf32>
    %113 = vector.broadcast %111 : vector<4x8x1xf32> to vector<4x8x8xf32>
    %114 = vector.broadcast %112 : vector<1x8x8xf32> to vector<4x8x8xf32>
    %115 = arith.mulf %113, %114 : vector<4x8x8xf32>
    %116 = arith.addf %106, %115 : vector<4x8x8xf32>
    %c9_i32 = arith.constant 9 : i32
    %117 = vector.broadcast %c9_i32 : i32 to vector<8x8xi32>
    %118 = arith.cmpi eq, %25, %117 : vector<8x8xi32>
    %119 = arith.extui %118 : vector<8x8xi1> to vector<8x8xi32>
    %120 = arith.sitofp %119 : vector<8x8xi32> to vector<8x8xf32>
    %121 = vector.extract_strided_slice %13 {offsets = [0, 0, 9], sizes = [4, 8, 1], strides = [1, 1, 1]} : vector<4x8x15xf32> to vector<4x8x1xf32>
    %122 = vector.shape_cast %120 : vector<8x8xf32> to vector<1x8x8xf32>
    %123 = vector.broadcast %121 : vector<4x8x1xf32> to vector<4x8x8xf32>
    %124 = vector.broadcast %122 : vector<1x8x8xf32> to vector<4x8x8xf32>
    %125 = arith.mulf %123, %124 : vector<4x8x8xf32>
    %126 = arith.addf %116, %125 : vector<4x8x8xf32>
    %c10_i32 = arith.constant 10 : i32
    %127 = vector.broadcast %c10_i32 : i32 to vector<8x8xi32>
    %128 = arith.cmpi eq, %25, %127 : vector<8x8xi32>
    %129 = arith.extui %128 : vector<8x8xi1> to vector<8x8xi32>
    %130 = arith.sitofp %129 : vector<8x8xi32> to vector<8x8xf32>
    %131 = vector.extract_strided_slice %13 {offsets = [0, 0, 10], sizes = [4, 8, 1], strides = [1, 1, 1]} : vector<4x8x15xf32> to vector<4x8x1xf32>
    %132 = vector.shape_cast %130 : vector<8x8xf32> to vector<1x8x8xf32>
    %133 = vector.broadcast %131 : vector<4x8x1xf32> to vector<4x8x8xf32>
    %134 = vector.broadcast %132 : vector<1x8x8xf32> to vector<4x8x8xf32>
    %135 = arith.mulf %133, %134 : vector<4x8x8xf32>
    %136 = arith.addf %126, %135 : vector<4x8x8xf32>
    %c11_i32 = arith.constant 11 : i32
    %137 = vector.broadcast %c11_i32 : i32 to vector<8x8xi32>
    %138 = arith.cmpi eq, %25, %137 : vector<8x8xi32>
    %139 = arith.extui %138 : vector<8x8xi1> to vector<8x8xi32>
    %140 = arith.sitofp %139 : vector<8x8xi32> to vector<8x8xf32>
    %141 = vector.extract_strided_slice %13 {offsets = [0, 0, 11], sizes = [4, 8, 1], strides = [1, 1, 1]} : vector<4x8x15xf32> to vector<4x8x1xf32>
    %142 = vector.shape_cast %140 : vector<8x8xf32> to vector<1x8x8xf32>
    %143 = vector.broadcast %141 : vector<4x8x1xf32> to vector<4x8x8xf32>
    %144 = vector.broadcast %142 : vector<1x8x8xf32> to vector<4x8x8xf32>
    %145 = arith.mulf %143, %144 : vector<4x8x8xf32>
    %146 = arith.addf %136, %145 : vector<4x8x8xf32>
    %c12_i32 = arith.constant 12 : i32
    %147 = vector.broadcast %c12_i32 : i32 to vector<8x8xi32>
    %148 = arith.cmpi eq, %25, %147 : vector<8x8xi32>
    %149 = arith.extui %148 : vector<8x8xi1> to vector<8x8xi32>
    %150 = arith.sitofp %149 : vector<8x8xi32> to vector<8x8xf32>
    %151 = vector.extract_strided_slice %13 {offsets = [0, 0, 12], sizes = [4, 8, 1], strides = [1, 1, 1]} : vector<4x8x15xf32> to vector<4x8x1xf32>
    %152 = vector.shape_cast %150 : vector<8x8xf32> to vector<1x8x8xf32>
    %153 = vector.broadcast %151 : vector<4x8x1xf32> to vector<4x8x8xf32>
    %154 = vector.broadcast %152 : vector<1x8x8xf32> to vector<4x8x8xf32>
    %155 = arith.mulf %153, %154 : vector<4x8x8xf32>
    %156 = arith.addf %146, %155 : vector<4x8x8xf32>
    %c13_i32 = arith.constant 13 : i32
    %157 = vector.broadcast %c13_i32 : i32 to vector<8x8xi32>
    %158 = arith.cmpi eq, %25, %157 : vector<8x8xi32>
    %159 = arith.extui %158 : vector<8x8xi1> to vector<8x8xi32>
    %160 = arith.sitofp %159 : vector<8x8xi32> to vector<8x8xf32>
    %161 = vector.extract_strided_slice %13 {offsets = [0, 0, 13], sizes = [4, 8, 1], strides = [1, 1, 1]} : vector<4x8x15xf32> to vector<4x8x1xf32>
    %162 = vector.shape_cast %160 : vector<8x8xf32> to vector<1x8x8xf32>
    %163 = vector.broadcast %161 : vector<4x8x1xf32> to vector<4x8x8xf32>
    %164 = vector.broadcast %162 : vector<1x8x8xf32> to vector<4x8x8xf32>
    %165 = arith.mulf %163, %164 : vector<4x8x8xf32>
    %166 = arith.addf %156, %165 : vector<4x8x8xf32>
    %c14_i32 = arith.constant 14 : i32
    %167 = vector.broadcast %c14_i32 : i32 to vector<8x8xi32>
    %168 = arith.cmpi eq, %25, %167 : vector<8x8xi32>
    %169 = arith.extui %168 : vector<8x8xi1> to vector<8x8xi32>
    %170 = arith.sitofp %169 : vector<8x8xi32> to vector<8x8xf32>
    %171 = vector.extract_strided_slice %13 {offsets = [0, 0, 14], sizes = [4, 8, 1], strides = [1, 1, 1]} : vector<4x8x15xf32> to vector<4x8x1xf32>
    %172 = vector.shape_cast %170 : vector<8x8xf32> to vector<1x8x8xf32>
    %173 = vector.broadcast %171 : vector<4x8x1xf32> to vector<4x8x8xf32>
    %174 = vector.broadcast %172 : vector<1x8x8xf32> to vector<4x8x8xf32>
    %175 = arith.mulf %173, %174 : vector<4x8x8xf32>
    %176 = arith.addf %166, %175 : vector<4x8x8xf32>
    %177 = arith.addf %9, %176 : vector<4x8x8xf32>
    %cst_17 = arith.constant 0.353553385 : f32
    %178 = vector.broadcast %cst_17 : f32 to vector<4x8x8xf32>
    %179 = arith.mulf %177, %178 : vector<4x8x8xf32>
    %cst_18 = arith.constant dense<0xFF800000> : vector<4x8xf32>
    %180 = vector.multi_reduction <maximumf>, %179, %cst_18 [2] : vector<4x8x8xf32> to vector<4x8xf32>
    %181 = vector.shape_cast %180 : vector<4x8xf32> to vector<4x8x1xf32>
    %182 = vector.broadcast %181 : vector<4x8x1xf32> to vector<4x8x8xf32>
    %183 = arith.subf %179, %182 : vector<4x8x8xf32>
    %184 = math.exp %183 : vector<4x8x8xf32>
    %cst_19 = arith.constant dense<0.000000e+00> : vector<4x8xf32>
    %185 = vector.multi_reduction <add>, %184, %cst_19 [2] : vector<4x8x8xf32> to vector<4x8xf32>
    %186 = vector.shape_cast %185 : vector<4x8xf32> to vector<4x8x1xf32>
    %cst_20 = arith.constant 1.000000e+00 : f32
    %187 = vector.broadcast %cst_20 : f32 to vector<4x8x1xf32>
    %188 = arith.divf %187, %186 : vector<4x8x1xf32>
    %189 = vector.broadcast %188 : vector<4x8x1xf32> to vector<4x8x8xf32>
    %190 = arith.mulf %184, %189 : vector<4x8x8xf32>
    %c0_21 = arith.constant 0 : index
    %c0_22 = arith.constant 0 : index
    %c0_23 = arith.constant 0 : index
    %c0_24 = arith.constant 0 : index
    %191 = vector.load %arg19[%c0_21, %c0_22, %c0_23, %c0_24] : memref<1x4x8x8xf32, #tpu.memory_space<vmem>>, vector<1x4x8x8xf32>
    %192 = vector.shape_cast %191 : vector<1x4x8x8xf32> to vector<4x8x8xf32>
    %193 = vector.shape_cast %190 : vector<4x8x8xf32> to vector<1x4x8x8xf32>
    tpu.vector_store %arg19[%c0_21, %c0_22, %c0_23, %c0_24], %193 {strides = array<i32>} : memref<1x4x8x8xf32, #tpu.memory_space<vmem>>, vector<1x4x8x8xf32>,
    %194 = arith.truncf %190 : vector<4x8x8xf32> to vector<4x8x8xbf16>
    "tpu.trace_start"() <{level = 10 : i32, message = "hqk,hkd->hqd"}> : () -> ()
    %cst_25 = arith.constant dense<0.000000e+00> : vector<4x8x8xf32>
    %195 = tpu.matmul %194, %8, %cst_25 {dimension_numbers = #tpu.dot_dimension_numbers<[2], [1], [1], [2], [0, 0, 0, 1, 1, 2], [0], [0]>} : vector<4x8x8xbf16>, vector<4x8x8xbf16>, vector<4x8x8xf32> -> vector<4x8x8xf32>
    %c0_i32_26 = arith.constant 0 : i32
    "tpu.trace_stop"() : () -> ()
    %196 = vector.broadcast %c0_i32_26 : i32 to vector<8x8xi32>
    %197 = arith.cmpi eq, %25, %196 : vector<8x8xi32>
    %198 = arith.extui %197 : vector<8x8xi1> to vector<8x8xi32>
    %199 = arith.sitofp %198 : vector<8x8xi32> to vector<8x8xf32>
    %200 = vector.shape_cast %199 : vector<8x8xf32> to vector<1x8x8xf32>
    %201 = vector.broadcast %200 : vector<1x8x8xf32> to vector<4x8x8xf32>
    %202 = arith.mulf %190, %201 : vector<4x8x8xf32>
    %cst_27 = arith.constant dense<0.000000e+00> : vector<4x8xf32>
    %203 = vector.multi_reduction <add>, %202, %cst_27 [2] : vector<4x8x8xf32> to vector<4x8xf32>
    %204 = vector.shape_cast %203 : vector<4x8xf32> to vector<4x8x1xf32>
    %c1_i32_28 = arith.constant 1 : i32
    %205 = vector.broadcast %c1_i32_28 : i32 to vector<8x8xi32>
    %206 = arith.cmpi eq, %25, %205 : vector<8x8xi32>
    %207 = arith.extui %206 : vector<8x8xi1> to vector<8x8xi32>
    %208 = arith.sitofp %207 : vector<8x8xi32> to vector<8x8xf32>
    %209 = vector.shape_cast %208 : vector<8x8xf32> to vector<1x8x8xf32>
    %210 = vector.broadcast %209 : vector<1x8x8xf32> to vector<4x8x8xf32>
    %211 = arith.mulf %190, %210 : vector<4x8x8xf32>
    %cst_29 = arith.constant dense<0.000000e+00> : vector<4x8xf32>
    %212 = vector.multi_reduction <add>, %211, %cst_29 [2] : vector<4x8x8xf32> to vector<4x8xf32>
    %213 = vector.shape_cast %212 : vector<4x8xf32> to vector<4x8x1xf32>
    %c2_i32_30 = arith.constant 2 : i32
    %214 = vector.broadcast %c2_i32_30 : i32 to vector<8x8xi32>
    %215 = arith.cmpi eq, %25, %214 : vector<8x8xi32>
    %216 = arith.extui %215 : vector<8x8xi1> to vector<8x8xi32>
    %217 = arith.sitofp %216 : vector<8x8xi32> to vector<8x8xf32>
    %218 = vector.shape_cast %217 : vector<8x8xf32> to vector<1x8x8xf32>
    %219 = vector.broadcast %218 : vector<1x8x8xf32> to vector<4x8x8xf32>
    %220 = arith.mulf %190, %219 : vector<4x8x8xf32>
    %cst_31 = arith.constant dense<0.000000e+00> : vector<4x8xf32>
    %221 = vector.multi_reduction <add>, %220, %cst_31 [2] : vector<4x8x8xf32> to vector<4x8xf32>
    %222 = vector.shape_cast %221 : vector<4x8xf32> to vector<4x8x1xf32>
    %c3_i32_32 = arith.constant 3 : i32
    %223 = vector.broadcast %c3_i32_32 : i32 to vector<8x8xi32>
    %224 = arith.cmpi eq, %25, %223 : vector<8x8xi32>
    %225 = arith.extui %224 : vector<8x8xi1> to vector<8x8xi32>
    %226 = arith.sitofp %225 : vector<8x8xi32> to vector<8x8xf32>
    %227 = vector.shape_cast %226 : vector<8x8xf32> to vector<1x8x8xf32>
    %228 = vector.broadcast %227 : vector<1x8x8xf32> to vector<4x8x8xf32>
    %229 = arith.mulf %190, %228 : vector<4x8x8xf32>
    %cst_33 = arith.constant dense<0.000000e+00> : vector<4x8xf32>
    %230 = vector.multi_reduction <add>, %229, %cst_33 [2] : vector<4x8x8xf32> to vector<4x8xf32>
    %231 = vector.shape_cast %230 : vector<4x8xf32> to vector<4x8x1xf32>
    %c4_i32_34 = arith.constant 4 : i32
    %232 = vector.broadcast %c4_i32_34 : i32 to vector<8x8xi32>
    %233 = arith.cmpi eq, %25, %232 : vector<8x8xi32>
    %234 = arith.extui %233 : vector<8x8xi1> to vector<8x8xi32>
    %235 = arith.sitofp %234 : vector<8x8xi32> to vector<8x8xf32>
    %236 = vector.shape_cast %235 : vector<8x8xf32> to vector<1x8x8xf32>
    %237 = vector.broadcast %236 : vector<1x8x8xf32> to vector<4x8x8xf32>
    %238 = arith.mulf %190, %237 : vector<4x8x8xf32>
    %cst_35 = arith.constant dense<0.000000e+00> : vector<4x8xf32>
    %239 = vector.multi_reduction <add>, %238, %cst_35 [2] : vector<4x8x8xf32> to vector<4x8xf32>
    %240 = vector.shape_cast %239 : vector<4x8xf32> to vector<4x8x1xf32>
    %c5_i32_36 = arith.constant 5 : i32
    %241 = vector.broadcast %c5_i32_36 : i32 to vector<8x8xi32>
    %242 = arith.cmpi eq, %25, %241 : vector<8x8xi32>
    %243 = arith.extui %242 : vector<8x8xi1> to vector<8x8xi32>
    %244 = arith.sitofp %243 : vector<8x8xi32> to vector<8x8xf32>
    %245 = vector.shape_cast %244 : vector<8x8xf32> to vector<1x8x8xf32>
    %246 = vector.broadcast %245 : vector<1x8x8xf32> to vector<4x8x8xf32>
    %247 = arith.mulf %190, %246 : vector<4x8x8xf32>
    %cst_37 = arith.constant dense<0.000000e+00> : vector<4x8xf32>
    %248 = vector.multi_reduction <add>, %247, %cst_37 [2] : vector<4x8x8xf32> to vector<4x8xf32>
    %249 = vector.shape_cast %248 : vector<4x8xf32> to vector<4x8x1xf32>
    %c6_i32_38 = arith.constant 6 : i32
    %250 = vector.broadcast %c6_i32_38 : i32 to vector<8x8xi32>
    %251 = arith.cmpi eq, %25, %250 : vector<8x8xi32>
    %252 = arith.extui %251 : vector<8x8xi1> to vector<8x8xi32>
    %253 = arith.sitofp %252 : vector<8x8xi32> to vector<8x8xf32>
    %254 = vector.shape_cast %253 : vector<8x8xf32> to vector<1x8x8xf32>
    %255 = vector.broadcast %254 : vector<1x8x8xf32> to vector<4x8x8xf32>
    %256 = arith.mulf %190, %255 : vector<4x8x8xf32>
    %cst_39 = arith.constant dense<0.000000e+00> : vector<4x8xf32>
    %257 = vector.multi_reduction <add>, %256, %cst_39 [2] : vector<4x8x8xf32> to vector<4x8xf32>
    %258 = vector.shape_cast %257 : vector<4x8xf32> to vector<4x8x1xf32>
    %c7_i32_40 = arith.constant 7 : i32
    %259 = vector.broadcast %c7_i32_40 : i32 to vector<8x8xi32>
    %260 = arith.cmpi eq, %25, %259 : vector<8x8xi32>
    %261 = arith.extui %260 : vector<8x8xi1> to vector<8x8xi32>
    %262 = arith.sitofp %261 : vector<8x8xi32> to vector<8x8xf32>
    %263 = vector.shape_cast %262 : vector<8x8xf32> to vector<1x8x8xf32>
    %264 = vector.broadcast %263 : vector<1x8x8xf32> to vector<4x8x8xf32>
    %265 = arith.mulf %190, %264 : vector<4x8x8xf32>
    %cst_41 = arith.constant dense<0.000000e+00> : vector<4x8xf32>
    %266 = vector.multi_reduction <add>, %265, %cst_41 [2] : vector<4x8x8xf32> to vector<4x8xf32>
    %267 = vector.shape_cast %266 : vector<4x8xf32> to vector<4x8x1xf32>
    %c8_i32_42 = arith.constant 8 : i32
    %268 = vector.broadcast %c8_i32_42 : i32 to vector<8x8xi32>
    %269 = arith.cmpi eq, %25, %268 : vector<8x8xi32>
    %270 = arith.extui %269 : vector<8x8xi1> to vector<8x8xi32>
    %271 = arith.sitofp %270 : vector<8x8xi32> to vector<8x8xf32>
    %272 = vector.shape_cast %271 : vector<8x8xf32> to vector<1x8x8xf32>
    %273 = vector.broadcast %272 : vector<1x8x8xf32> to vector<4x8x8xf32>
    %274 = arith.mulf %190, %273 : vector<4x8x8xf32>
    %cst_43 = arith.constant dense<0.000000e+00> : vector<4x8xf32>
    %275 = vector.multi_reduction <add>, %274, %cst_43 [2] : vector<4x8x8xf32> to vector<4x8xf32>
    %276 = vector.shape_cast %275 : vector<4x8xf32> to vector<4x8x1xf32>
    %c9_i32_44 = arith.constant 9 : i32
    %277 = vector.broadcast %c9_i32_44 : i32 to vector<8x8xi32>
    %278 = arith.cmpi eq, %25, %277 : vector<8x8xi32>
    %279 = arith.extui %278 : vector<8x8xi1> to vector<8x8xi32>
    %280 = arith.sitofp %279 : vector<8x8xi32> to vector<8x8xf32>
    %281 = vector.shape_cast %280 : vector<8x8xf32> to vector<1x8x8xf32>
    %282 = vector.broadcast %281 : vector<1x8x8xf32> to vector<4x8x8xf32>
    %283 = arith.mulf %190, %282 : vector<4x8x8xf32>
    %cst_45 = arith.constant dense<0.000000e+00> : vector<4x8xf32>
    %284 = vector.multi_reduction <add>, %283, %cst_45 [2] : vector<4x8x8xf32> to vector<4x8xf32>
    %285 = vector.shape_cast %284 : vector<4x8xf32> to vector<4x8x1xf32>
    %c10_i32_46 = arith.constant 10 : i32
    %286 = vector.broadcast %c10_i32_46 : i32 to vector<8x8xi32>
    %287 = arith.cmpi eq, %25, %286 : vector<8x8xi32>
    %288 = arith.extui %287 : vector<8x8xi1> to vector<8x8xi32>
    %289 = arith.sitofp %288 : vector<8x8xi32> to vector<8x8xf32>
    %290 = vector.shape_cast %289 : vector<8x8xf32> to vector<1x8x8xf32>
    %291 = vector.broadcast %290 : vector<1x8x8xf32> to vector<4x8x8xf32>
    %292 = arith.mulf %190, %291 : vector<4x8x8xf32>
    %cst_47 = arith.constant dense<0.000000e+00> : vector<4x8xf32>
    %293 = vector.multi_reduction <add>, %292, %cst_47 [2] : vector<4x8x8xf32> to vector<4x8xf32>
    %294 = vector.shape_cast %293 : vector<4x8xf32> to vector<4x8x1xf32>
    %c11_i32_48 = arith.constant 11 : i32
    %295 = vector.broadcast %c11_i32_48 : i32 to vector<8x8xi32>
    %296 = arith.cmpi eq, %25, %295 : vector<8x8xi32>
    %297 = arith.extui %296 : vector<8x8xi1> to vector<8x8xi32>
    %298 = arith.sitofp %297 : vector<8x8xi32> to vector<8x8xf32>
    %299 = vector.shape_cast %298 : vector<8x8xf32> to vector<1x8x8xf32>
    %300 = vector.broadcast %299 : vector<1x8x8xf32> to vector<4x8x8xf32>
    %301 = arith.mulf %190, %300 : vector<4x8x8xf32>
    %cst_49 = arith.constant dense<0.000000e+00> : vector<4x8xf32>
    %302 = vector.multi_reduction <add>, %301, %cst_49 [2] : vector<4x8x8xf32> to vector<4x8xf32>
    %303 = vector.shape_cast %302 : vector<4x8xf32> to vector<4x8x1xf32>
    %c12_i32_50 = arith.constant 12 : i32
    %304 = vector.broadcast %c12_i32_50 : i32 to vector<8x8xi32>
    %305 = arith.cmpi eq, %25, %304 : vector<8x8xi32>
    %306 = arith.extui %305 : vector<8x8xi1> to vector<8x8xi32>
    %307 = arith.sitofp %306 : vector<8x8xi32> to vector<8x8xf32>
    %308 = vector.shape_cast %307 : vector<8x8xf32> to vector<1x8x8xf32>
    %309 = vector.broadcast %308 : vector<1x8x8xf32> to vector<4x8x8xf32>
    %310 = arith.mulf %190, %309 : vector<4x8x8xf32>
    %cst_51 = arith.constant dense<0.000000e+00> : vector<4x8xf32>
    %311 = vector.multi_reduction <add>, %310, %cst_51 [2] : vector<4x8x8xf32> to vector<4x8xf32>
    %312 = vector.shape_cast %311 : vector<4x8xf32> to vector<4x8x1xf32>
    %c13_i32_52 = arith.constant 13 : i32
    %313 = vector.broadcast %c13_i32_52 : i32 to vector<8x8xi32>
    %314 = arith.cmpi eq, %25, %313 : vector<8x8xi32>
    %315 = arith.extui %314 : vector<8x8xi1> to vector<8x8xi32>
    %316 = arith.sitofp %315 : vector<8x8xi32> to vector<8x8xf32>
    %317 = vector.shape_cast %316 : vector<8x8xf32> to vector<1x8x8xf32>
    %318 = vector.broadcast %317 : vector<1x8x8xf32> to vector<4x8x8xf32>
    %319 = arith.mulf %190, %318 : vector<4x8x8xf32>
    %cst_53 = arith.constant dense<0.000000e+00> : vector<4x8xf32>
    %320 = vector.multi_reduction <add>, %319, %cst_53 [2] : vector<4x8x8xf32> to vector<4x8xf32>
    %321 = vector.shape_cast %320 : vector<4x8xf32> to vector<4x8x1xf32>
    %c14_i32_54 = arith.constant 14 : i32
    %322 = vector.broadcast %c14_i32_54 : i32 to vector<8x8xi32>
    %323 = arith.cmpi eq, %25, %322 : vector<8x8xi32>
    %324 = arith.extui %323 : vector<8x8xi1> to vector<8x8xi32>
    %325 = arith.sitofp %324 : vector<8x8xi32> to vector<8x8xf32>
    %326 = vector.shape_cast %325 : vector<8x8xf32> to vector<1x8x8xf32>
    %327 = vector.broadcast %326 : vector<1x8x8xf32> to vector<4x8x8xf32>
    %328 = arith.mulf %190, %327 : vector<4x8x8xf32>
    %cst_55 = arith.constant dense<0.000000e+00> : vector<4x8xf32>
    %329 = vector.multi_reduction <add>, %328, %cst_55 [2] : vector<4x8x8xf32> to vector<4x8xf32>
    %330 = vector.shape_cast %329 : vector<4x8xf32> to vector<4x8x1xf32>
    %331 = tpu.concatenate %204, %213, %222, %231, %240, %249, %258, %267, %276, %285, %294, %303, %312, %321, %330 in 2 : vector<4x8x1xf32>, vector<4x8x1xf32>, vector<4x8x1xf32>, vector<4x8x1xf32>, vector<4x8x1xf32>, vector<4x8x1xf32>, vector<4x8x1xf32>, vector<4x8x1xf32>, vector<4x8x1xf32>, vector<4x8x1xf32>, vector<4x8x1xf32>, vector<4x8x1xf32>, vector<4x8x1xf32>, vector<4x8x1xf32>, vector<4x8x1xf32> -> vector<4x8x15xf32>
    %332 = vector.shape_cast %331 : vector<4x8x15xf32> to vector<32x15xf32>
    %333 = arith.truncf %332 : vector<32x15xf32> to vector<32x15xbf16>
    %c0_56 = arith.constant 0 : index
    %c0_57 = arith.constant 0 : index
    %334 = vector.load %arg7[%c0_56, %c0_57] : memref<15x8xbf16, #tpu.memory_space<vmem>>, vector<15x8xbf16>
    %cst_58 = arith.constant dense<0.000000e+00> : vector<32x8xf32>
    %335 = tpu.matmul %333, %334, %cst_58 {dimension_numbers = #tpu.dot_dimension_numbers<[1], [0], [0], [1], [0, 0, 1, 1], [], []>} : vector<32x15xbf16>, vector<15x8xbf16>, vector<32x8xf32> -> vector<32x8xf32>
    %336 = vector.shape_cast %335 : vector<32x8xf32> to vector<4x8x8xf32>
    %337 = arith.addf %195, %336 : vector<4x8x8xf32>
    %338 = vector.extract_strided_slice %337 {offsets = [0, 0, 0], sizes = [1, 8, 8], strides = [1, 1, 1]} : vector<4x8x8xf32> to vector<1x8x8xf32>
    %339 = vector.shape_cast %338 : vector<1x8x8xf32> to vector<8x8xf32>
    %340 = vector.extract_strided_slice %337 {offsets = [1, 0, 0], sizes = [1, 8, 8], strides = [1, 1, 1]} : vector<4x8x8xf32> to vector<1x8x8xf32>
    %341 = vector.shape_cast %340 : vector<1x8x8xf32> to vector<8x8xf32>
    %342 = vector.extract_strided_slice %337 {offsets = [2, 0, 0], sizes = [1, 8, 8], strides = [1, 1, 1]} : vector<4x8x8xf32> to vector<1x8x8xf32>
    %343 = vector.shape_cast %342 : vector<1x8x8xf32> to vector<8x8xf32>
    %344 = vector.extract_strided_slice %337 {offsets = [3, 0, 0], sizes = [1, 8, 8], strides = [1, 1, 1]} : vector<4x8x8xf32> to vector<1x8x8xf32>
    %345 = vector.shape_cast %344 : vector<1x8x8xf32> to vector<8x8xf32>
    %346 = tpu.concatenate %339, %341, %343, %345 in 1 : vector<8x8xf32>, vector<8x8xf32>, vector<8x8xf32>, vector<8x8xf32> -> vector<8x32xf32>
    %347 = arith.truncf %346 : vector<8x32xf32> to vector<8x32xbf16>
    %c0_59 = arith.constant 0 : index
    %c0_60 = arith.constant 0 : index
    %348 = vector.load %arg8[%c0_59, %c0_60] : memref<32x32xbf16, #tpu.memory_space<vmem>>, vector<32x32xbf16>
    %cst_61 = arith.constant dense<0.000000e+00> : vector<8x32xf32>
    %349 = tpu.matmul %347, %348, %cst_61 {dimension_numbers = #tpu.dot_dimension_numbers<[1], [0], [0], [1], [0, 0, 1, 1], [], []>} : vector<8x32xbf16>, vector<32x32xbf16>, vector<8x32xf32> -> vector<8x32xf32>
    %c0_62 = arith.constant 0 : index
    %c0_63 = arith.constant 0 : index
    %350 = vector.load %arg9[%c0_62, %c0_63] : memref<1x32xf32, #tpu.memory_space<vmem>>, vector<1x32xf32>
    %351 = vector.broadcast %350 : vector<1x32xf32> to vector<8x32xf32>
    %352 = arith.addf %349, %351 : vector<8x32xf32>
    %c0_64 = arith.constant 0 : index
    %c0_65 = arith.constant 0 : index
    %c0_66 = arith.constant 0 : index
    %353 = vector.load %arg2[%c0_64, %c0_65, %c0_66] : memref<1x8x32xf32, #tpu.memory_space<vmem>>, vector<1x8x32xf32>
    %354 = vector.shape_cast %353 : vector<1x8x32xf32> to vector<8x32xf32>
    %355 = arith.addf %354, %352 : vector<8x32xf32>
    %c0_67 = arith.constant 0 : index
    %c0_68 = arith.constant 0 : index
    %356 = vector.load %arg10[%c0_67, %c0_68] : memref<1x32xf32, #tpu.memory_space<vmem>>, vector<1x32xf32>
    %c0_69 = arith.constant 0 : index
    %c0_70 = arith.constant 0 : index
    %357 = vector.load %arg11[%c0_69, %c0_70] : memref<1x32xf32, #tpu.memory_space<vmem>>, vector<1x32xf32>
    %cst_71 = arith.constant dense<0.000000e+00> : vector<8xf32>
    %358 = vector.multi_reduction <add>, %355, %cst_71 [1] : vector<8x32xf32> to vector<8xf32>
    %359 = vector.shape_cast %358 : vector<8xf32> to vector<8x1xf32>
    %cst_72 = arith.constant 3.200000e+01 : f32
    %360 = vector.broadcast %cst_72 : f32 to vector<8x1xf32>
    %361 = arith.divf %359, %360 : vector<8x1xf32>
    %362 = vector.broadcast %361 : vector<8x1xf32> to vector<8x32xf32>
    %363 = arith.subf %355, %362 : vector<8x32xf32>
    %364 = arith.mulf %363, %363 : vector<8x32xf32>
    %cst_73 = arith.constant dense<0.000000e+00> : vector<8xf32>
    %365 = vector.multi_reduction <add>, %364, %cst_73 [1] : vector<8x32xf32> to vector<8xf32>
    %366 = vector.shape_cast %365 : vector<8xf32> to vector<8x1xf32>
    %cst_74 = arith.constant 3.200000e+01 : f32
    %367 = vector.broadcast %cst_74 : f32 to vector<8x1xf32>
    %368 = arith.divf %366, %367 : vector<8x1xf32>
    %369 = vector.broadcast %361 : vector<8x1xf32> to vector<8x32xf32>
    %370 = arith.subf %355, %369 : vector<8x32xf32>
    %cst_75 = arith.constant 9.99999974E-6 : f32
    %371 = vector.broadcast %cst_75 : f32 to vector<8x1xf32>
    %372 = arith.addf %368, %371 : vector<8x1xf32>
    %373 = math.rsqrt %372 : vector<8x1xf32>
    %374 = vector.broadcast %373 : vector<8x1xf32> to vector<8x32xf32>
    %375 = arith.mulf %370, %374 : vector<8x32xf32>
    %376 = vector.broadcast %356 : vector<1x32xf32> to vector<8x32xf32>
    %377 = arith.mulf %375, %376 : vector<8x32xf32>
    %378 = vector.broadcast %357 : vector<1x32xf32> to vector<8x32xf32>
    %379 = arith.addf %377, %378 : vector<8x32xf32>
    %380 = arith.truncf %379 : vector<8x32xf32> to vector<8x32xbf16>
    %c0_76 = arith.constant 0 : index
    %c0_77 = arith.constant 0 : index
    %381 = vector.load %arg12[%c0_76, %c0_77] : memref<32x64xbf16, #tpu.memory_space<vmem>>, vector<32x64xbf16>
    %cst_78 = arith.constant dense<0.000000e+00> : vector<8x64xf32>
    %382 = tpu.matmul %380, %381, %cst_78 {dimension_numbers = #tpu.dot_dimension_numbers<[1], [0], [0], [1], [0, 0, 1, 1], [], []>} : vector<8x32xbf16>, vector<32x64xbf16>, vector<8x64xf32> -> vector<8x64xf32>
    %c0_79 = arith.constant 0 : index
    %c0_80 = arith.constant 0 : index
    %383 = vector.load %arg13[%c0_79, %c0_80] : memref<1x64xf32, #tpu.memory_space<vmem>>, vector<1x64xf32>
    %384 = vector.broadcast %383 : vector<1x64xf32> to vector<8x64xf32>
    %385 = arith.addf %382, %384 : vector<8x64xf32>
    %cst_81 = arith.constant 5.000000e-01 : f32
    %386 = vector.broadcast %cst_81 : f32 to vector<8x64xf32>
    %387 = arith.mulf %386, %385 : vector<8x64xf32>
    %cst_82 = arith.constant 4.471500e-02 : f32
    %388 = vector.broadcast %cst_82 : f32 to vector<8x64xf32>
    %389 = arith.mulf %388, %385 : vector<8x64xf32>
    %390 = arith.mulf %389, %385 : vector<8x64xf32>
    %391 = arith.mulf %390, %385 : vector<8x64xf32>
    %392 = arith.addf %385, %391 : vector<8x64xf32>
    %cst_83 = arith.constant 0.797884583 : f32
    %393 = vector.broadcast %cst_83 : f32 to vector<8x64xf32>
    %394 = arith.mulf %393, %392 : vector<8x64xf32>
    %395 = math.tanh %394 : vector<8x64xf32>
    %cst_84 = arith.constant 1.000000e+00 : f32
    %396 = vector.broadcast %cst_84 : f32 to vector<8x64xf32>
    %397 = arith.addf %396, %395 : vector<8x64xf32>
    %398 = arith.mulf %387, %397 : vector<8x64xf32>
    %399 = arith.truncf %398 : vector<8x64xf32> to vector<8x64xbf16>
    %c0_85 = arith.constant 0 : index
    %c0_86 = arith.constant 0 : index
    %400 = vector.load %arg14[%c0_85, %c0_86] : memref<64x32xbf16, #tpu.memory_space<vmem>>, vector<64x32xbf16>
    %cst_87 = arith.constant dense<0.000000e+00> : vector<8x32xf32>
    %401 = tpu.matmul %399, %400, %cst_87 {dimension_numbers = #tpu.dot_dimension_numbers<[1], [0], [0], [1], [0, 0, 1, 1], [], []>} : vector<8x64xbf16>, vector<64x32xbf16>, vector<8x32xf32> -> vector<8x32xf32>
    %c0_88 = arith.constant 0 : index
    %c0_89 = arith.constant 0 : index
    %402 = vector.load %arg15[%c0_88, %c0_89] : memref<1x32xf32, #tpu.memory_space<vmem>>, vector<1x32xf32>
    %403 = vector.broadcast %402 : vector<1x32xf32> to vector<8x32xf32>
    %404 = arith.addf %401, %403 : vector<8x32xf32>
    %405 = arith.addf %379, %404 : vector<8x32xf32>
    %c0_90 = arith.constant 0 : index
    %c0_91 = arith.constant 0 : index
    %406 = vector.load %arg16[%c0_90, %c0_91] : memref<1x32xf32, #tpu.memory_space<vmem>>, vector<1x32xf32>
    %c0_92 = arith.constant 0 : index
    %c0_93 = arith.constant 0 : index
    %407 = vector.load %arg17[%c0_92, %c0_93] : memref<1x32xf32, #tpu.memory_space<vmem>>, vector<1x32xf32>
    %cst_94 = arith.constant dense<0.000000e+00> : vector<8xf32>
    %408 = vector.multi_reduction <add>, %405, %cst_94 [1] : vector<8x32xf32> to vector<8xf32>
    %409 = vector.shape_cast %408 : vector<8xf32> to vector<8x1xf32>
    %cst_95 = arith.constant 3.200000e+01 : f32
    %410 = vector.broadcast %cst_95 : f32 to vector<8x1xf32>
    %411 = arith.divf %409, %410 : vector<8x1xf32>
    %412 = vector.broadcast %411 : vector<8x1xf32> to vector<8x32xf32>
    %413 = arith.subf %405, %412 : vector<8x32xf32>
    %414 = arith.mulf %413, %413 : vector<8x32xf32>
    %cst_96 = arith.constant dense<0.000000e+00> : vector<8xf32>
    %415 = vector.multi_reduction <add>, %414, %cst_96 [1] : vector<8x32xf32> to vector<8xf32>
    %416 = vector.shape_cast %415 : vector<8xf32> to vector<8x1xf32>
    %cst_97 = arith.constant 3.200000e+01 : f32
    %417 = vector.broadcast %cst_97 : f32 to vector<8x1xf32>
    %418 = arith.divf %416, %417 : vector<8x1xf32>
    %419 = vector.broadcast %411 : vector<8x1xf32> to vector<8x32xf32>
    %420 = arith.subf %405, %419 : vector<8x32xf32>
    %cst_98 = arith.constant 9.99999974E-6 : f32
    %421 = vector.broadcast %cst_98 : f32 to vector<8x1xf32>
    %422 = arith.addf %418, %421 : vector<8x1xf32>
    %423 = math.rsqrt %422 : vector<8x1xf32>
    %424 = vector.broadcast %423 : vector<8x1xf32> to vector<8x32xf32>
    %425 = arith.mulf %420, %424 : vector<8x32xf32>
    %426 = vector.broadcast %406 : vector<1x32xf32> to vector<8x32xf32>
    %427 = arith.mulf %425, %426 : vector<8x32xf32>
    %428 = vector.broadcast %407 : vector<1x32xf32> to vector<8x32xf32>
    %429 = arith.addf %427, %428 : vector<8x32xf32>
    %c0_99 = arith.constant 0 : index
    %c0_100 = arith.constant 0 : index
    %c0_101 = arith.constant 0 : index
    %430 = vector.load %arg18[%c0_99, %c0_100, %c0_101] : memref<1x8x32xf32, #tpu.memory_space<vmem>>, vector<1x8x32xf32>
    %431 = vector.shape_cast %430 : vector<1x8x32xf32> to vector<8x32xf32>
    %432 = vector.shape_cast %429 : vector<8x32xf32> to vector<1x8x32xf32>
    tpu.vector_store %arg18[%c0_99, %c0_100, %c0_101], %432 {strides = array<i32>} : memref<1x8x32xf32, #tpu.memory_space<vmem>>, vector<1x8x32xf32>,
    return
  }
  func.func @transform_0(%arg0: i32, %arg1: i32) -> (i32, i32, i32) {
    %c0_i32 = arith.constant 0 : i32
    %c0_i32_0 = arith.constant 0 : i32
    return %arg0, %arg1, %c0_i32 : i32, i32, i32
  }
  func.func @transform_1(%arg0: i32, %arg1: i32) -> (i32, i32, i32) {
    %c0_i32 = arith.constant 0 : i32
    %c0_i32_0 = arith.constant 0 : i32
    %c0_i32_1 = arith.constant 0 : i32
    return %arg0, %c0_i32, %c0_i32_0 : i32, i32, i32
  }
  func.func @transform_2(%arg0: i32, %arg1: i32) -> (i32, i32) {
    %c0_i32 = arith.constant 0 : i32
    %c0_i32_0 = arith.constant 0 : i32
    %c0_i32_1 = arith.constant 0 : i32
    return %c0_i32, %c0_i32_0 : i32, i32
  }
  func.func @transform_3(%arg0: i32, %arg1: i32) -> (i32, i32) {
    %c0_i32 = arith.constant 0 : i32
    %c0_i32_0 = arith.constant 0 : i32
    %c0_i32_1 = arith.constant 0 : i32
    return %c0_i32, %c0_i32_0 : i32, i32
  }
  func.func @transform_4(%arg0: i32, %arg1: i32) -> (i32, i32) {
    %c0_i32 = arith.constant 0 : i32
    %c0_i32_0 = arith.constant 0 : i32
    %c0_i32_1 = arith.constant 0 : i32
    return %c0_i32, %c0_i32_0 : i32, i32
  }
  func.func @transform_5(%arg0: i32, %arg1: i32) -> (i32, i32) {
    %c0_i32 = arith.constant 0 : i32
    %c0_i32_0 = arith.constant 0 : i32
    %c0_i32_1 = arith.constant 0 : i32
    return %c0_i32, %c0_i32_0 : i32, i32
  }
  func.func @transform_6(%arg0: i32, %arg1: i32) -> (i32, i32) {
    %c0_i32 = arith.constant 0 : i32
    %c0_i32_0 = arith.constant 0 : i32
    %c0_i32_1 = arith.constant 0 : i32
    return %c0_i32, %c0_i32_0 : i32, i32
  }
  func.func @transform_7(%arg0: i32, %arg1: i32) -> (i32, i32) {
    %c0_i32 = arith.constant 0 : i32
    %c0_i32_0 = arith.constant 0 : i32
    %c0_i32_1 = arith.constant 0 : i32
    return %c0_i32, %c0_i32_0 : i32, i32
  }
  func.func @transform_8(%arg0: i32, %arg1: i32) -> (i32, i32) {
    %c0_i32 = arith.constant 0 : i32
    %c0_i32_0 = arith.constant 0 : i32
    %c0_i32_1 = arith.constant 0 : i32
    return %c0_i32, %c0_i32_0 : i32, i32
  }
  func.func @transform_9(%arg0: i32, %arg1: i32) -> (i32, i32) {
    %c0_i32 = arith.constant 0 : i32
    %c0_i32_0 = arith.constant 0 : i32
    %c0_i32_1 = arith.constant 0 : i32
    return %c0_i32, %c0_i32_0 : i32, i32
  }
  func.func @transform_10(%arg0: i32, %arg1: i32) -> (i32, i32) {
    %c0_i32 = arith.constant 0 : i32
    %c0_i32_0 = arith.constant 0 : i32
    %c0_i32_1 = arith.constant 0 : i32
    return %c0_i32, %c0_i32_0 : i32, i32
  }
  func.func @transform_11(%arg0: i32, %arg1: i32) -> (i32, i32) {
    %c0_i32 = arith.constant 0 : i32
    %c0_i32_0 = arith.constant 0 : i32
    %c0_i32_1 = arith.constant 0 : i32
    return %c0_i32, %c0_i32_0 : i32, i32
  }
  func.func @transform_12(%arg0: i32, %arg1: i32) -> (i32, i32) {
    %c0_i32 = arith.constant 0 : i32
    %c0_i32_0 = arith.constant 0 : i32
    %c0_i32_1 = arith.constant 0 : i32
    return %c0_i32, %c0_i32_0 : i32, i32
  }
  func.func @transform_13(%arg0: i32, %arg1: i32) -> (i32, i32) {
    %c0_i32 = arith.constant 0 : i32
    %c0_i32_0 = arith.constant 0 : i32
    %c0_i32_1 = arith.constant 0 : i32
    return %c0_i32, %c0_i32_0 : i32, i32
  }
  func.func @transform_14(%arg0: i32, %arg1: i32) -> (i32, i32) {
    %c0_i32 = arith.constant 0 : i32
    %c0_i32_0 = arith.constant 0 : i32
    %c0_i32_1 = arith.constant 0 : i32
    return %c0_i32, %c0_i32_0 : i32, i32
  }
  func.func @transform_15(%arg0: i32, %arg1: i32) -> (i32, i32) {
    %c0_i32 = arith.constant 0 : i32
    %c0_i32_0 = arith.constant 0 : i32
    %c0_i32_1 = arith.constant 0 : i32
    return %c0_i32, %c0_i32_0 : i32, i32
  }
  func.func @transform_16(%arg0: i32, %arg1: i32) -> (i32, i32, i32) {
    %c0_i32 = arith.constant 0 : i32
    %c0_i32_0 = arith.constant 0 : i32
    return %arg0, %arg1, %c0_i32 : i32, i32, i32
  }
  func.func @transform_17(%arg0: i32, %arg1: i32) -> (i32, i32, i32, i32) {
    %c0_i32 = arith.constant 0 : i32
    %c0_i32_0 = arith.constant 0 : i32
    %c0_i32_1 = arith.constant 0 : i32
    return %arg0, %c0_i32, %arg1, %c0_i32_0 : i32, i32, i32, i32
  }
}

</mosaic_0001>

<bundles_post_ra>
// kernel: encoder_layer_forward.1
= control target key start
LH: loop header
LB: loop body
LE: loop exit
PB: predicated region body
PF: predicated region fallthrough
CT: control target
= control target key end

     0   :  { %s3506_s0 = inlined_call_operand.vmem [shape: f32[2,8,32], index: 0, kind: input, shape index: {}, may-alias: {0,1}]   ;;  %s3507_s1 = inlined_call_operand.vmem [shape: f32[2,8,32], index: 1, kind: input, shape index: {}, may-alias: {0,1}]   ;;  %s3508_s2 = inlined_call_operand.vmem [shape: bf16[32,96], index: 2, kind: input, shape index: {}]   ;;  %s3509_s3 = inlined_call_operand.vmem [shape: f32[1,96], index: 3, kind: input, shape index: {}]   ;;  %s3510_s4 = inlined_call_operand.vmem [shape: bf16[8,15], index: 4, kind: input, shape index: {}]   ;;  %s3511_s5 = inlined_call_operand.vmem [shape: bf16[15,8], index: 5, kind: input, shape index: {}]   ;;  %s3512_s6 = inlined_call_operand.vmem [shape: bf16[32,32], index: 6, kind: input, shape index: {}]   ;;  %s3513_s7 = inlined_call_operand.vmem [shape: f32[1,32], index: 7, kind: input, shape index: {}]   ;;  %s3514_s8 = inlined_call_operand.vmem [shape: f32[1,32], index: 8, kind: input, shape index: {}]   ;;  %s3515_s9 = inlined_call_operand.vmem [shape: f32[1,32], index: 9, kind: input, shape index: {}]   ;;  %s3516_s10 = inlined_call_operand.vmem [shape: bf16[32,64], index: 10, kind: input, shape index: {}]   ;;  %s3517_s11 = inlined_call_operand.vmem [shape: f32[1,64], index: 11, kind: input, shape index: {}]   ;;  %s3518_s12 = inlined_call_operand.vmem [shape: bf16[64,32], index: 12, kind: input, shape index: {}]   ;;  %s3519_s13 = inlined_call_operand.vmem [shape: f32[1,32], index: 13, kind: input, shape index: {}]   ;;  %s3520_s14 = inlined_call_operand.vmem [shape: f32[1,32], index: 14, kind: input, shape index: {}]   ;;  %s3521_s15 = inlined_call_operand.vmem [shape: f32[1,32], index: 15, kind: input, shape index: {}]   ;;  %s3522_s16 = inlined_call_operand.hbm [shape: f32[2,8,32], index: 16, kind: output, shape index: {0}]   ;;  %s3523_s17 = inlined_call_operand.hbm [shape: f32[2,4,8,8], index: 17, kind: output, shape index: {1}]  }
   0x1   :  { %3533 = sst [smem:[#allocation16_spill]] %s3506_s0 }
   0x2   :  { %3534 = sst [smem:[#allocation17_spill]] %s3507_s1 }
   0x3   :  { %3535 = sst [smem:[#allocation18_spill]] %s3508_s2 }
   0x4   :  { %3536 = sst [smem:[#allocation19_spill]] %s3509_s3 }
   0x5   :  { %3537 = sst [smem:[#allocation20_spill]] %s3510_s4 }
   0x6   :  { %3538 = sst [smem:[#allocation21_spill]] %s3511_s5 }
   0x7   :  { %3539 = sst [smem:[#allocation22_spill]] %s3512_s6 }
   0x8   :  { %23 = vsyncpa [#allocation6], 0 }
   0x9   :  { %25 = vsyncpa [#allocation6 + $0x1], 0 }
   0xa   :  { %26 = vsyncpa [#allocation8], 0 }
   0xb   :  { %28 = vsyncpa [#allocation8 + $0x1], 0  ;;  %s2704_s24 = smov 0   ;;  %s2706_s25 = smov 0  }
   0xc   :  { %s2708_s26 = smov 0   ;;  %s2710_s27 = smov 0  }
   0xd   :  { %s2712_s28 = smov 0   ;;  %s2714_s29 = smov 0  }
   0xe LB: > { %3540 = sst [smem:[#allocation11_spill]] %s2573_s26  ;;  %s2182_s0 = sadd.s32 4294967295, %s2585_s29   ;;  %s2585_s29 = sphi %s2714_s29, %s34_s29   ;;  %s2581_s28 = sphi %s2712_s28, %s3570_s28   ;;  %s2577_s27 = sphi %s2710_s27, %s3569_s27   ;;  %s2573_s26 = sphi %s2708_s26, %s3568_s26   ;;  %s2569_s25 = sphi %s2706_s25, %s3572_s25   ;;  %s2565_s24 = sphi %s2704_s24, %s3571_s24  }
   0xf   : > { %3541 = sst [smem:[#allocation12_spill]] %s2581_s28  ;;  %s2183_s30 = sadd.s32 4294967294, %s2585_s29  }
  0x10   : > { %s46_s18 = sadd.s32 1, %s2581_s28  ;;  %s403_s19 = sadd.s32 1, %s2573_s26 }
  0x11   : > { %p48_p0 = scmp.ge.s32.totalorder %s46_s18, 2  ;;  %p413_p1 = scmp.ne.s32.totalorder %s2573_s26, %s2569_s25 }
  0x12   : > { %p414_p2 = scmp.eq.s32.totalorder %s2182_s0, 1  ;;  %p419_p3 = scmp.ne.s32.totalorder %s2569_s25, %s2565_s24 }
  0x13   : > { %s3574_s18 = smov (%p48_p0, %s46_s18), 0  ;;  %p420_p5 = scmp.eq.s32.totalorder %s2183_s30, 1 }
  0x14   : > { %3542 = sst [smem:[#allocation13_spill]] %s3574_s18  ;;  %p2744_p4 = por %p414_p2, %p413_p1 }
  0x15   : > { %s398_s20 = ssub.s32 %s2581_s28, %s3574_s18  ;;  %p2186_p6 = scmp.ge.s32.totalorder %s2585_s29, 1 }
  0x16   : > { %p401_p7 = scmp.eq.s32.totalorder %s398_s20, 0  ;;  %p2751_p8 = por %p420_p5, %p419_p3 }
  0x17   : > { %p525_p9 = scmp.lt.s32.totalorder %s2585_s29, 3 }
  0x18   : > { %s3544_s21 = scalar_select %p2751_p8, 1, 0 }
  0x19   : > { %s2757_s22 = scalar_select %p401_p7, %s2573_s26, %s403_s19  }
  0x1a   : > { %3545 = sst [smem:[#allocation14_spill]] %s3544_s21  ;;  %p526_p10 = pnand %p2186_p6, %p525_p9 }
  0x1b   : > { %3546 = sst [smem:[#allocation15_spill]] %s2757_s22  ;;  %p588_p11 = scmp.lt.s32.totalorder (!%p526_p10), %s2577_s27, 1 }
  0x1c   : > { %529 = sbr.rel (%p526_p10) target bundleno = 2462 (0x99e), region = 84  ;;  %s3547_s2 = sld [smem:[#allocation18_spill]] (!%p526_p10) }
  0x1d   : > { %s3548_s26 = sld [smem:[#allocation17_spill]] (!%p526_p10)  ;;  %s2587_s18 = smov (!%p526_p10), 104  }
  0x1e   : > { %s3549_s3 = sld [smem:[#allocation19_spill]] (!%p526_p10)  ;;  %s2588_s30 = smov (!%p526_p10), 120  }
  0x1f   : > { %s2590_s28 = smov (!%p526_p10), 96   ;;  %s3550_s4 = sld [smem:[#allocation20_spill]] (!%p526_p10) }
  0x20   : > { %s3075_s0 = sand.u32 (!%p526_p10), 1, %s2569_s25   ;;  %s3551_s5 = sld [smem:[#allocation21_spill]] (!%p526_p10) }
  0x21   : > { %s2767_s20 = scalar_select %p588_p11, %s2577_s27, 1  ;;  %vm3528_vm0 = vcmask 261120   ;;  %vm657_vm1 = vcmask 60416   ;;  %vm3529_vm2 = vcmask 1043456   ;;  %vm726_vm3 = vcmask 64512  }
  0x22   : > { %v2282_v0 = vld [vmem:[%s3547_s2 + $0x8] sm:$0xff]  ;;  %v2281_v1 = vld [vmem:[%s3547_s2] sm:$0xff]  ;;  %v2592_v30 = vmov 2   ;;  %v2593_v31 = vmov 1   ;;  %v2594_v32 = vmov 0   ;;  %v2595_v42 = vmov 3  }
  0x23   : > { %636 = vmatpush.bf16.msra.mxu0 %v2282_v0  ;;  %s3531_s19 = sshll.u32 %s2767_s20, 3  ;;  %2384 = vset.pattern.permute.xlu2 %v2592_v30  ;;  %v2596_v43 = vmov 6   ;;  %v2597_v44 = vmov 4   ;;  %v2598_v45 = vmov 7   ;;  %v2599_v47 = vmov 9   ;;  %s3532_s22 = smov 8  }
  0x24   : > { %s598_s21 = scalar_lea.vmem %s3548_s26, %s3531_s19  ;;  %v2443_v4 = vld [vmem:[%s3549_s3] ss:$0 sm:$0xff]  ;;  %s2589_s26 = smov 112   ;;  %2383 = vset.pattern.permute.xlu0 %v2593_v31  ;;  %2382 = vset.pattern.permute.xlu1 %v2594_v32  ;;  %v2600_v48 = vmov 5   ;;  %v2601_v50 = vmov 8   ;;  %v2602_v51 = vmov 14   ;;  %v756_v58 = vlaneseq }
  0x25   : > { %v604_v2 = vld [vmem:[%s598_s21] sm:$0xff]  ;;  %s2591_s21 = smov 64   ;;  %v2603_v52 = vmov 11   ;;  %v2604_v53 = vmov 10   ;;  %v2605_v54 = vmov 13   ;;  %v2606_v56 = vmov 12  }
  0x26   : > { %v605_v3 = vpack.c.bf16 %v604_v2, %v604_v2  ;;  %v715_v9 = vld [vmem:[%s3550_s4] sm:$0xf]  ;;  %v757_v60 = vshrl.u32 %v756_v58, 7  ;;  %v761_v61 = vand.u32 127, %v756_v58  ;;  %s2611_s23 = smov 16   ;;  %s3555_s6 = sld [smem:[#allocation22_spill]] }
  0x27   : > { %637 = vmatpush.bf16.msra.mxu0 %v2281_v1  ;;  %v735_v10 = vsel %vm3529_vm2, %v715_v9, 0  ;;  %s3558_s19 = sld [smem:[#allocation16_spill]] }
  0x28   : > { %744 = vmatpush.bf16.msra.mxu1 %v735_v10  ;;  %v762_v62 = vsub.s32 %v761_v61, %v757_v60 }
  0x2a   : > { %2199 = vmatmul.msk.bf16.vlgmr.msra.gmra.mxu0 %vm3528_vm0, %v605_v3  ;;  %vm763_vm4 = vcmp.gt.s32.totalorder %v762_v62, 4294967289  ;;  %vm1669_vm0 = vcmask 113664  }
  0x2b   : > { %v764_v63 = vsel %vm763_vm4, %v762_v62, 4294967289 }
  0x2c   : > { %vm765_vm5 = vcmp.lt.s32.totalorder %v764_v63, 7 }
  0x2d   : > { %v766_v2 = vsel %vm765_vm5, %v764_v63, 7 }
  0x2e   : > { %v2866_v3 = vadd.s32 7, %v766_v2 }
  0x30   : > { %vm799_vm6 = vcmp.eq.s32.totalorder %v2866_v3, 1  ;;  %vm768_vm7 = vcmp.eq.s32.totalorder %v2866_v3, 0  ;;  %vm826_vm8 = vcmp.eq.s32.totalorder %v2866_v3, 2  ;;  %vm853_vm9 = vcmp.eq.s32.totalorder %v2866_v3, 3 }
  0x31   : > { %vm880_vm10 = vcmp.eq.s32.totalorder %v2866_v3, 4  ;;  %vm907_vm11 = vcmp.eq.s32.totalorder %v2866_v3, 5  ;;  %vm934_vm12 = vcmp.eq.s32.totalorder %v2866_v3, 6  ;;  %vm961_vm13 = vcmp.eq.s32.totalorder %v2866_v3, 7 }
  0x32   : > { %vm988_vm14 = vcmp.eq.s32.totalorder %v2866_v3, 8  ;;  %vm1015_vm15 = vcmp.eq.s32.totalorder %v2866_v3, 9  ;;  %vm1042_vm4 = vcmp.eq.s32.totalorder %v2866_v3, 10  ;;  %vm1069_vm5 = vcmp.eq.s32.totalorder %v2866_v3, 11 }
  0xa7   : > { %v639_v5 = vpop.f32.mrf.mxu0 }
  0xa8   : > { %v640_v6 = vadd.f32 %v2443_v4, %v639_v5 }
  0xaa   : > { %650 = vrot.lane.b32.xlu1 %v640_v6, %s2587_s18  ;;  %644 = vrot.lane.b32.xlu0 %v640_v6, %s2588_s30  ;;  %v653_v7 = vpack.c.bf16 %v640_v6, %v640_v6  ;;  %s2188_s18 = sshll.u32 %s3075_s0, 5 }
  0xab   : > { %s3080_s30 = scalar_lea.vmem [#allocation7], %s2188_s18 }
  0xac   : > { %658 = vst.msk [vmem:[#allocation2] sm:$0xf] %vm657_vm1, %v653_v7  ;;  %s2056_s3 = sshll.u32 %s3080_s30, 4  ;;  %s2057_s3 = int_to_ptr.vmem [resolvable:$true] %s2056_s3 }
  0xaf   : > { %v641_v8 = vpop.f32.mrf.mxu0 }
  0xb2   : > { %647 = vrot.lane.b32.xlu0 %v640_v6, %s2589_s26  ;;  %666 = vrot.lane.b32.xlu1 %v653_v7, %s2590_s28 }
  0xb3   : > { %v703_v22 = vld [vmem:[#allocation2] sm:$0xf] }
  0xba   : > { %682 = vrot.lane.b32.xlu1 %v653_v7, %s2591_s21  ;;  %v2607_v7 = vmov 0.0  }
  0xbb   : > { %v2874_v8 = vsel %vm799_vm6, 1.0, %v2607_v7  ;;  %v2880_v9 = vsel %vm768_vm7, 1.0, %v2607_v7  ;;  %v2933_v61 = vsel %vm1015_vm15, 1.0, %v2607_v7  ;;  %v2941_v2 = vsel %vm1042_vm4, 1.0, %v2607_v7 }
  0xbc   : > { %vm1096_vm6 = vcmp.eq.s32.totalorder %v2866_v3, 12  ;;  %vm1123_vm7 = vcmp.eq.s32.totalorder %v2866_v3, 13 }
 0x11c   : > { %v651_v11 = vpop.permute.xlu1 %650  ;;  %v645_v12 = vpop.permute.xlu0 %644 }
 0x11d   : > { %v2785_v13 = vpack.c.bf16 %v651_v11, %v651_v11  ;;  %v2787_v14 = vpack.c.bf16 %v645_v12, %v645_v12 }
 0x11f   : > { %661 = vst.msk [vmem:[#allocation2 + $0xc] sm:$0xf] %vm657_vm1, %v2785_v13  ;;  %668 = vrot.lane.b32.xlu2 %v2787_v14, %s2590_s28 }
 0x120   : > { %659 = vst.msk [vmem:[#allocation2 + $0x4] sm:$0xf] %vm657_vm1, %v2787_v14 }
 0x124   : > { %v648_v15 = vpop.permute.xlu0 %647  ;;  %v667_v16 = vpop.permute.xlu1 %666 }
 0x125   : > { %v2794_v17 = vpack.c.bf16 %v648_v15, %v648_v15  ;;  %678 = vst.msk [vmem:[#allocation3] sm:$0xf] %vm657_vm1, %v667_v16  ;;  %v2886_v15 = vsel %vm826_vm8, 1.0, %v2607_v7  ;;  %vm1150_vm8 = vcmp.eq.s32.totalorder %v2866_v3, 14 }
 0x126   : > { %v706_v36 = vld [vmem:[#allocation2 + $0xc] sm:$0xf] }
 0x127   : > { %660 = vst.msk [vmem:[#allocation2 + $0x8] sm:$0xf] %vm657_vm1, %v2794_v17  ;;  %672 = vrot.lane.b32.xlu2 %v2785_v13, %s2590_s28  ;;  %670 = vrot.lane.b32.xlu0 %v2794_v17, %s2590_s28  ;;  %v2283_v18 = vld [vmem:[#allocation2] sm:$0xff] }
 0x128   : > { %2208 = vmatmul.msk.bf16.vlgmr.msra.gmra.mxu1 %vm726_vm3, %v2283_v18  ;;  %v704_v33 = vld [vmem:[#allocation2 + $0x4] sm:$0xf] }
 0x12c   : > { %v683_v19 = vpop.permute.xlu1 %682  ;;  %v707_v20 = vld [vmem:[#allocation3] sm:$0xf] }
 0x12d   : > { %694 = vst.msk [vmem:[#allocation4] sm:$0xf] %vm657_vm1, %v683_v19  ;;  %v1181_v21 = vsel %vm726_vm3, %v707_v20, 0 }
 0x12e   : > { %1190 = vmatpush.bf16.xpose.msra.mxu2 %v1181_v21  ;;  %v2284_v25 = vld [vmem:[#allocation2 + $0x8] sm:$0xff] }
 0x12f   : > { %v705_v41 = vld [vmem:[#allocation2 + $0x8] sm:$0xf] }
 0x134   : > { %v711_v23 = vld [vmem:[#allocation4] sm:$0xf] }
 0x135   : > { %2225 = vmatmul.msk.bf16.vlgmr.msra.gmra.mxu2 %vm726_vm3, %v703_v22  ;;  %v1720_v24 = vsel %vm3529_vm2, %v711_v23, 0  ;;  %v2893_v22 = vsel %vm853_vm9, 1.0, %v2607_v7  ;;  %vm3530_vm2 = vcmask 121856  }
 0x136   : > { %1729 = vmatpush.bf16.msrb.mxu1 %v1720_v24  ;;  %v2899_v24 = vsel %vm880_vm10, 1.0, %v2607_v7 }
 0x138   : > { %2209 = vmatmul.msk.bf16.gmra.mxu1 %vm726_vm3, %v2284_v25 }
 0x179   : > { %v669_v26 = vpop.permute.xlu2 %668 }
 0x17a   : > { %679 = vst.msk [vmem:[#allocation3 + $0x4] sm:$0xf] %vm657_vm1, %v669_v26 }
 0x181   : > { %v673_v27 = vpop.permute.xlu2 %672  ;;  %v708_v28 = vld [vmem:[#allocation3 + $0x4] sm:$0xf] }
 0x182   : > { %681 = vst.msk [vmem:[#allocation3 + $0xc] sm:$0xf] %vm657_vm1, %v673_v27  ;;  %v1200_v29 = vsel %vm726_vm3, %v708_v28, 0 }
 0x183   : > { %1209 = vmatpush.bf16.xpose.msra.mxu3 %v1200_v29 }
 0x189   : > { %v710_v34 = vld [vmem:[#allocation3 + $0xc] sm:$0xf] }
 0x18a   : > { %2226 = vmatmul.msk.bf16.vlgmr.msra.gmra.mxu3 %vm726_vm3, %v704_v33  ;;  %v1238_v35 = vsel %vm726_vm3, %v710_v34, 0 }
 0x18b   : > { %1247 = vmatpush.bf16.xpose.msrb.mxu2 %v1238_v35 }
 0x192   : > { %2228 = vmatmul.msk.bf16.vlgmr.msrb.gmra.mxu2 %vm726_vm3, %v706_v36  ;;  %v2913_v36 = vsel %vm907_vm11, 1.0, %v2607_v7 }
 0x199   : > { %v671_v37 = vpop.permute.xlu0 %670 }
 0x19a   : > { %680 = vst.msk [vmem:[#allocation3 + $0x8] sm:$0xf] %vm657_vm1, %v671_v37  ;;  %v2917_v37 = vsel %vm934_vm12, 1.0, %v2607_v7 }
 0x1a1   : > { %v709_v38 = vld [vmem:[#allocation3 + $0x8] sm:$0xf] }
 0x1a2   : > { %v1219_v39 = vsel %vm726_vm3, %v709_v38, 0 }
 0x1a3   : > { %1228 = vmatpush.bf16.xpose.msrb.mxu0 %v1219_v39 }
 0x1a5   : > { %v746_v40 = vpop.f32.mrf.mxu1 }
 0x1a6   : > { %830 = vperm.xlu2 %2384, %v746_v40   ;;  %803 = vperm.xlu0 %2383, %v746_v40  }
 0x1a7   : > { %773 = vperm.xlu1 %2382, %v746_v40  }
 0x1aa   : > { %2227 = vmatmul.msk.bf16.vlgmr.msrb.gmra.mxu0 %vm726_vm3, %v705_v41 }
 0x1ad   : > { %v748_v55 = vpop.f32.mrf.mxu1 }
 0x1ae   : > { %2385 = vset.pattern.permute.xlu2 %v2595_v42  ;;  %2388 = vset.pattern.permute.xlu0 %v2596_v43 }
 0x1af   : > { %2386 = vset.pattern.permute.xlu1 %v2597_v44  ;;  %857 = vperm.xlu2 %2385, %v746_v40  }
 0x1b0   : > { %938 = vperm.xlu0 %2388, %v746_v40   ;;  %884 = vperm.xlu1 %2386, %v746_v40  }
 0x1b5   : > { %v2841_v57 = vpop.f32.mrf.mxu1 }
 0x1b7   : > { %2389 = vset.pattern.permute.xlu2 %v2598_v45 }
 0x1b8   : > { %v2823_v46 = vpop.f32.mrf.mxu2  ;;  %2391 = vset.pattern.permute.xlu0 %v2599_v47  ;;  %2387 = vset.pattern.permute.xlu1 %v2600_v48 }
 0x1b9   : > { %965 = vperm.xlu2 %2389, %v746_v40   ;;  %1019 = vperm.xlu0 %2391, %v746_v40  }
 0x1ba   : > { %911 = vperm.xlu1 %2387, %v746_v40  }
 0x1bd   : > { %v2851_v59 = vpop.f32.mrf.mxu1 }
 0x1c0   : > { %v1194_v49 = vpop.f32.mrf.mxu2 }
 0x1c1   : > { %2390 = vset.pattern.permute.xlu2 %v2601_v50  ;;  %2396 = vset.pattern.permute.xlu0 %v2602_v51 }
 0x1c2   : > { %2393 = vset.pattern.permute.xlu1 %v2603_v52  ;;  %992 = vperm.xlu2 %2390, %v746_v40  }
 0x1c3   : > { %1154 = vperm.xlu0 %2396, %v746_v40   ;;  %1073 = vperm.xlu1 %2393, %v746_v40  }
 0x1ca   : > { %2392 = vset.pattern.permute.xlu2 %v2604_v53 }
 0x1cb   : > { %2400 = vset.pattern.permute.xlu0 %v2595_v42  ;;  %2395 = vset.pattern.permute.xlu1 %v2605_v54 }
 0x1cc   : > { %1046 = vperm.xlu2 %2392, %v746_v40   ;;  %1127 = vperm.xlu1 %2395, %v746_v40  }
 0x1cd   : > { %861 = vperm.xlu0 %2400, %v748_v55  }
 0x1d4   : > { %2394 = vset.pattern.permute.xlu2 %v2606_v56  ;;  %2398 = vset.pattern.permute.xlu1 %v2593_v31 }
 0x1d5   : > { %2405 = vset.pattern.permute.xlu0 %v2601_v50  ;;  %1100 = vperm.xlu2 %2394, %v746_v40   ;;  %v2922_v40 = vsel %vm961_vm13, 1.0, %v2607_v7 }
 0x1d6   : > { %996 = vperm.xlu0 %2405, %v748_v55   ;;  %807 = vperm.xlu1 %2398, %v748_v55  }
 0x1dd   : > { %2397 = vset.pattern.permute.xlu2 %v2594_v32 }
 0x1de   : > { %2407 = vset.pattern.permute.xlu0 %v2604_v53  ;;  %2399 = vset.pattern.permute.xlu1 %v2592_v30 }
 0x1df   : > { %1050 = vperm.xlu0 %2407, %v748_v55   ;;  %834 = vperm.xlu1 %2399, %v748_v55  }
 0x1e0   : > { %778 = vperm.xlu2 %2397, %v748_v55  }
 0x1e7   : > { %2416 = vset.pattern.permute.xlu0 %v2597_v44  ;;  %2403 = vset.pattern.permute.xlu1 %v2596_v43 }
 0x1e8   : > { %2401 = vset.pattern.permute.xlu2 %v2597_v44  ;;  %942 = vperm.xlu1 %2403, %v748_v55  }
 0x1e9   : > { %888 = vperm.xlu2 %2401, %v748_v55   ;;  %892 = vperm.xlu0 %2416, %v2841_v57  }
 0x1f0   : > { %2404 = vset.pattern.permute.xlu1 %v2598_v45 }
 0x1f1   : > { %2402 = vset.pattern.permute.xlu2 %v2600_v48  ;;  %2423 = vset.pattern.permute.xlu0 %v2603_v52 }
 0x1f2   : > { %969 = vperm.xlu1 %2404, %v748_v55   ;;  %915 = vperm.xlu2 %2402, %v748_v55  }
 0x1f3   : > { %1081 = vperm.xlu0 %2423, %v2841_v57  }
 0x1fa   : > { %2406 = vset.pattern.permute.xlu1 %v2599_v47  ;;  %2408 = vset.pattern.permute.xlu2 %v2603_v52 }
 0x1fb   : > { %2432 = vset.pattern.permute.xlu0 %v2600_v48  ;;  %1023 = vperm.xlu1 %2406, %v748_v55  }
 0x1fc   : > { %1077 = vperm.xlu2 %2408, %v748_v55   ;;  %923 = vperm.xlu0 %2432, %v2851_v59  }
 0x200   : > { %v831_v0 = vpop.permute.xlu2 %830 }
 0x201   : > { %v845_v21 = vmul.f32 %v2886_v15, %v831_v0 }
 0x203   : > { %2409 = vset.pattern.permute.xlu1 %v2606_v56 }
 0x204   : > { %2410 = vset.pattern.permute.xlu2 %v2605_v54  ;;  %2435 = vset.pattern.permute.xlu0 %v2601_v50 }
 0x205   : > { %1104 = vperm.xlu1 %2409, %v748_v55   ;;  %1131 = vperm.xlu2 %2410, %v748_v55  }
 0x206   : > { %1004 = vperm.xlu0 %2435, %v2851_v59  }
 0x209   : > { %v858_v4 = vpop.permute.xlu2 %857 }
 0x20a   : > { %v872_v25 = vmul.f32 %v2893_v22, %v858_v4 }
 0x20d   : > { %v2859_v1 = vpop.f32.mrf.mxu3  ;;  %2411 = vset.pattern.permute.xlu1 %v2602_v51  ;;  %2414 = vset.pattern.permute.xlu2 %v2592_v30 }
 0x20e   : > { %2440 = vset.pattern.permute.xlu0 %v2605_v54  ;;  %1158 = vperm.xlu1 %2411, %v748_v55  }
 0x20f   : > { %838 = vperm.xlu2 %2414, %v2841_v57   ;;  %1139 = vperm.xlu0 %2440, %v2851_v59  }
 0x213   : > { %v966_v18 = vpop.permute.xlu2 %965 }
 0x214   : > { %v980_v58 = vmul.f32 %v2922_v40, %v966_v18 }
 0x215   : > { %v1213_v5 = vpop.f32.mrf.mxu3  ;;  %v2869_v6 = vpop.f32.mrf.mxu2 }
 0x216   : > { %2412 = vset.pattern.permute.xlu1 %v2594_v32 }
 0x217   : > { %2417 = vset.pattern.permute.xlu2 %v2600_v48  ;;  %783 = vperm.xlu1 %2412, %v2841_v57  }
 0x218   : > { %919 = vperm.xlu2 %2417, %v2841_v57   ;;  %v804_v10 = vpop.permute.xlu0 %803  ;;  %2442 = vset.pattern.permute.xlu0 %v2602_v51 }
 0x219   : > { %v818_v11 = vmul.f32 %v2874_v8, %v804_v10  ;;  %v774_v12 = vpop.permute.xlu1 %773 }
 0x21a   : > { %v791_v16 = vmul.f32 %v2880_v9, %v774_v12 }
 0x21c   : > { %v822_v19 = vadd.f32 %v818_v11, %v791_v16  ;;  %v993_v33 = vpop.permute.xlu2 %992  ;;  %v2945_v11 = vsel %vm1069_vm5, 1.0, %v2607_v7 }
 0x21d   : > { %v1251_v20 = vpop.f32.mrf.mxu2 }
 0x21e   : > { %v849_v23 = vadd.f32 %v845_v21, %v822_v19  ;;  %v2952_v20 = vsel %vm1096_vm6, 1.0, %v2607_v7 }
 0x21f   : > { %2413 = vset.pattern.permute.xlu1 %v2593_v31 }
 0x220   : > { %2419 = vset.pattern.permute.xlu2 %v2598_v45  ;;  %811 = vperm.xlu1 %2413, %v2841_v57   ;;  %v876_v27 = vadd.f32 %v872_v25, %v849_v23  ;;  %v2959_v25 = vsel %vm1123_vm7, 1.0, %v2607_v7 }
 0x221   : > { %973 = vperm.xlu2 %2419, %v2841_v57  }
 0x222   : > { %v885_v26 = vpop.permute.xlu1 %884  ;;  %v939_v35 = vpop.permute.xlu0 %938 }
 0x223   : > { %v899_v28 = vmul.f32 %v2899_v24, %v885_v26  ;;  %v953_v48 = vmul.f32 %v2917_v37, %v939_v35 }
 0x225   : > { %v903_v29 = vadd.f32 %v899_v28, %v876_v27 }
 0x226   : > { %v1047_v55 = vpop.permute.xlu2 %1046 }
 0x227   : > { %v2904_v34 = vpop.f32.mrf.mxu0  ;;  %v1061_v12 = vmul.f32 %v2941_v2, %v1047_v55 }
 0x228   : > { %2415 = vset.pattern.permute.xlu1 %v2595_v42 }
 0x229   : > { %2420 = vset.pattern.permute.xlu2 %v2601_v50  ;;  %865 = vperm.xlu1 %2415, %v2841_v57   ;;  %v2927_v50 = vsel %vm988_vm14, 1.0, %v2607_v7 }
 0x22a   : > { %1000 = vperm.xlu2 %2420, %v2841_v57   ;;  %v1007_v63 = vmul.f32 %v2927_v50, %v993_v33 }
 0x22b   : > { %v1020_v62 = vpop.permute.xlu0 %1019 }
 0x22c   : > { %v912_v38 = vpop.permute.xlu1 %911  ;;  %v1034_v4 = vmul.f32 %v2933_v61, %v1020_v62 }
 0x22d   : > { %v926_v39 = vmul.f32 %v2913_v36, %v912_v38 }
 0x22f   : > { %v1232_v41 = vpop.f32.mrf.mxu0  ;;  %v930_v49 = vadd.f32 %v926_v39, %v903_v29  ;;  %v1101_v21 = vpop.permute.xlu2 %1100 }
 0x230   : > { %v1115_v26 = vmul.f32 %v2952_v20, %v1101_v21 }
 0x231   : > { %v957_v60 = vadd.f32 %v953_v48, %v930_v49  ;;  %2418 = vset.pattern.permute.xlu1 %v2596_v43 }
 0x232   : > { %2424 = vset.pattern.permute.xlu2 %v2606_v56  ;;  %946 = vperm.xlu1 %2418, %v2841_v57  }
 0x233   : > { %v984_v0 = vadd.f32 %v980_v58, %v957_v60  ;;  %1108 = vperm.xlu2 %2424, %v2841_v57  }
 0x235   : > { %v1011_v5 = vadd.f32 %v1007_v63, %v984_v0  ;;  %v1074_v10 = vpop.permute.xlu1 %1073 }
 0x236   : > { %v1088_v19 = vmul.f32 %v2945_v11, %v1074_v10 }
 0x237   : > { %v1038_v16 = vadd.f32 %v1034_v4, %v1011_v5 }
 0x239   : > { %v1065_v18 = vadd.f32 %v1061_v12, %v1038_v16 }
 0x23a   : > { %2421 = vset.pattern.permute.xlu1 %v2599_v47  ;;  %v779_v35 = vpop.permute.xlu2 %778 }
 0x23b   : > { %v1092_v23 = vadd.f32 %v1088_v19, %v1065_v18  ;;  %2425 = vset.pattern.permute.xlu2 %v2605_v54  ;;  %1027 = vperm.xlu1 %2421, %v2841_v57  }
 0x23c   : > { %1135 = vperm.xlu2 %2425, %v2841_v57  }
 0x23d   : > { %v1119_v28 = vadd.f32 %v1115_v26, %v1092_v23 }
 0x23e   : > { %v1128_v27 = vpop.permute.xlu1 %1127 }
 0x23f   : > { %v1142_v29 = vmul.f32 %v2959_v25, %v1128_v27 }
 0x241   : > { %v2963_v33 = vadd.f32 %v1142_v29, %v1119_v28 }
 0x243   : > { %2422 = vset.pattern.permute.xlu1 %v2604_v53  ;;  %v889_v38 = vpop.permute.xlu2 %888 }
 0x244   : > { %2427 = vset.pattern.permute.xlu2 %v2594_v32  ;;  %1054 = vperm.xlu1 %2422, %v2841_v57   ;;  %v900_v62 = vmul.f32 %v2899_v24, %v889_v38 }
 0x245   : > { %788 = vperm.xlu2 %2427, %v2851_v59  }
 0x248   : > { %v808_v54 = vpop.permute.xlu1 %807 }
 0x24c   : > { %2426 = vset.pattern.permute.xlu1 %v2602_v51  ;;  %v916_v32 = vpop.permute.xlu2 %915 }
 0x24d   : > { %2428 = vset.pattern.permute.xlu2 %v2593_v31  ;;  %1162 = vperm.xlu1 %2426, %v2841_v57   ;;  %v1155_v57 = vpop.permute.xlu0 %1154  ;;  %v927_v5 = vmul.f32 %v2913_v36, %v916_v32 }
 0x24e   : > { %815 = vperm.xlu2 %2428, %v2851_v59  }
 0x251   : > { %v835_v39 = vpop.permute.xlu1 %834 }
 0x255   : > { %2429 = vset.pattern.permute.xlu1 %v2592_v30  ;;  %v819_v30 = vmul.f32 %v2874_v8, %v808_v54  ;;  %v862_v58 = vpop.permute.xlu0 %861 }
 0x256   : > { %2430 = vset.pattern.permute.xlu2 %v2595_v42  ;;  %842 = vperm.xlu1 %2429, %v2851_v59   ;;  %v1078_v31 = vpop.permute.xlu2 %1077  ;;  %v792_v42 = vmul.f32 %v2880_v9, %v779_v35 }
 0x257   : > { %869 = vperm.xlu2 %2430, %v2851_v59  }
 0x258   : > { %v823_v49 = vadd.f32 %v819_v30, %v792_v42 }
 0x25a   : > { %v943_v41 = vpop.permute.xlu1 %942 }
 0x25d   : > { %v997_v10 = vpop.permute.xlu0 %996 }
 0x25e   : > { %2431 = vset.pattern.permute.xlu1 %v2597_v44  ;;  %v1008_v23 = vmul.f32 %v2927_v50, %v997_v10 }
 0x25f   : > { %2433 = vset.pattern.permute.xlu2 %v2596_v43  ;;  %896 = vperm.xlu1 %2431, %v2851_v59   ;;  %v846_v43 = vmul.f32 %v2886_v15, %v835_v39  ;;  %v1132_v44 = vpop.permute.xlu2 %1131 }
 0x260   : > { %950 = vperm.xlu2 %2433, %v2851_v59   ;;  %v1143_v30 = vmul.f32 %v2959_v25, %v1132_v44 }
 0x261   : > { %v850_v60 = vadd.f32 %v846_v43, %v823_v49 }
 0x264   : > { %v970_v48 = vpop.permute.xlu1 %969 }
 0x265   : > { %v981_v12 = vmul.f32 %v2922_v40, %v970_v48 }
 0x267   : > { %2434 = vset.pattern.permute.xlu1 %v2598_v45  ;;  %v873_v45 = vmul.f32 %v2893_v22, %v862_v58 }
 0x268   : > { %2436 = vset.pattern.permute.xlu2 %v2599_v47  ;;  %977 = vperm.xlu1 %2434, %v2851_v59  }
 0x269   : > { %1031 = vperm.xlu2 %2436, %v2851_v59   ;;  %v877_v47 = vadd.f32 %v873_v45, %v850_v60  ;;  %v839_v63 = vpop.permute.xlu2 %838 }
 0x26b   : > { %v904_v0 = vadd.f32 %v900_v62, %v877_v47 }
 0x26d   : > { %v1024_v55 = vpop.permute.xlu1 %1023 }
 0x270   : > { %2438 = vset.pattern.permute.xlu1 %v2603_v52  ;;  %v931_v52 = vadd.f32 %v927_v5, %v904_v0  ;;  %v847_v0 = vmul.f32 %v2886_v15, %v839_v63 }
 0x271   : > { %2437 = vset.pattern.permute.xlu2 %v2604_v53  ;;  %1085 = vperm.xlu1 %2438, %v2851_v59   ;;  %v954_v53 = vmul.f32 %v2917_v37, %v943_v41  ;;  %v3008_v41 = vsel %vm1150_vm8, 1.0, %v2607_v7 }
 0x272   : > { %1058 = vperm.xlu2 %2437, %v2851_v59   ;;  %v920_v18 = vpop.permute.xlu2 %919  ;;  %v1169_v49 = vmul.f32 %v3008_v41, %v1155_v57 }
 0x273   : > { %v958_v16 = vadd.f32 %v954_v53, %v931_v52 }
 0x275   : > { %v985_v21 = vadd.f32 %v981_v12, %v958_v16 }
 0x277   : > { %v1105_v4 = vpop.permute.xlu1 %1104  ;;  %v1012_v26 = vadd.f32 %v1008_v23, %v985_v21 }
 0x278   : > { %v1116_v38 = vmul.f32 %v2952_v20, %v1105_v4 }
 0x279   : > { %2439 = vset.pattern.permute.xlu1 %v2606_v56  ;;  %v1035_v56 = vmul.f32 %v2933_v61, %v1024_v55 }
 0x27a   : > { %2441 = vset.pattern.permute.xlu2 %v2602_v51  ;;  %1112 = vperm.xlu1 %2439, %v2851_v59   ;;  %v1051_v51 = vpop.permute.xlu0 %1050 }
 0x27b   : > { %1166 = vperm.xlu2 %2441, %v2851_v59   ;;  %v1039_v27 = vadd.f32 %v1035_v56, %v1012_v26  ;;  %v1062_v28 = vmul.f32 %v2941_v2, %v1051_v51  ;;  %v974_v35 = vpop.permute.xlu2 %973  ;;  %v1089_v59 = vmul.f32 %v2945_v11, %v1078_v31  ;;  %v1173_v31 = vadd.f32 %v1169_v49, %v2963_v33 }
 0x27c   : > { %v982_v51 = vmul.f32 %v2922_v40, %v974_v35 }
 0x27d   : > { %v1066_v54 = vadd.f32 %v1062_v28, %v1039_v27  ;;  %v1193_v47 = vadd.f32 %v2823_v46, %v1173_v31 }
 0x27f   : > { %v1093_v39 = vadd.f32 %v1089_v59, %v1066_v54  ;;  %v3022_v5 = vmul.f32 0.35355338, %v1193_v47 }
 0x280   : > { %v1159_v19 = vpop.permute.xlu1 %1158 }
 0x281   : > { %v1120_v32 = vadd.f32 %v1116_v38, %v1093_v39  ;;  %v1170_v42 = vmul.f32 %v3008_v41, %v1159_v19  ;;  %v928_v19 = vmul.f32 %v2913_v36, %v920_v18 }
 0x282   : > { %v893_v52 = vpop.permute.xlu0 %892 }
 0x283   : > { %v1147_v55 = vadd.f32 %v1143_v30, %v1120_v32  ;;  %v901_v63 = vmul.f32 %v2899_v24, %v893_v52 }
 0x284   : > { %v1001_v43 = vpop.permute.xlu2 %1000 }
 0x285   : > { %v1174_v58 = vadd.f32 %v1170_v42, %v1147_v55 }
 0x287   : > { %v1212_v7 = vadd.f32 %v2859_v1, %v1174_v58  ;;  %v1257_v1 = vsel %vm726_vm3, %v3022_v5, -inf }
 0x289   : > { %v784_v29 = vpop.permute.xlu1 %783  ;;  %v3020_v57 = vmul.f32 0.35355338, %v1212_v7 }
 0x28a   : > { %v793_v3 = vmul.f32 %v2880_v9, %v784_v29  ;;  %v1009_v29 = vmul.f32 %v2927_v50, %v1001_v43  ;;  %v1082_v38 = vpop.permute.xlu0 %1081 }
 0x28b   : > { %v1260_v10 = vsel %vm726_vm3, %v3020_v57, -inf  ;;  %v1090_v18 = vmul.f32 %v2945_v11, %v1082_v38 }
 0x28d   : > { %v1109_v44 = vpop.permute.xlu2 %1108 }
 0x28e   : > { %v1117_v42 = vmul.f32 %v2952_v20, %v1109_v44 }
 0x292   : > { %v812_v48 = vpop.permute.xlu1 %811 }
 0x293   : > { %v820_v60 = vmul.f32 %v2874_v8, %v812_v48 }
 0x295   : > { %v824_v62 = vadd.f32 %v820_v60, %v793_v3 }
 0x296   : > { %v1136_v16 = vpop.permute.xlu2 %1135 }
 0x297   : > { %v851_v33 = vadd.f32 %v847_v0, %v824_v62  ;;  %v1144_v35 = vmul.f32 %v2959_v25, %v1136_v16 }
 0x29b   : > { %v866_v45 = vpop.permute.xlu1 %865 }
 0x29c   : > { %v874_v4 = vmul.f32 %v2893_v22, %v866_v45 }
 0x29e   : > { %v878_v53 = vadd.f32 %v874_v4, %v851_v33 }
 0x29f   : > { %v789_v28 = vpop.permute.xlu2 %788 }
 0x2a0   : > { %v905_v12 = vadd.f32 %v901_v63, %v878_v53  ;;  %v794_v4 = vmul.f32 %v2880_v9, %v789_v28 }
 0x2a2   : > { %v932_v23 = vadd.f32 %v928_v19, %v905_v12 }
 0x2a4   : > { %1261 = vmax.xlane.f32.xlu2 %v1260_v10  ;;  %v947_v46 = vpop.permute.xlu1 %946  ;;  %1258 = vmax.xlane.f32.xlu1 %v1257_v1 }
 0x2a5   : > { %v955_v21 = vmul.f32 %v2917_v37, %v947_v46  ;;  %v924_v46 = vpop.permute.xlu0 %923 }
 0x2a6   : > { %v929_v19 = vmul.f32 %v2913_v36, %v924_v46 }
 0x2a7   : > { %v959_v56 = vadd.f32 %v955_v21, %v932_v23 }
 0x2a8   : > { %v816_v55 = vpop.permute.xlu2 %815 }
 0x2a9   : > { %v986_v27 = vadd.f32 %v982_v51, %v959_v56  ;;  %v821_v62 = vmul.f32 %v2874_v8, %v816_v55 }
 0x2ab   : > { %v1013_v59 = vadd.f32 %v1009_v29, %v986_v27  ;;  %v825_v52 = vadd.f32 %v821_v62, %v794_v4 }
 0x2ad   : > { %v1028_v26 = vpop.permute.xlu1 %1027  ;;  %v1005_v28 = vpop.permute.xlu0 %1004 }
 0x2ae   : > { %v1036_v54 = vmul.f32 %v2933_v61, %v1028_v26 }
 0x2b0   : > { %v1040_v32 = vadd.f32 %v1036_v54, %v1013_v59  ;;  %v1010_v54 = vmul.f32 %v2927_v50, %v1005_v28 }
 0x2b1   : > { %v870_v7 = vpop.permute.xlu2 %869 }
 0x2b2   : > { %v875_v10 = vmul.f32 %v2893_v22, %v870_v7 }
 0x2b6   : > { %v1055_v39 = vpop.permute.xlu1 %1054 }
 0x2b7   : > { %v1063_v48 = vmul.f32 %v2941_v2, %v1055_v39 }
 0x2b9   : > { %v1067_v30 = vadd.f32 %v1063_v48, %v1040_v32 }
 0x2ba   : > { %v951_v1 = vpop.permute.xlu2 %950 }
 0x2bb   : > { %v1094_v49 = vadd.f32 %v1090_v18, %v1067_v30  ;;  %v956_v23 = vmul.f32 %v2917_v37, %v951_v1 }
 0x2bd   : > { %v1121_v31 = vadd.f32 %v1117_v42, %v1094_v49  ;;  %v1140_v49 = vpop.permute.xlu0 %1139 }
 0x2bf   : > { %v1148_v58 = vadd.f32 %v1144_v35, %v1121_v31  ;;  %v1163_v43 = vpop.permute.xlu1 %1162 }
 0x2c0   : > { %v1171_v60 = vmul.f32 %v3008_v41, %v1163_v43  ;;  %v1145_v43 = vmul.f32 %v2959_v25, %v1140_v49 }
 0x2c2   : > { %v1175_v3 = vadd.f32 %v1171_v60, %v1148_v58 }
 0x2c3   : > { %v1032_v56 = vpop.permute.xlu2 %1031 }
 0x2c4   : > { %v1231_v45 = vadd.f32 %v2904_v34, %v1175_v3  ;;  %v1037_v38 = vmul.f32 %v2933_v61, %v1032_v56 }
 0x2c6   : > { %v3040_v47 = vmul.f32 0.35355338, %v1231_v45 }
 0x2c8   : > { %v843_v0 = vpop.permute.xlu1 %842  ;;  %v1263_v44 = vsel %vm726_vm3, %v3040_v47, -inf }
 0x2c9   : > { %1264 = vmax.xlane.f32.xlu0 %v1263_v44  ;;  %v848_v33 = vmul.f32 %v2886_v15, %v843_v0 }
 0x2cb   : > { %v852_v53 = vadd.f32 %v848_v33, %v825_v52 }
 0x2cc   : > { %v1059_v32 = vpop.permute.xlu2 %1058 }
 0x2cd   : > { %v879_v63 = vadd.f32 %v875_v10, %v852_v53  ;;  %v1064_v18 = vmul.f32 %v2941_v2, %v1059_v32 }
 0x2d1   : > { %v897_v34 = vpop.permute.xlu1 %896 }
 0x2d2   : > { %v902_v12 = vmul.f32 %v2899_v24, %v897_v34 }
 0x2d4   : > { %v906_v16 = vadd.f32 %v902_v12, %v879_v63 }
 0x2d5   : > { %v1167_v58 = vpop.permute.xlu2 %1166 }
 0x2d6   : > { %v933_v21 = vadd.f32 %v929_v19, %v906_v16  ;;  %v1172_v3 = vmul.f32 %v3008_v41, %v1167_v58 }
 0x2d8   : > { %v960_v51 = vadd.f32 %v956_v23, %v933_v21 }
 0x2da   : > { %v978_v26 = vpop.permute.xlu1 %977 }
 0x2db   : > { %v983_v27 = vmul.f32 %v2922_v40, %v978_v26 }
 0x2dd   : > { %v987_v29 = vadd.f32 %v983_v27, %v960_v51 }
 0x2df   : > { %v1014_v59 = vadd.f32 %v1010_v54, %v987_v29 }
 0x2e1   : > { %v1041_v48 = vadd.f32 %v1037_v38, %v1014_v59 }
 0x2e3   : > { %v1086_v39 = vpop.permute.xlu1 %1085  ;;  %v1068_v30 = vadd.f32 %v1064_v18, %v1041_v48 }
 0x2e4   : > { %v1091_v42 = vmul.f32 %v2945_v11, %v1086_v39 }
 0x2e6   : > { %v1095_v35 = vadd.f32 %v1091_v42, %v1068_v30 }
 0x2ec   : > { %v1113_v55 = vpop.permute.xlu1 %1112 }
 0x2ed   : > { %v1118_v31 = vmul.f32 %v2952_v20, %v1113_v55 }
 0x2ef   : > { %v1122_v60 = vadd.f32 %v1118_v31, %v1095_v35 }
 0x2f1   : > { %v1149_v45 = vadd.f32 %v1145_v43, %v1122_v60 }
 0x2f3   : > { %v1176_v7 = vadd.f32 %v1172_v3, %v1149_v45 }
 0x2f5   : > { %v1250_v62 = vadd.f32 %v2869_v6, %v1176_v7 }
 0x2f7   : > { %v1256_v0 = vmul.f32 0.35355338, %v1250_v62 }
 0x2f9   : > { %v1266_v44 = vsel %vm726_vm3, %v1256_v0, -inf }
 0x2fa   : > { %1267 = vmax.xlane.f32.xlu2 %v1266_v44 }
 0x317   : > { %v1262_v4 = vpop.xlane.xlu2 %1261  ;;  %v1259_v33 = vpop.xlane.xlu1 %1258 }
 0x318   : > { %v1270_v52 = vsub.f32 %v3020_v57, %v1262_v4  ;;  %v1269_v53 = vsub.f32 %v3022_v5, %v1259_v33 }
 0x31a   : > { %v1275_v10 = vmul.f32 1.442695, %v1270_v52  ;;  %v1273_v1 = vmul.f32 1.442695, %v1269_v53 }
 0x31c   : > { %2451 = vpow2.f32 %v1275_v10 }
 0x31d   : > { %2453 = vpow2.f32 %v1273_v1 }
 0x322   : > { %v2452_v34 = vpop.eup %2451 }
 0x323   : > { %v2454_v46 = vpop.eup %2453  ;;  %v1284_v63 = vsel %vm726_vm3, %v2452_v34, 0.0 }
 0x324   : > { %1285 = vadd.xlane.f32.xlu2 %v1284_v63  ;;  %v1281_v6 = vsel %vm726_vm3, %v2454_v46, 0.0 }
 0x325   : > { %1282 = vadd.xlane.f32.xlu1 %v1281_v6 }
 0x33c   : > { %v1265_v12 = vpop.xlane.xlu0 %1264 }
 0x33d   : > { %v1271_v16 = vsub.f32 %v3040_v47, %v1265_v12 }
 0x33f   : > { %v1277_v19 = vmul.f32 1.442695, %v1271_v16 }
 0x341   : > { %2455 = vpow2.f32 %v1277_v19 }
 0x347   : > { %v3066_v57 = vpop.eup %2455 }
 0x348   : > { %v1287_v5 = vsel %vm726_vm3, %v3066_v57, 0.0 }
 0x349   : > { %1288 = vadd.xlane.f32.xlu0 %v1287_v5 }
 0x36d   : > { %v1268_v21 = vpop.xlane.xlu2 %1267 }
 0x36e   : > { %v1272_v23 = vsub.f32 %v1256_v0, %v1268_v21 }
 0x370   : > { %v1279_v56 = vmul.f32 1.442695, %v1272_v23 }
 0x372   : > { %2457 = vpow2.f32 %v1279_v56 }
 0x378   : > { %v3070_v26 = vpop.eup %2457 }
 0x379   : > { %v1290_v51 = vsel %vm726_vm3, %v3070_v26, 0.0 }
 0x37a   : > { %1291 = vadd.xlane.f32.xlu1 %v1290_v51 }
 0x397   : > { %v1286_v47 = vpop.xlane.xlu2 %1285 }
 0x398   : > { %2459 = vrcp.f32 %v1286_v47  ;;  %v1283_v27 = vpop.xlane.xlu1 %1282  ;;  %v1319_v39 = vand.u32 2147483648, %v1286_v47  ;;  %v1317_v18 = vand.u32 2147483647, %v1286_v47  ;;  %vm1313_vm11 = vweird.f32 %v1286_v47 }
 0x399   : > { %2461 = vrcp.f32 %v1283_v27  ;;  %v1304_v30 = vand.u32 2147483648, %v1283_v27  ;;  %v1302_v49 = vand.u32 2147483647, %v1283_v27  ;;  %vm1298_vm13 = vweird.f32 %v1283_v27 }
 0x39a   : > { %v1320_v35 = vor.u32 1.1754944e-38, %v1319_v39  ;;  %vm1318_vm14 = vcmp.eq.f32.partialorder %v1317_v18, 8.507059e+37 }
 0x39b   : > { %v1305_v43 = vor.u32 1.1754944e-38, %v1304_v30  ;;  %vm1303_vm4 = vcmp.eq.f32.partialorder %v1302_v49, 8.507059e+37 }
 0x39e   : > { %v2460_v28 = vpop.eup %2459 }
 0x39f   : > { %v2462_v29 = vpop.eup %2461  ;;  %v1309_v54 = vmul.f32 %v2460_v28, %v1286_v47  ;;  %vm1314_vm9 = vweird.f32 %v2460_v28 }
 0x3a0   : > { %v1294_v59 = vmul.f32 %v2462_v29, %v1283_v27  ;;  %vm1299_vm10 = vweird.f32 %v2462_v29  ;;  %vm1315_vm12 = vmor %vm1313_vm11, %vm1314_vm9 }
 0x3a1   : > { %v1310_v38 = vsub.f32 1.0, %v1309_v54  ;;  %vm1300_vm15 = vmor %vm1298_vm13, %vm1299_vm10  ;;  %vm1605_vm13 = vcmask 7168  }
 0x3a2   : > { %v1295_v32 = vsub.f32 1.0, %v1294_v59 }
 0x3a3   : > { %v1311_v48 = vmul.f32 %v2460_v28, %v1310_v38 }
 0x3a4   : > { %v1296_v42 = vmul.f32 %v2462_v29, %v1295_v32 }
 0x3a5   : > { %v1312_v55 = vadd.f32 %v2460_v28, %v1311_v48 }
 0x3a6   : > { %v1297_v31 = vadd.f32 %v2462_v29, %v1296_v42 }
 0x3a7   : > { %v1316_v58 = vsel %vm1315_vm12, %v2460_v28, %v1312_v55 }
 0x3a8   : > { %v1321_v60 = vsel %vm1318_vm14, %v1320_v35, %v1316_v58  ;;  %v1301_v3 = vsel %vm1300_vm15, %v2462_v29, %v1297_v31  ;;  %vm1610_vm14 = vcmask 15360   ;;  %vm1690_vm15 = vcmask 1046528  }
 0x3a9   : > { %v3078_v45 = vmul.f32 %v2452_v34, %v1321_v60  ;;  %v1306_v7 = vsel %vm1303_vm4, %v1305_v43, %v1301_v3  ;;  %vm1691_vm4 = vcmask 1047552  }
 0x3aa   : > { %v1353_v62 = vmul.f32 %v2454_v46, %v1306_v7 }
 0x3ab   : > { %1358 = vst.msk [vmem:[%s3080_s30 + $0x8] sm:$0xff] %vm726_vm3, %v3078_v45 }
 0x3ac   : > { %v1361_v0 = vpack.c.bf16 %v1353_v62, %v1353_v62  ;;  %v1397_v44 = vmul.f32 %v2886_v15, %v1353_v62  ;;  %v1381_v4 = vmul.f32 %v2874_v8, %v1353_v62  ;;  %v1365_v33 = vmul.f32 %v2880_v9, %v1353_v62  ;;  %1357 = vst.msk [vmem:[%s3080_s30] sm:$0xff] %vm726_vm3, %v1353_v62 }
 0x3ad   : > { %v1445_v1 = vmul.f32 %v2913_v36, %v1353_v62  ;;  %v1429_v34 = vmul.f32 %v2899_v24, %v1353_v62  ;;  %v1413_v46 = vmul.f32 %v2893_v22, %v1353_v62  ;;  %v1493_v16 = vmul.f32 %v2927_v50, %v1353_v62 }
 0x3ae   : > { %2235 = vmatmul.msk.bf16.vlgmr.msrb.gmra.mxu1 %vm726_vm3, %v1361_v0  ;;  %v1401_v52 = vsel %vm726_vm3, %v1397_v44, 0.0  ;;  %v1385_v53 = vsel %vm726_vm3, %v1381_v4, 0.0  ;;  %v1369_v10 = vsel %vm726_vm3, %v1365_v33, 0.0  ;;  %v1477_v19 = vmul.f32 %v2922_v40, %v1353_v62 }
 0x3af   : > { %1402 = vadd.xlane.f32.xlu0 %v1401_v52  ;;  %1386 = vadd.xlane.f32.xlu1 %v1385_v53  ;;  %v1449_v63 = vsel %vm726_vm3, %v1445_v1, 0.0  ;;  %v1433_v6 = vsel %vm726_vm3, %v1429_v34, 0.0  ;;  %v1417_v12 = vsel %vm726_vm3, %v1413_v46, 0.0  ;;  %v1461_v5 = vmul.f32 %v2917_v37, %v1353_v62 }
 0x3b0   : > { %1370 = vadd.xlane.f32.xlu2 %v1369_v10  ;;  %v1497_v23 = vsel %vm726_vm3, %v1493_v16, 0.0  ;;  %v1481_v56 = vsel %vm726_vm3, %v1477_v19, 0.0  ;;  %v1541_v47 = vmul.f32 %v2945_v11, %v1353_v62  ;;  %v1525_v27 = vmul.f32 %v2941_v2, %v1353_v62 }
 0x3b1   : > { %v1465_v51 = vsel %vm726_vm3, %v1461_v5, 0.0  ;;  %v1509_v29 = vmul.f32 %v2933_v61, %v1353_v62  ;;  %v1589_v49 = vmul.f32 %v3008_v41, %v1353_v62  ;;  %v1573_v55 = vmul.f32 %v2959_v25, %v1353_v62 }
 0x3b2   : > { %v1545_v38 = vsel %vm726_vm3, %v1541_v47, 0.0  ;;  %v1529_v39 = vsel %vm726_vm3, %v1525_v27, 0.0  ;;  %v1557_v31 = vmul.f32 %v2952_v20, %v1353_v62  ;;  %v1366_v62 = vmul.f32 %v2880_v9, %v3078_v45 }
 0x3b3   : > { %v1513_v48 = vsel %vm726_vm3, %v1509_v29, 0.0  ;;  %v1593_v3 = vsel %vm726_vm3, %v1589_v49, 0.0  ;;  %v1577_v7 = vsel %vm726_vm3, %v1573_v55, 0.0  ;;  %v1398_v44 = vmul.f32 %v2886_v15, %v3078_v45 }
 0x3b4   : > { %v1561_v0 = vsel %vm726_vm3, %v1557_v31, 0.0  ;;  %v1372_v4 = vsel %vm726_vm3, %v1366_v62, 0.0  ;;  %v1414_v53 = vmul.f32 %v2893_v22, %v3078_v45  ;;  %v1446_v10 = vmul.f32 %v2913_v36, %v3078_v45 }
 0x3b5   : > { %v1404_v33 = vsel %vm726_vm3, %v1398_v44, 0.0  ;;  %v1430_v1 = vmul.f32 %v2899_v24, %v3078_v45  ;;  %v1478_v16 = vmul.f32 %v2922_v40, %v3078_v45 }
 0x3b6   : > { %v1420_v34 = vsel %vm726_vm3, %v1414_v53, 0.0  ;;  %v1452_v46 = vsel %vm726_vm3, %v1446_v10, 0.0 }
 0x3b7   : > { %1450 = vadd.xlane.f32.xlu0 %v1449_v63  ;;  %1434 = vadd.xlane.f32.xlu1 %v1433_v6  ;;  %v1436_v63 = vsel %vm726_vm3, %v1430_v1, 0.0  ;;  %v1462_v6 = vmul.f32 %v2917_v37, %v3078_v45 }
 0x3b8   : > { %1418 = vadd.xlane.f32.xlu2 %v1417_v12  ;;  %v1494_v12 = vmul.f32 %v2927_v50, %v3078_v45 }
 0x3b9   : > { %v1468_v19 = vsel %vm726_vm3, %v1462_v6, 0.0 }
 0x3ba   : > { %v1500_v5 = vsel %vm726_vm3, %v1494_v12, 0.0 }
 0x3bc   : > { %v1289_v21 = vpop.xlane.xlu0 %1288 }
 0x3bd   : > { %2463 = vrcp.f32 %v1289_v21  ;;  %v1334_v32 = vand.u32 2147483648, %v1289_v21  ;;  %v1332_v30 = vand.u32 2147483647, %v1289_v21  ;;  %vm1328_vm6 = vweird.f32 %v1289_v21 }
 0x3bf   : > { %1498 = vadd.xlane.f32.xlu0 %v1497_v23  ;;  %1482 = vadd.xlane.f32.xlu1 %v1481_v56  ;;  %v1335_v35 = vor.u32 1.1754944e-38, %v1334_v32  ;;  %vm1333_vm8 = vcmp.eq.f32.partialorder %v1332_v30, 8.507059e+37  ;;  %v1510_v23 = vmul.f32 %v2933_v61, %v3078_v45  ;;  %v1542_v56 = vmul.f32 %v2945_v11, %v3078_v45 }
 0x3c0   : > { %1466 = vadd.xlane.f32.xlu2 %v1465_v51  ;;  %v1526_v51 = vmul.f32 %v2941_v2, %v3078_v45 }
 0x3c1   : > { %v1516_v27 = vsel %vm726_vm3, %v1510_v23, 0.0 }
 0x3c2   : > { %v1532_v29 = vsel %vm726_vm3, %v1526_v51, 0.0 }
 0x3c3   : > { %v2464_v28 = vpop.eup %2463 }
 0x3c4   : > { %v1324_v54 = vmul.f32 %v2464_v28, %v1289_v21  ;;  %vm1329_vm5 = vweird.f32 %v2464_v28  ;;  %v1484_v21 = vsel %vm726_vm3, %v1478_v16, 0.0 }
 0x3c5   : > { %vm1330_vm7 = vmor %vm1328_vm6, %vm1329_vm5  ;;  %vm1615_vm5 = vcmask 23552   ;;  %vm1620_vm6 = vcmask 31744  }
 0x3c6   : > { %v1325_v59 = vsub.f32 1.0, %v1324_v54  ;;  %v1558_v54 = vmul.f32 %v2952_v20, %v3078_v45 }
 0x3c7   : > { %1546 = vadd.xlane.f32.xlu0 %v1545_v38  ;;  %1530 = vadd.xlane.f32.xlu1 %v1529_v39  ;;  %v1574_v38 = vmul.f32 %v2959_v25, %v3078_v45 }
 0x3c8   : > { %v1326_v18 = vmul.f32 %v2464_v28, %v1325_v59  ;;  %1514 = vadd.xlane.f32.xlu2 %v1513_v48  ;;  %v1590_v59 = vmul.f32 %v3008_v41, %v3078_v45  ;;  %v1564_v48 = vsel %vm726_vm3, %v1558_v54, 0.0 }
 0x3ca   : > { %v1327_v42 = vadd.f32 %v2464_v28, %v1326_v18  ;;  %v1596_v18 = vsel %vm726_vm3, %v1590_v59, 0.0 }
 0x3cc   : > { %v1331_v58 = vsel %vm1330_vm7, %v2464_v28, %v1327_v42  ;;  %v1548_v28 = vsel %vm726_vm3, %v1542_v56, 0.0  ;;  %v1580_v42 = vsel %vm726_vm3, %v1574_v38, 0.0  ;;  %vm1625_vm7 = vcmask 39936  }
 0x3cd   : > { %v1336_v43 = vsel %vm1333_vm8, %v1335_v35, %v1331_v58  ;;  %vm1630_vm8 = vcmask 48128  }
 0x3ce   : > { %v3116_v60 = vmul.f32 %v3066_v57, %v1336_v43  ;;  %v1382_v57 = vmul.f32 %v2874_v8, %v3078_v45 }
 0x3cf   : > { %1594 = vadd.xlane.f32.xlu0 %v1593_v3  ;;  %1578 = vadd.xlane.f32.xlu1 %v1577_v7 }
 0x3d0   : > { %1562 = vadd.xlane.f32.xlu2 %v1561_v0  ;;  %1359 = vst.msk [vmem:[%s3080_s30 + $0x10] sm:$0xff] %vm726_vm3, %v3116_v60  ;;  %v1388_v52 = vsel %vm726_vm3, %v1382_v57, 0.0  ;;  %v1399_v31 = vmul.f32 %v2886_v15, %v3116_v60  ;;  %v1383_v58 = vmul.f32 %v2874_v8, %v3116_v60  ;;  %v1367_v3 = vmul.f32 %v2880_v9, %v3116_v60 }
 0x3d1   : > { %v1479_v53 = vmul.f32 %v2922_v40, %v3116_v60  ;;  %v1415_v10 = vmul.f32 %v2893_v22, %v3116_v60  ;;  %v1431_v6 = vmul.f32 %v2899_v24, %v3116_v60 }
 0x3d2   : > { %v1407_v44 = vsel %vm726_vm3, %v1399_v31, 0.0  ;;  %v1391_v57 = vsel %vm726_vm3, %v1383_v58, 0.0 }
 0x3d3   : > { %v1487_v1 = vsel %vm726_vm3, %v1479_v53, 0.0 }
 0x3d7   : > { %1373 = vadd.xlane.f32.xlu0 %v1372_v4  ;;  %1405 = vadd.xlane.f32.xlu1 %v1404_v33  ;;  %v1375_v33 = vsel %vm726_vm3, %v1367_v3, 0.0 }
 0x3d8   : > { %1389 = vadd.xlane.f32.xlu2 %v1388_v52  ;;  %v1495_v52 = vmul.f32 %v2927_v50, %v3116_v60 }
 0x3df   : > { %1421 = vadd.xlane.f32.xlu0 %v1420_v34  ;;  %1453 = vadd.xlane.f32.xlu1 %v1452_v46  ;;  %v1423_v34 = vsel %vm726_vm3, %v1415_v10, 0.0  ;;  %v1511_v46 = vmul.f32 %v2933_v61, %v3116_v60 }
 0x3e0   : > { %1437 = vadd.xlane.f32.xlu2 %v1436_v63 }
 0x3e1   : > { %v1519_v12 = vsel %vm726_vm3, %v1511_v46, 0.0 }
 0x3e7   : > { %1469 = vadd.xlane.f32.xlu0 %v1468_v19  ;;  %1501 = vadd.xlane.f32.xlu1 %v1500_v5  ;;  %v1439_v19 = vsel %vm726_vm3, %v1431_v6, 0.0  ;;  %v1527_v5 = vmul.f32 %v2941_v2, %v3116_v60 }
 0x3e8   : > { %1485 = vadd.xlane.f32.xlu2 %v1484_v21 }
 0x3e9   : > { %v1535_v23 = vsel %vm726_vm3, %v1527_v5, 0.0 }
 0x3ed   : > { %v1292_v47 = vpop.xlane.xlu1 %1291 }
 0x3ee   : > { %2465 = vrcp.f32 %v1292_v47  ;;  %v1349_v49 = vand.u32 2147483648, %v1292_v47  ;;  %v1347_v35 = vand.u32 2147483647, %v1292_v47  ;;  %vm1343_vm10 = vweird.f32 %v1292_v47 }
 0x3ef   : > { %1517 = vadd.xlane.f32.xlu0 %v1516_v27  ;;  %1549 = vadd.xlane.f32.xlu1 %v1548_v28  ;;  %v1463_v28 = vmul.f32 %v2917_v37, %v3116_v60 }
 0x3f0   : > { %1533 = vadd.xlane.f32.xlu2 %v1532_v29  ;;  %v1350_v7 = vor.u32 1.1754944e-38, %v1349_v49  ;;  %vm1348_vm12 = vcmp.eq.f32.partialorder %v1347_v35, 8.507059e+37 }
 0x3f1   : > { %v1471_v59 = vsel %vm726_vm3, %v1463_v28, 0.0 }
 0x3f4   : > { %v2466_v39 = vpop.eup %2465 }
 0x3f5   : > { %v1339_v32 = vmul.f32 %v2466_v39, %v1292_v47  ;;  %vm1344_vm9 = vweird.f32 %v2466_v39  ;;  %v1543_v47 = vmul.f32 %v2945_v11, %v3116_v60 }
 0x3f6   : > { %vm1345_vm11 = vmor %vm1343_vm10, %vm1344_vm9  ;;  %vm1635_vm9 = vcmask 56320   ;;  %vm1644_vm10 = vcmask 72704  }
 0x3f7   : > { %v1340_v30 = vsub.f32 1.0, %v1339_v32  ;;  %1565 = vadd.xlane.f32.xlu0 %v1564_v48  ;;  %1597 = vadd.xlane.f32.xlu1 %v1596_v18  ;;  %v1551_v29 = vsel %vm726_vm3, %v1543_v47, 0.0  ;;  %v1559_v32 = vmul.f32 %v2952_v20, %v3116_v60 }
 0x3f8   : > { %1581 = vadd.xlane.f32.xlu2 %v1580_v42 }
 0x3f9   : > { %v1341_v55 = vmul.f32 %v2466_v39, %v1340_v30  ;;  %v1567_v42 = vsel %vm726_vm3, %v1559_v32, 0.0 }
 0x3fb   : > { %v1342_v43 = vadd.f32 %v2466_v39, %v1341_v55 }
 0x3fd   : > { %v1346_v0 = vsel %vm1345_vm11, %v2466_v39, %v1342_v43  ;;  %vm1649_vm11 = vcmask 80896  }
 0x3fe   : > { %v1351_v62 = vsel %vm1348_vm12, %v1350_v7, %v1346_v0  ;;  %vm1654_vm12 = vcmask 89088  }
 0x3ff   : > { %v3178_v4 = vmul.f32 %v3070_v26, %v1351_v62  ;;  %1408 = vadd.xlane.f32.xlu0 %v1407_v44  ;;  %1392 = vadd.xlane.f32.xlu1 %v1391_v57  ;;  %v1503_v26 = vsel %vm726_vm3, %v1495_v52, 0.0 }
 0x400   : > { %1376 = vadd.xlane.f32.xlu2 %v1375_v33 }
 0x401   : > { %1360 = vst.msk [vmem:[%s3080_s30 + $0x18] sm:$0xff] %vm726_vm3, %v3178_v4  ;;  %v1400_v63 = vmul.f32 %v2886_v15, %v3178_v4  ;;  %v1560_v21 = vmul.f32 %v2952_v20, %v3178_v4  ;;  %v1447_v15 = vmul.f32 %v2913_v36, %v3116_v60  ;;  %v1576_v27 = vmul.f32 %v2959_v25, %v3178_v4  ;;  %s2495_s30 = scalar_lea.hbm %s3523_s17, 64 }
 0x402   : > { %v1592_v48 = vmul.f32 %v3008_v41, %v3178_v4  ;;  %v1384_v30 = vmul.f32 %v2874_v8, %v3178_v4  ;;  %v1368_v20 = vmul.f32 %v2880_v9, %v3178_v4  ;;  %v1480_v8 = vmul.f32 %v2922_v40, %v3178_v4 }
 0x403   : > { %v1410_v16 = vsel %vm726_vm3, %v1400_v63, 0.0  ;;  %v1570_v56 = vsel %vm726_vm3, %v1560_v21, 0.0  ;;  %v1455_v51 = vsel %vm726_vm3, %v1447_v15, 0.0  ;;  %v1586_v54 = vsel %vm726_vm3, %v1576_v27, 0.0 }
 0x404   : > { %v1602_v49 = vsel %vm726_vm3, %v1592_v48, 0.0  ;;  %v1394_v55 = vsel %vm726_vm3, %v1384_v30, 0.0  ;;  %v1378_v3 = vsel %vm726_vm3, %v1368_v20, 0.0  ;;  %v1490_v7 = vsel %vm726_vm3, %v1480_v8, 0.0 }
 0x405   : > { %v1416_v44 = vmul.f32 %v2893_v22, %v3178_v4  ;;  %v1496_v33 = vmul.f32 %v2927_v50, %v3178_v4  ;;  %v1591_v20 = vmul.f32 %v3008_v41, %v3116_v60 }
 0x407   : > { %1504 = vadd.xlane.f32.xlu0 %v1503_v26  ;;  %1488 = vadd.xlane.f32.xlu1 %v1487_v1  ;;  %v1426_v40 = vsel %vm726_vm3, %v1416_v44, 0.0  ;;  %v1506_v52 = vsel %vm726_vm3, %v1496_v33, 0.0  ;;  %v1432_v26 = vmul.f32 %v2899_v24, %v3178_v4  ;;  %v1512_v1 = vmul.f32 %v2933_v61, %v3178_v4 }
 0x408   : > { %1424 = vadd.xlane.f32.xlu2 %v1423_v34  ;;  %v1448_v24 = vmul.f32 %v2913_v36, %v3178_v4  ;;  %v1528_v61 = vmul.f32 %v2941_v2, %v3178_v4  ;;  %v1544_v36 = vmul.f32 %v2945_v11, %v3178_v4 }
 0x409   : > { %v1442_v50 = vsel %vm726_vm3, %v1432_v26, 0.0  ;;  %v1522_v34 = vsel %vm726_vm3, %v1512_v1, 0.0 }
 0x40f   : > { %1520 = vadd.xlane.f32.xlu0 %v1519_v12  ;;  %1411 = vadd.xlane.f32.xlu1 %v1410_v16  ;;  %v1458_v12 = vsel %vm726_vm3, %v1448_v24, 0.0  ;;  %v1538_v16 = vsel %vm726_vm3, %v1528_v61, 0.0 }
 0x410   : > { %1440 = vadd.xlane.f32.xlu2 %v1439_v19 }
 0x417   : > { %1536 = vadd.xlane.f32.xlu0 %v1535_v23  ;;  %1571 = vadd.xlane.f32.xlu1 %v1570_v56  ;;  %v2285_v23 = vld [vmem:[%s3551_s5] sm:$0xff]  ;;  %v2608_v56 = vmov 65535  }
 0x418   : > { %1456 = vadd.xlane.f32.xlu2 %v1455_v51  ;;  %v1692_v51 = vsel %vm1690_vm15, 4294967295, %v2608_v56  ;;  %vm1659_vm15 = vcmask 97280  }
 0x419   : > { %v1693_v47 = vsel %vm1691_vm4, %v1692_v51, 0  ;;  %vm1664_vm4 = vcmask 105472  }
 0x41a   : > { %v1695_v27 = vand.u32 %v2285_v23, %v1693_v47 }
 0x41c   : > { %1704 = vmatpush.bf16.msrb.mxu3 %v1695_v27 }
 0x41f   : > { %1552 = vadd.xlane.f32.xlu0 %v1551_v29  ;;  %1587 = vadd.xlane.f32.xlu1 %v1586_v54 }
 0x420   : > { %1472 = vadd.xlane.f32.xlu2 %v1471_v59 }
 0x422   : > { %v3220_v38 = vpop.xlane.xlu0 %1402  ;;  %v1387_v39 = vpop.xlane.xlu1 %1386 }
 0x423   : > { %v1371_v18 = vpop.xlane.xlu2 %1370 }
 0x424   : > { %v1606_v2 = vsel %vm1605_vm13, %v1371_v18, %v1387_v39  ;;  %v1575_v39 = vmul.f32 %v2959_v25, %v3116_v60 }
 0x425   : > { %v1611_v11 = vsel %vm1610_vm14, %v1606_v2, %v3220_v38 }
 0x426   : > { %v1583_v30 = vsel %vm726_vm3, %v1575_v39, 0.0 }
 0x427   : > { %1568 = vadd.xlane.f32.xlu0 %v1567_v42  ;;  %1603 = vadd.xlane.f32.xlu1 %v1602_v49 }
 0x428   : > { %1395 = vadd.xlane.f32.xlu2 %v1394_v55 }
 0x42a   : > { %v3231_v35 = vpop.xlane.xlu0 %1450  ;;  %v3233_v31 = vpop.xlane.xlu1 %1434 }
 0x42b   : > { %v1419_v58 = vpop.xlane.xlu2 %1418  ;;  %v3237_v43 = vpop.f32.mrf.mxu1 }
 0x42c   : > { %v1616_v28 = vsel %vm1615_vm5, %v1611_v11, %v1419_v58 }
 0x42d   : > { %v1621_v48 = vsel %vm1620_vm6, %v1616_v28, %v3233_v31 }
 0x42e   : > { %v1626_v42 = vsel %vm1625_vm7, %v1621_v48, %v3231_v35 }
 0x42f   : > { %1379 = vadd.xlane.f32.xlu0 %v1378_v3 }
 0x430   : > { %1491 = vadd.xlane.f32.xlu2 %v1490_v7  ;;  %v1599_v7 = vsel %vm726_vm3, %v1591_v20, 0.0 }
 0x432   : > { %v3243_v0 = vpop.xlane.xlu0 %1498  ;;  %v3245_v62 = vpop.xlane.xlu1 %1482 }
 0x433   : > { %v3249_v9 = vpop.xlane.xlu2 %1466  ;;  %v1733_v57 = vpop.f32.mrf.mxu1 }
 0x434   : > { %v1631_v25 = vsel %vm1630_vm8, %v1626_v42, %v3249_v9 }
 0x435   : > { %v1636_v8 = vsel %vm1635_vm9, %v1631_v25, %v3245_v62 }
 0x436   : > { %v1640_v44 = vsel %vm726_vm3, %v1636_v8, %v3243_v0 }
 0x437   : > { %1427 = vadd.xlane.f32.xlu0 %v1426_v40 }
 0x438   : > { %1507 = vadd.xlane.f32.xlu2 %v1506_v52 }
 0x43a   : > { %v3255_v53 = vpop.xlane.xlu0 %1546  ;;  %v3257_v10 = vpop.xlane.xlu1 %1530 }
 0x43b   : > { %v3261_v22 = vpop.xlane.xlu2 %1514 }
 0x43c   : > { %v1645_v9 = vsel %vm1644_vm10, %v1640_v44, %v3261_v22 }
 0x43d   : > { %v1650_v62 = vsel %vm1649_vm11, %v1645_v9, %v3257_v10 }
 0x43e   : > { %v1655_v0 = vsel %vm1654_vm12, %v1650_v62, %v3255_v53 }
 0x43f   : > { %1443 = vadd.xlane.f32.xlu0 %v1442_v50 }
 0x440   : > { %1523 = vadd.xlane.f32.xlu2 %v1522_v34  ;;  %688 = vrot.lane.b32.xlu1 %v2785_v13, %s2591_s21  ;;  %v1464_v13 = vmul.f32 %v2917_v37, %v3178_v4  ;;  %v1554_v37 = vsel %vm726_vm3, %v1544_v36, 0.0 }
 0x442   : > { %v3269_v46 = vpop.xlane.xlu0 %1594  ;;  %v3271_v63 = vpop.xlane.xlu1 %1578  ;;  %v1474_v15 = vsel %vm726_vm3, %v1464_v13, 0.0 }
 0x443   : > { %v3275_v6 = vpop.xlane.xlu2 %1562 }
 0x444   : > { %v1660_v22 = vsel %vm1659_vm15, %v1655_v0, %v3275_v6 }
 0x445   : > { %v1665_v10 = vsel %vm1664_vm4, %v1660_v22, %v3271_v63 }
 0x446   : > { %v1670_v6 = vsel %vm1669_vm0, %v1665_v10, %v3269_v46 }
 0x447   : > { %1459 = vadd.xlane.f32.xlu0 %v1458_v12 }
 0x448   : > { %1539 = vadd.xlane.f32.xlu2 %v1538_v16 }
 0x44a   : > { %v1374_v19 = vpop.xlane.xlu0 %1373  ;;  %v1406_v5 = vpop.xlane.xlu1 %1405 }
 0x44b   : > { %v1390_v21 = vpop.xlane.xlu2 %1389 }
 0x44c   : > { %v1607_v29 = vsel %vm1605_vm13, %v1374_v19, %v1390_v21 }
 0x44d   : > { %v1612_v18 = vsel %vm1610_vm14, %v1607_v29, %v1406_v5 }
 0x44f   : > { %1475 = vadd.xlane.f32.xlu0 %v1474_v15 }
 0x450   : > { %1555 = vadd.xlane.f32.xlu2 %v1554_v37 }
 0x452   : > { %v1422_v54 = vpop.xlane.xlu0 %1421  ;;  %v1454_v59 = vpop.xlane.xlu1 %1453 }
 0x453   : > { %v1438_v32 = vpop.xlane.xlu2 %1437  ;;  %v1617_v38 = vsel %vm1615_vm5, %v1612_v18, %v1422_v54 }
 0x454   : > { %v1622_v49 = vsel %vm1620_vm6, %v1617_v38, %v1438_v32 }
 0x455   : > { %v1627_v3 = vsel %vm1625_vm7, %v1622_v49, %v1454_v59 }
 0x457   : > { %1584 = vadd.xlane.f32.xlu0 %v1583_v30 }
 0x45a   : > { %v1470_v55 = vpop.xlane.xlu0 %1469  ;;  %v1502_v31 = vpop.xlane.xlu1 %1501 }
 0x45b   : > { %v1486_v58 = vpop.xlane.xlu2 %1485  ;;  %v1632_v35 = vsel %vm1630_vm8, %v1627_v3, %v1470_v55 }
 0x45c   : > { %v1637_v41 = vsel %vm1635_vm9, %v1632_v35, %v1486_v58 }
 0x45d   : > { %v1641_v40 = vsel %vm726_vm3, %v1637_v41, %v1502_v31  ;;  %v1364_v41 = vpack.c.bf16 %v3178_v4, %v3178_v4 }
 0x45f   : > { %1600 = vadd.xlane.f32.xlu0 %v1599_v7 }
 0x462   : > { %v1518_v57 = vpop.xlane.xlu0 %1517  ;;  %v1550_v33 = vpop.xlane.xlu1 %1549 }
 0x463   : > { %v1534_v52 = vpop.xlane.xlu2 %1533  ;;  %v1646_v26 = vsel %vm1644_vm10, %v1641_v40, %v1518_v57 }
 0x464   : > { %v1651_v1 = vsel %vm1649_vm11, %v1646_v26, %v1534_v52 }
 0x465   : > { %v1656_v50 = vsel %vm1654_vm12, %v1651_v1, %v1550_v33 }
 0x468   : > { %686 = vrot.lane.b32.xlu2 %v2794_v17, %s2591_s21 }
 0x46a   : > { %v1566_v34 = vpop.xlane.xlu0 %1565  ;;  %v1598_v24 = vpop.xlane.xlu1 %1597 }
 0x46b   : > { %v1661_v61 = vsel %vm1659_vm15, %v1656_v50, %v1566_v34  ;;  %v1582_v53 = vpop.xlane.xlu2 %1581 }
 0x46c   : > { %v1666_v12 = vsel %vm1664_vm4, %v1661_v61, %v1582_v53 }
 0x46d   : > { %v1671_v16 = vsel %vm1669_vm0, %v1666_v12, %v1598_v24 }
 0x46e   : > { %v1674_v17 = vpack.c.bf16 %v1671_v16, %v1670_v6 }
 0x470   : > { %2233 = vmatmul.msk.bf16.vlgmr.msrb.gmra.mxu3 %vm3530_vm2, %v1674_v17  ;;  %vm3552_vm2 = vcmask 1043456  }
 0x472   : > { %v1409_v63 = vpop.xlane.xlu0 %1408  ;;  %v1393_v13 = vpop.xlane.xlu1 %1392 }
 0x473   : > { %v1377_v19 = vpop.xlane.xlu2 %1376  ;;  %684 = vrot.lane.b32.xlu0 %v2787_v14, %s2591_s21  ;;  %s2609_s21 = smov 24  }
 0x474   : > { %v1608_v5 = vsel %vm1605_vm13, %v1377_v19, %v1393_v13 }
 0x475   : > { %v1613_v21 = vsel %vm1610_vm14, %v1608_v5, %v1409_v63 }
 0x47a   : > { %v1505_v36 = vpop.xlane.xlu0 %1504  ;;  %v1489_v2 = vpop.xlane.xlu1 %1488 }
 0x47b   : > { %v1425_v15 = vpop.xlane.xlu2 %1424 }
 0x47c   : > { %v1618_v46 = vsel %vm1615_vm5, %v1613_v21, %v1425_v15 }
 0x482   : > { %v1521_v23 = vpop.xlane.xlu0 %1520  ;;  %v1412_v11 = vpop.xlane.xlu1 %1411 }
 0x483   : > { %v1441_v37 = vpop.xlane.xlu2 %1440 }
 0x484   : > { %v1623_v56 = vsel %vm1620_vm6, %v1618_v46, %v1441_v37 }
 0x48a   : > { %v1537_v51 = vpop.xlane.xlu0 %1536  ;;  %v1572_v59 = vpop.xlane.xlu1 %1571 }
 0x48b   : > { %v1457_v47 = vpop.xlane.xlu2 %1456 }
 0x48c   : > { %v1628_v28 = vsel %vm1625_vm7, %v1623_v56, %v1457_v47 }
 0x492   : > { %v1553_v27 = vpop.xlane.xlu0 %1552  ;;  %v1588_v30 = vpop.xlane.xlu1 %1587 }
 0x493   : > { %v1473_v14 = vpop.xlane.xlu2 %1472 }
 0x494   : > { %v1633_v29 = vsel %vm1630_vm8, %v1628_v28, %v1473_v14 }
 0x495   : > { %v1638_v54 = vsel %vm1635_vm9, %v1633_v29, %v1489_v2 }
 0x496   : > { %v1642_v39 = vsel %vm726_vm3, %v1638_v54, %v1505_v36  ;;  %v1363_v36 = vpack.c.bf16 %v3116_v60, %v3116_v60 }
 0x497   : > { %v1647_v32 = vsel %vm1644_vm10, %v1642_v39, %v1521_v23  ;;  %v1362_v23 = vpack.c.bf16 %v3078_v45, %v3078_v45  ;;  %v2287_v39 = vld [vmem:[%s3555_s6 + $0x8] sm:$0xff] }
 0x498   : > { %v1652_v48 = vsel %vm1649_vm11, %v1647_v32, %v1537_v51  ;;  %v2286_v32 = vld [vmem:[%s3555_s6] sm:$0xff] }
 0x499   : > { %v1657_v53 = vsel %vm1654_vm12, %v1652_v48, %v1553_v27 }
 0x49a   : > { %v1569_v18 = vpop.xlane.xlu0 %1568  ;;  %v1604_v49 = vpop.xlane.xlu1 %1603 }
 0x49b   : > { %v1396_v38 = vpop.xlane.xlu2 %1395  ;;  %v1662_v6 = vsel %vm1659_vm15, %v1657_v53, %v1569_v18 }
 0x4a2   : > { %v1380_v42 = vpop.xlane.xlu0 %1379 }
 0x4a3   : > { %v1492_v25 = vpop.xlane.xlu2 %1491  ;;  %v1609_v9 = vsel %vm1605_vm13, %v1380_v42, %v1396_v38  ;;  %vm3553_vm13 = vcmask 121856  }
 0x4a4   : > { %v1614_v57 = vsel %vm1610_vm14, %v1609_v9, %v1412_v11  ;;  %vm3554_vm14 = vmmov %vm3552_vm2 }
 0x4aa   : > { %v1428_v55 = vpop.xlane.xlu0 %1427 }
 0x4ab   : > { %v1508_v31 = vpop.xlane.xlu2 %1507  ;;  %v1619_v33 = vsel %vm1615_vm5, %v1614_v57, %v1428_v55  ;;  %vm3556_vm5 = vcmask 261120  }
 0x4b2   : > { %v1444_v20 = vpop.xlane.xlu0 %1443  ;;  %v689_v58 = vpop.permute.xlu1 %688 }
 0x4b3   : > { %v1524_v8 = vpop.xlane.xlu2 %1523  ;;  %697 = vst.msk [vmem:[#allocation4 + $0xc] sm:$0xf] %vm657_vm1, %v689_v58  ;;  %v1624_v62 = vsel %vm1620_vm6, %v1619_v33, %v1444_v20 }
 0x4ba   : > { %v1460_v3 = vpop.xlane.xlu0 %1459  ;;  %v714_v35 = vld [vmem:[#allocation4 + $0xc] sm:$0xf] }
 0x4bb   : > { %v1540_v7 = vpop.xlane.xlu2 %1539  ;;  %v1777_v44 = vsel %vm3552_vm2, %v714_v35, 0  ;;  %v1629_v40 = vsel %vm1625_vm7, %v1624_v62, %v1460_v3 }
 0x4bc   : > { %1786 = vmatpush.bf16.msra.mxu1 %v1777_v44 }
 0x4bf   : > { %2238 = vmatmul.msk.bf16.vlgmr.msra.gmra.mxu1 %vm726_vm3, %v1364_v41 }
 0x4c2   : > { %v1476_v52 = vpop.xlane.xlu0 %1475 }
 0x4c3   : > { %v1556_v26 = vpop.xlane.xlu2 %1555  ;;  %v1634_v0 = vsel %vm1630_vm8, %v1629_v40, %v1476_v52 }
 0x4c4   : > { %v1639_v22 = vsel %vm1635_vm9, %v1634_v0, %v1492_v25 }
 0x4c5   : > { %v1643_v1 = vsel %vm726_vm3, %v1639_v22, %v1508_v31 }
 0x4c6   : > { %v1648_v4 = vsel %vm1644_vm10, %v1643_v1, %v1524_v8  ;;  %v2289_v1 = vld [vmem:[%s3516_s10 + $0x8] sm:$0xff] }
 0x4c7   : > { %v1653_v10 = vsel %vm1649_vm11, %v1648_v4, %v1540_v7  ;;  %v2612_v7 = vmov 32.0   ;;  %v2288_v4 = vld [vmem:[%s3516_s10] sm:$0xff] }
 0x4c8   : > { %v1658_v34 = vsel %vm1654_vm12, %v1653_v10, %v1556_v26  ;;  %2467 = vrcp.f32 %v2612_v7  ;;  %vm1971_vm12 = vcmask 523264  }
 0x4c9   : > { %v1663_v61 = vsel %vm1659_vm15, %v1658_v34, %v1572_v59 }
 0x4ca   : > { %v1585_v50 = vpop.xlane.xlu0 %1584  ;;  %v1668_v12 = vsel %vm1664_vm4, %v1663_v61, %v1588_v30 }
 0x4cb   : > { %v687_v24 = vpop.permute.xlu2 %686  ;;  %v1667_v16 = vsel %vm1664_vm4, %v1662_v6, %v1585_v50  ;;  %v1673_v13 = vsel %vm1669_vm0, %v1668_v12, %v1604_v49 }
 0x4cc   : > { %696 = vst.msk [vmem:[#allocation4 + $0x8] sm:$0xf] %vm657_vm1, %v687_v24 }
 0x4ce   : > { %v2468_v44 = vpop.eup %2467 }
 0x4cf   : > { %v1855_v9 = vmul.f32 32.0, %v2468_v44  ;;  %vm1859_vm6 = vweird.f32 %v2468_v44 }
 0x4d1   : > { %v1856_v41 = vsub.f32 1.0, %v1855_v9 }
 0x4d2   : > { %v1601_v17 = vpop.xlane.xlu0 %1600 }
 0x4d3   : > { %v1672_v63 = vsel %vm1669_vm0, %v1667_v16, %v1601_v17  ;;  %v713_v19 = vld [vmem:[#allocation4 + $0x8] sm:$0xf]  ;;  %vm1805_vm0 = vcmask 130048   ;;  %v1857_v57 = vmul.f32 %v2468_v44, %v1856_v41  ;;  %v2445_v17 = vld [vmem:[%s3514_s8] ss:$0 sm:$0xff] }
 0x4d4   : > { %v1675_v5 = vpack.c.bf16 %v1673_v13, %v1672_v63  ;;  %v1758_v21 = vsel %vm3552_vm2, %v713_v19, 0  ;;  %v2446_v13 = vld [vmem:[%s3515_s9] ss:$0 sm:$0xff] }
 0x4d5   : > { %1767 = vmatpush.bf16.msra.mxu2 %v1758_v21  ;;  %v1858_v33 = vadd.f32 %v2468_v44, %v1857_v57 }
 0x4d6   : > { %2234 = vmatmul.msk.bf16.gmra.mxu3 %vm3553_vm13, %v1675_v5 }
 0x4d7   : > { %v3404_v62 = vsel %vm1859_vm6, %v2468_v44, %v1858_v33 }
 0x4d8   : > { %2237 = vmatmul.msk.bf16.vlgmr.msra.gmra.mxu2 %vm726_vm3, %v1363_v36 }
 0x4d9   : > { %1918 = vmatpush.bf16.msrb.mxu2 %v2289_v1 }
 0x4dd   : > { %1919 = vmatpush.bf16.msrb.mxu2 %v2288_v4 }
 0x4e5   : > { %v685_v15 = vpop.permute.xlu0 %684 }
 0x4e6   : > { %695 = vst.msk [vmem:[#allocation4 + $0x4] sm:$0xf] %vm657_vm1, %v685_v15  ;;  %vm1807_vm1 = vcmask 195584   ;;  %v2293_v15 = vld [vmem:[%s3518_s12 + $0x18] sm:$0xff] }
 0x4e7   : > { %1979 = vmatpush.bf16.msra.mxu3 %v2293_v15 }
 0x4ed   : > { %v712_v46 = vld [vmem:[#allocation4 + $0x4] sm:$0xf] }
 0x4ee   : > { %v1739_v2 = vsel %vm3554_vm14, %v712_v46, 0  ;;  %v2292_v46 = vld [vmem:[%s3518_s12 + $0x10] sm:$0xff] }
 0x4ef   : > { %1748 = vmatpush.bf16.msra.mxu0 %v1739_v2  ;;  %1980 = vmatpush.bf16.msra.mxu3 %v2292_v46  ;;  %v2291_v2 = vld [vmem:[%s3518_s12 + $0x8] sm:$0xff] }
 0x4f2   : > { %2236 = vmatmul.msk.bf16.vlgmr.msra.gmra.mxu0 %vm726_vm3, %v1362_v23  ;;  %v2290_v23 = vld [vmem:[%s3518_s12] sm:$0xff] }
 0x4f3   : > { %v1706_v51 = vpop.f32.mrf.mxu3  ;;  %1840 = vmatpush.bf16.msrb.mxu0 %v2287_v39  ;;  %1981 = vmatpush.bf16.msra.mxu3 %v2291_v2 }
 0x4f4   : > { %v1732_v18 = vadd.f32 %v3237_v43, %v1706_v51  ;;  %v2444_v43 = vld [vmem:[%s3513_s7] ss:$0 sm:$0xff] }
 0x4f7   : > { %1841 = vmatpush.bf16.msrb.mxu0 %v2286_v32  ;;  %1982 = vmatpush.bf16.msra.mxu3 %v2290_v23  ;;  %v2448_v32 = vld [vmem:[%s3519_s13] ss:$0 sm:$0xff] }
 0x4fb   : > { %v1708_v47 = vpop.f32.mrf.mxu3 }
 0x53c   : > { %v1788_v37 = vpop.f32.mrf.mxu1 }
 0x544   : > { %v1790_v56 = vpop.f32.mrf.mxu1 }
 0x559   : > { %v1711_v11 = vpop.f32.mrf.mxu3 }
 0x55b   : > { %v1769_v60 = vpop.f32.mrf.mxu2 }
 0x55c   : > { %v1770_v45 = vadd.f32 %v1769_v60, %v1711_v11 }
 0x561   : > { %v1713_v27 = vpop.f32.mrf.mxu3 }
 0x562   : > { %v1789_v28 = vadd.f32 %v1788_v37, %v1713_v27  ;;  %v2447_v37 = vld [vmem:[%s3517_s11] ss:$0 sm:$0xff] }
 0x563   : > { %v1771_v14 = vpop.f32.mrf.mxu2 }
 0x564   : > { %1801 = vrot.lane.b32.xlu0 %v1789_v28, %s2609_s21  ;;  %s3557_s21 = sshll.u32 %s2767_s20, 3 }
 0x565   : > { %s594_s26 = scalar_lea.vmem %s3558_s19, %s3557_s21 }
 0x566   : > { %v1847_v20 = vld [vmem:[%s594_s26] sm:$0xff]  ;;  %s2028_s26 = scalar_lea.sflag [#allocation8], %s3075_s0 }
 0x56f   : > { %v1750_v29 = vpop.f32.mrf.mxu0 }
 0x570   : > { %v1751_v54 = vadd.f32 %v1750_v29, %v1708_v47 }
 0x572   : > { %1793 = vrot.lane.b32.xlu2 %v1751_v54, %s3532_s22  ;;  %s2294_s22 = sshll.u32 %s2577_s27, 5 }
 0x573   : > { %s2055_s18 = scalar_lea.hbm %s3523_s17, %s2294_s22 }
 0x574   : > { %s2058_s19 = sshll.u32 %s2055_s18, 4  ;;  %s2059_s19 = int_to_ptr.hbm [resolvable:$true] %s2058_s19 }
 0x575   : > { %s2489_s28 = sshra.s32 %s2059_s19, 4  ;;  %s2490_s28 = int_to_ptr.hbm [resolvable:$true] %s2489_s28 }
 0x576   : > { %s2491_s20 = scalar_lea.hbm %s2490_s28, 32  ;;  %p2496_p1 = scmp.lt.s32.totalorder %s2490_s28, %s3523_s17 }
 0x577   : > { %v1752_v59 = vpop.f32.mrf.mxu0  ;;  %p2492_p12 = scmp.ne.s32.totalorder %s2490_s28, %s2491_s20  ;;  %p2497_p2 = scmp.lt.s32.totalorder %s2495_s30, %s2491_s20 }
 0x579   : > { %p2493_p13 = pnand %p2492_p12, %p2744_p4  ;;  %p2498_p3 = por %p2497_p2, %p2496_p1 }
 0x57a   : > { %1797 = vrot.lane.b32.xlu2 %v1770_v45, %s2611_s23 }
 0x57b   : > { %p2494_p0 = pneg %p2493_p13 }
 0x57d   : > { %p2499_p5 = pnand %p2498_p3, %p2494_p0 }
 0x5cc   : > { %v1794_v48 = vpop.permute.xlu2 %1793 }
 0x5cd   : > { %v1804_v38 = vsel %vm726_vm3, %v1732_v18, %v1794_v48  ;;  %vm3559_vm3 = vmmov %vm3556_vm5 }
 0x5ce   : > { %vm3560_vm7 = vmmov %vm3559_vm3 }
 0x5cf   : > { %vm3561_vm11 = vmmov %vm3559_vm3 }
 0x5d0   : > { %vm3562_vm15 = vmmov %vm3559_vm3 }
 0x5d1   : > { %vm3563_vm4 = vmmov %vm3559_vm3 }
 0x5d4   : > { %v1798_v30 = vpop.permute.xlu2 %1797 }
 0x5d5   : > { %v1806_v42 = vsel %vm1805_vm0, %v1804_v38, %v1798_v30 }
 0x5d6   : > { %v1802_v25 = vpop.permute.xlu0 %1801 }
 0x5d7   : > { %v1808_v49 = vsel %vm1807_vm1, %v1806_v42, %v1802_v25 }
 0x5d8   : > { %v1809_v55 = vpack.c.bf16 %v1808_v49, %v1808_v49 }
 0x5da   : > { %2247 = vmatmul.msk.bf16.vlgmr.msrb.gmra.mxu0 %vm3556_vm5, %v1809_v55 }
 0x657   : > { %v1843_v31 = vpop.f32.mrf.mxu0 }
 0x658   : > { %v1844_v58 = vadd.f32 %v2444_v43, %v1843_v31 }
 0x65a   : > { %v1848_v8 = vadd.f32 %v1847_v20, %v1844_v58 }
 0x65c   : > { %v1851_v3 = vsel %vm3559_vm3, %v1848_v8, 0.0 }
 0x65d   : > { %1852 = vadd.xlane.f32.xlu2 %v1851_v3 }
 0x65f   : > { %v1845_v35 = vpop.f32.mrf.mxu0 }
 0x6d0   : > { %v1853_v40 = vpop.xlane.xlu2 %1852 }
 0x6d1   : > { %v1861_v52 = vmul.f32 %v3404_v62, %v1853_v40 }
 0x6d3   : > { %v1862_v26 = vsub.f32 %v1848_v8, %v1861_v52 }
 0x6d5   : > { %v1863_v0 = vmul.f32 %v1862_v26, %v1862_v26 }
 0x6d7   : > { %v1864_v22 = vsel %vm3560_vm7, %v1863_v0, 0.0 }
 0x6d8   : > { %1865 = vadd.xlane.f32.xlu0 %v1864_v22 }
 0x74b   : > { %v1866_v10 = vpop.xlane.xlu0 %1865 }
 0x74c   : > { %v1867_v50 = vmul.f32 %v1866_v10, %v3404_v62 }
 0x74e   : > { %v1868_v34 = vadd.f32 1e-05, %v1867_v50 }
 0x750   : > { %2469 = vrsqrt.f32 %v1868_v34  ;;  %vm1875_vm9 = vweird.f32 %v1868_v34 }
 0x756   : > { %v2470_v24 = vpop.eup %2469 }
 0x757   : > { %v1870_v61 = vmul.f32 %v2470_v24, %v1868_v34  ;;  %vm1876_vm8 = vweird.f32 %v2470_v24 }
 0x758   : > { %vm1877_vm10 = vmor %vm1875_vm9, %vm1876_vm8 }
 0x759   : > { %v1871_v53 = vmul.f32 %v2470_v24, %v1870_v61 }
 0x75b   : > { %v1872_v12 = vmul.f32 0.5, %v1871_v53 }
 0x75d   : > { %v1873_v6 = vsub.f32 1.5, %v1872_v12 }
 0x75f   : > { %v1874_v16 = vmul.f32 %v2470_v24, %v1873_v6 }
 0x761   : > { %v1878_v63 = vsel %vm1877_vm10, %v2470_v24, %v1874_v16 }
 0x762   : > { %v1879_v19 = vmul.f32 %v1878_v63, %v1862_v26 }
 0x764   : > { %v1883_v5 = vmul.f32 %v2445_v17, %v1879_v19 }
 0x766   : > { %v1887_v21 = vadd.f32 %v2446_v13, %v1883_v5 }
 0x768   : > { %v1888_v36 = vpack.c.bf16 %v1887_v21, %v1887_v21 }
 0x76a   : > { %2256 = vmatmul.msk.bf16.vlgmr.msrb.gmra.mxu2 %vm3561_vm11, %v1888_v36 }
 0x7ed   : > { %v1921_v56 = vpop.f32.mrf.mxu2 }
 0x7ee   : > { %v1922_v51 = vadd.f32 %v2447_v37, %v1921_v56 }
 0x7f0   : > { %v1926_v47 = vmul.f32 0.044715, %v1922_v51  ;;  %v1925_v54 = vmul.f32 0.5, %v1922_v51 }
 0x7f2   : > { %v1927_v11 = vmul.f32 %v1926_v47, %v1922_v51 }
 0x7f4   : > { %v1928_v60 = vmul.f32 %v1927_v11, %v1922_v51 }
 0x7f5   : > { %v1923_v27 = vpop.f32.mrf.mxu2 }
 0x7f6   : > { %v1929_v28 = vadd.f32 %v1928_v60, %v1922_v51 }
 0x7f8   : > { %v1930_v14 = vmul.f32 0.7978846, %v1929_v28 }
 0x7fa   : > { %2471 = vtanh.f32 %v1930_v14 }
 0x800   : > { %v2472_v29 = vpop.eup %2471 }
 0x801   : > { %v1932_v59 = vadd.f32 1.0, %v2472_v29 }
 0x803   : > { %v1933_v45 = vmul.f32 %v1932_v59, %v1925_v54 }
 0x805   : > { %v1934_v39 = vpack.c.bf16 %v1933_v45, %v1933_v45 }
 0x807   : > { %2273 = vmatmul.msk.bf16.vlgmr.msra.gmra.mxu3 %vm1971_vm12, %v1934_v39 }
 0x88a   : > { %v1984_v48 = vpop.f32.mrf.mxu3 }
 0x88b   : > { %v1985_v18 = vadd.f32 %v2448_v32, %v1984_v48 }
 0x88d   : > { %v1988_v38 = vadd.f32 %v1985_v18, %v1887_v21 }
 0x88f   : > { %v1991_v30 = vsel %vm3562_vm15, %v1988_v38, 0.0 }
 0x890   : > { %1992 = vadd.xlane.f32.xlu1 %v1991_v30 }
 0x892   : > { %v1986_v42 = vpop.f32.mrf.mxu3 }
 0x903   : > { %v1993_v25 = vpop.xlane.xlu1 %1992 }
 0x904   : > { %v1994_v49 = vmul.f32 %v1993_v25, %v3404_v62 }
 0x906   : > { %v1995_v55 = vsub.f32 %v1988_v38, %v1994_v49 }
 0x908   : > { %v1996_v43 = vmul.f32 %v1995_v55, %v1995_v55 }
 0x90a   : > { %v1997_v31 = vsel %vm3563_vm4, %v1996_v43, 0.0 }
 0x90b   : > { %1998 = vadd.xlane.f32.xlu2 %v1997_v31 }
 0x90c   : > { %2502 = shalt.err (!%p2499_p5)
}
 0x90d   : > { %s2613_s22 = smov 128   ;;  %s3564_s21 = smov 8   ;;  %v2449_v57 = vld [vmem:[%s3520_s14] ss:$0 sm:$0xff]  ;;  %vm3565_vm0 = vmmov %vm3559_vm3 }
 0x90e   : > { %2296 = dma.vmem_to_hbm [thread:$0]  (%p2744_p4), %s2057_s3, 512, %s2059_s19, %s2028_s26, %s2613_s22, %s2613_s22, %s3564_s21  }
 0x90f   : > { %s2187_s4 = sshll.u32 %s3075_s0, 3  ;;  %s2276_s5 = sshll.u32 %s2577_s27, 3  ;;  %v2450_v40 = vld [vmem:[%s3521_s15] ss:$0 sm:$0xff] }
 0x910   : > { %s2039_s19 = scalar_lea.hbm %s3522_s16, %s2276_s5  ;;  %s580_s27 = scalar_lea.vmem [#allocation5], %s2187_s4 }
 0x911   : > { %s2041_s20 = sshll.u32 %s580_s27, 4  ;;  %s2043_s2 = sshll.u32 %s2039_s19, 4  ;;  %s2042_s20 = int_to_ptr.vmem [resolvable:$true] %s2041_s20  ;;  %s2044_s2 = int_to_ptr.hbm [resolvable:$true] %s2043_s2 }
 0x912   : > { %s2023_s30 = scalar_lea.sflag [#allocation6], %s3075_s0  ;;  %s2517_s22 = sshra.s32 %s2044_s2, 4  ;;  %s2518_s22 = int_to_ptr.hbm [resolvable:$true] %s2517_s22 }
 0x913   : > { %s2519_s21 = scalar_lea.hbm %s2518_s22, 8  ;;  %s2523_s4 = scalar_lea.hbm %s3522_s16, 16 }
 0x914   : > { %p2520_p6 = scmp.ne.s32.totalorder %s2518_s22, %s2519_s21  ;;  %p2524_p10 = scmp.lt.s32.totalorder %s2518_s22, %s3522_s16 }
 0x915   : > { %p2525_p11 = scmp.lt.s32.totalorder %s2523_s4, %s2519_s21 }
 0x916   : > { %p2521_p7 = pnand %p2520_p6, %p2744_p4 }
 0x917   : > { %p2526_p12 = por %p2525_p11, %p2524_p10 }
 0x918   : > { %p2522_p9 = pneg %p2521_p7 }
 0x91a   : > { %p2527_p13 = pnand %p2526_p12, %p2522_p9 }
 0x97e   : > { %v1999_v20 = vpop.xlane.xlu2 %1998 }
 0x97f   : > { %v2000_v58 = vmul.f32 %v1999_v20, %v3404_v62 }
 0x981   : > { %v2001_v8 = vadd.f32 1e-05, %v2000_v58 }
 0x983   : > { %2473 = vrsqrt.f32 %v2001_v8  ;;  %vm2008_vm13 = vweird.f32 %v2001_v8 }
 0x989   : > { %v2474_v3 = vpop.eup %2473 }
 0x98a   : > { %v2003_v35 = vmul.f32 %v2474_v3, %v2001_v8  ;;  %vm2009_vm2 = vweird.f32 %v2474_v3 }
 0x98b   : > { %vm2010_vm14 = vmor %vm2008_vm13, %vm2009_vm2 }
 0x98c   : > { %v2004_v7 = vmul.f32 %v2474_v3, %v2003_v35 }
 0x98e   : > { %v2005_v44 = vmul.f32 0.5, %v2004_v7 }
 0x990   : > { %v2006_v9 = vsub.f32 1.5, %v2005_v44 }
 0x992   : > { %v2007_v41 = vmul.f32 %v2474_v3, %v2006_v9 }
 0x994   : > { %v2011_v33 = vsel %vm2010_vm14, %v2474_v3, %v2007_v41 }
 0x995   : > { %v2012_v62 = vmul.f32 %v2011_v33, %v1995_v55 }
 0x997   : > { %v2016_v52 = vmul.f32 %v2449_v57, %v2012_v62 }
 0x999   : > { %v2020_v26 = vadd.f32 %v2450_v40, %v2016_v52 }
 0x99b   : > { %2021 = vst.msk [vmem:[%s580_s27] sm:$0xff] %vm3565_vm0, %v2020_v26 }
 0x99c   : > { %2530 = shalt.err (!%p2527_p13)
}
 0x99d   : > { %2295 = dma.vmem_to_hbm [thread:$0]  (%p2744_p4), %s2042_s20, 128, %s2044_s2, %s2023_s30  }
 0x99e PF: > { %p2306_p0 = scmp.ge.s32.totalorder %s2585_s29, 2  ;;  %s2073_s18 = sand.u32 1, %s2565_s24  }
 0x99f   : > { %s2074_s19 = scalar_lea.sflag [#allocation6], %s2073_s18 }
 0x9a0   : > { %p2300_p1 = pnand %p2306_p0, %p2751_p8 }
 0x9a2   : > { %p2301_p2 = pneg %p2300_p1 }
 0x9a4   : > { %2556 = dma.done.wait (%p2301_p2), %s2074_s19, 128  }
 0x9a5   : > { %2558 = vsyncadd (%p2301_p2), %s2074_s19, 4294967168  ;;  %s2084_s26 = scalar_lea.sflag [#allocation8], %s2073_s18 }
 0x9a6   : > { %2560 = dma.done.wait (%p2301_p2), %s2084_s26, 512  }
 0x9a7   : > { %2562 = vsyncadd (%p2301_p2), %s2084_s26, 4294966784  ;;  %s34_s29 = sadd.s32 1, %s2585_s29   ;;  %s3567_s1 = sld [smem:[#allocation11_spill]] }
 0x9a8   : > { %p31_p3 = scmp.ge.s32.totalorder %s34_s29, 4   ;;  %s3568_s26 = sld [smem:[#allocation15_spill]] }
 0x9a9   : > { %s3569_s27 = sld [smem:[#allocation12_spill]]  ;;  %s3571_s24 = smov %s2569_s25 }
 0x9aa   : > { %s3570_s28 = sld [smem:[#allocation13_spill]]  ;;  %33 = sbr.rel (!%p31_p3) target bundleno = 14 (0xe), region = 144 }
 0x9ad   : > { %s3572_s25 = smov %s3567_s1 }
 0x9af   :  { %2090 = vsyncpa [#allocation6], 1 }
 0x9b0   :  { %2092 = vsyncpa [#allocation6 + $0x1], 1 }
 0x9b1   :  { %2093 = vsyncpa [#allocation8], 1 }
 0x9b2   :  { %2095 = vsyncpa [#allocation8 + $0x1], 1 }

// kernel: encoder_layer_forward.1
= control target key start
LH: loop header
LB: loop body
LE: loop exit
PB: predicated region body
PF: predicated region fallthrough
CT: control target
= control target key end

     0   :  { %s3506_s0 = inlined_call_operand.vmem [shape: f32[2,8,32], index: 0, kind: input, shape index: {}, may-alias: {0,1}]   ;;  %s3507_s1 = inlined_call_operand.vmem [shape: f32[2,8,32], index: 1, kind: input, shape index: {}, may-alias: {0,1}]   ;;  %s3508_s2 = inlined_call_operand.vmem [shape: bf16[32,96], index: 2, kind: input, shape index: {}]   ;;  %s3509_s3 = inlined_call_operand.vmem [shape: f32[1,96], index: 3, kind: input, shape index: {}]   ;;  %s3510_s4 = inlined_call_operand.vmem [shape: bf16[8,15], index: 4, kind: input, shape index: {}]   ;;  %s3511_s5 = inlined_call_operand.vmem [shape: bf16[15,8], index: 5, kind: input, shape index: {}]   ;;  %s3512_s6 = inlined_call_operand.vmem [shape: bf16[32,32], index: 6, kind: input, shape index: {}]   ;;  %s3513_s7 = inlined_call_operand.vmem [shape: f32[1,32], index: 7, kind: input, shape index: {}]   ;;  %s3514_s8 = inlined_call_operand.vmem [shape: f32[1,32], index: 8, kind: input, shape index: {}]   ;;  %s3515_s9 = inlined_call_operand.vmem [shape: f32[1,32], index: 9, kind: input, shape index: {}]   ;;  %s3516_s10 = inlined_call_operand.vmem [shape: bf16[32,64], index: 10, kind: input, shape index: {}]   ;;  %s3517_s11 = inlined_call_operand.vmem [shape: f32[1,64], index: 11, kind: input, shape index: {}]   ;;  %s3518_s12 = inlined_call_operand.vmem [shape: bf16[64,32], index: 12, kind: input, shape index: {}]   ;;  %s3519_s13 = inlined_call_operand.vmem [shape: f32[1,32], index: 13, kind: input, shape index: {}]   ;;  %s3520_s14 = inlined_call_operand.vmem [shape: f32[1,32], index: 14, kind: input, shape index: {}]   ;;  %s3521_s15 = inlined_call_operand.vmem [shape: f32[1,32], index: 15, kind: input, shape index: {}]   ;;  %s3522_s16 = inlined_call_operand.hbm [shape: f32[2,8,32], index: 16, kind: output, shape index: {0}]   ;;  %s3523_s17 = inlined_call_operand.hbm [shape: f32[2,4,8,8], index: 17, kind: output, shape index: {1}]  }
   0x1   :  { %3533 = sst [smem:[#allocation16_spill]] %s3506_s0 }
   0x2   :  { %3534 = sst [smem:[#allocation17_spill]] %s3507_s1 }
   0x3   :  { %3535 = sst [smem:[#allocation18_spill]] %s3508_s2 }
   0x4   :  { %3536 = sst [smem:[#allocation19_spill]] %s3509_s3 }
   0x5   :  { %3537 = sst [smem:[#allocation20_spill]] %s3510_s4 }
   0x6   :  { %3538 = sst [smem:[#allocation21_spill]] %s3511_s5 }
   0x7   :  { %3539 = sst [smem:[#allocation22_spill]] %s3512_s6 }
   0x8   :  { %23 = vsyncpa [#allocation6], 0 }
   0x9   :  { %25 = vsyncpa [#allocation6 + $0x1], 0 }
   0xa   :  { %26 = vsyncpa [#allocation8], 0 }
   0xb   :  { %28 = vsyncpa [#allocation8 + $0x1], 0  ;;  %s2704_s24 = smov 0   ;;  %s2706_s25 = smov 0  }
   0xc   :  { %s2708_s26 = smov 0   ;;  %s2710_s27 = smov 0  }
   0xd   :  { %s2712_s28 = smov 0   ;;  %s2714_s29 = smov 0  }
   0xe LB: > { %3540 = sst [smem:[#allocation11_spill]] %s2573_s26  ;;  %s2182_s0 = sadd.s32 4294967295, %s2585_s29   ;;  %s2585_s29 = sphi %s2714_s29, %s34_s29   ;;  %s2581_s28 = sphi %s2712_s28, %s3570_s28   ;;  %s2577_s27 = sphi %s2710_s27, %s3569_s27   ;;  %s2573_s26 = sphi %s2708_s26, %s3568_s26   ;;  %s2569_s25 = sphi %s2706_s25, %s3572_s25   ;;  %s2565_s24 = sphi %s2704_s24, %s3571_s24  }
   0xf   : > { %3541 = sst [smem:[#allocation12_spill]] %s2581_s28  ;;  %s2183_s30 = sadd.s32 4294967294, %s2585_s29  }
  0x10   : > { %s46_s18 = sadd.s32 1, %s2581_s28  ;;  %s403_s19 = sadd.s32 1, %s2573_s26 }
  0x11   : > { %p48_p0 = scmp.ge.s32.totalorder %s46_s18, 2  ;;  %p413_p1 = scmp.ne.s32.totalorder %s2573_s26, %s2569_s25 }
  0x12   : > { %p414_p2 = scmp.eq.s32.totalorder %s2182_s0, 1  ;;  %p419_p3 = scmp.ne.s32.totalorder %s2569_s25, %s2565_s24 }
  0x13   : > { %s3574_s18 = smov (%p48_p0, %s46_s18), 0  ;;  %p420_p5 = scmp.eq.s32.totalorder %s2183_s30, 1 }
  0x14   : > { %3542 = sst [smem:[#allocation13_spill]] %s3574_s18  ;;  %p2744_p4 = por %p414_p2, %p413_p1 }
  0x15   : > { %s398_s20 = ssub.s32 %s2581_s28, %s3574_s18  ;;  %p2186_p6 = scmp.ge.s32.totalorder %s2585_s29, 1 }
  0x16   : > { %p401_p7 = scmp.eq.s32.totalorder %s398_s20, 0  ;;  %p2751_p8 = por %p420_p5, %p419_p3 }
  0x17   : > { %p525_p9 = scmp.lt.s32.totalorder %s2585_s29, 3 }
  0x18   : > { %s3544_s21 = scalar_select %p2751_p8, 1, 0 }
  0x19   : > { %s2757_s22 = scalar_select %p401_p7, %s2573_s26, %s403_s19  }
  0x1a   : > { %3545 = sst [smem:[#allocation14_spill]] %s3544_s21  ;;  %p526_p10 = pnand %p2186_p6, %p525_p9 }
  0x1b   : > { %3546 = sst [smem:[#allocation15_spill]] %s2757_s22  ;;  %p588_p11 = scmp.lt.s32.totalorder (!%p526_p10), %s2577_s27, 1 }
  0x1c   : > { %529 = sbr.rel (%p526_p10) target bundleno = 2462 (0x99e), region = 84  ;;  %s3547_s2 = sld [smem:[#allocation18_spill]] (!%p526_p10) }
  0x1d   : > { %s3548_s26 = sld [smem:[#allocation17_spill]] (!%p526_p10)  ;;  %s2587_s18 = smov (!%p526_p10), 104  }
  0x1e   : > { %s3549_s3 = sld [smem:[#allocation19_spill]] (!%p526_p10)  ;;  %s2588_s30 = smov (!%p526_p10), 120  }
  0x1f   : > { %s2590_s28 = smov (!%p526_p10), 96   ;;  %s3550_s4 = sld [smem:[#allocation20_spill]] (!%p526_p10) }
  0x20   : > { %s3075_s0 = sand.u32 (!%p526_p10), 1, %s2569_s25   ;;  %s3551_s5 = sld [smem:[#allocation21_spill]] (!%p526_p10) }
  0x21   : > { %s2767_s20 = scalar_select %p588_p11, %s2577_s27, 1  ;;  %vm3528_vm0 = vcmask 261120   ;;  %vm657_vm1 = vcmask 60416   ;;  %vm3529_vm2 = vcmask 1043456   ;;  %vm726_vm3 = vcmask 64512  }
  0x22   : > { %v2282_v0 = vld [vmem:[%s3547_s2 + $0x8] sm:$0xff]  ;;  %v2281_v1 = vld [vmem:[%s3547_s2] sm:$0xff]  ;;  %v2592_v30 = vmov 2   ;;  %v2593_v31 = vmov 1   ;;  %v2594_v32 = vmov 0   ;;  %v2595_v42 = vmov 3  }
  0x23   : > { %636 = vmatpush.bf16.msra.mxu0 %v2282_v0  ;;  %s3531_s19 = sshll.u32 %s2767_s20, 3  ;;  %2384 = vset.pattern.permute.xlu2 %v2592_v30  ;;  %v2596_v43 = vmov 6   ;;  %v2597_v44 = vmov 4   ;;  %v2598_v45 = vmov 7   ;;  %v2599_v47 = vmov 9   ;;  %s3532_s22 = smov 8  }
  0x24   : > { %s598_s21 = scalar_lea.vmem %s3548_s26, %s3531_s19  ;;  %v2443_v4 = vld [vmem:[%s3549_s3] ss:$0 sm:$0xff]  ;;  %s2589_s26 = smov 112   ;;  %2383 = vset.pattern.permute.xlu0 %v2593_v31  ;;  %2382 = vset.pattern.permute.xlu1 %v2594_v32  ;;  %v2600_v48 = vmov 5   ;;  %v2601_v50 = vmov 8   ;;  %v2602_v51 = vmov 14   ;;  %v756_v58 = vlaneseq }
  0x25   : > { %v604_v2 = vld [vmem:[%s598_s21] sm:$0xff]  ;;  %s2591_s21 = smov 64   ;;  %v2603_v52 = vmov 11   ;;  %v2604_v53 = vmov 10   ;;  %v2605_v54 = vmov 13   ;;  %v2606_v56 = vmov 12  }
  0x26   : > { %v605_v3 = vpack.c.bf16 %v604_v2, %v604_v2  ;;  %v715_v9 = vld [vmem:[%s3550_s4] sm:$0xf]  ;;  %v757_v60 = vshrl.u32 %v756_v58, 7  ;;  %v761_v61 = vand.u32 127, %v756_v58  ;;  %s2611_s23 = smov 16   ;;  %s3555_s6 = sld [smem:[#allocation22_spill]] }
  0x27   : > { %637 = vmatpush.bf16.msra.mxu0 %v2281_v1  ;;  %v735_v10 = vsel %vm3529_vm2, %v715_v9, 0  ;;  %s3558_s19 = sld [smem:[#allocation16_spill]] }
  0x28   : > { %744 = vmatpush.bf16.msra.mxu1 %v735_v10  ;;  %v762_v62 = vsub.s32 %v761_v61, %v757_v60 }
  0x2a   : > { %2199 = vmatmul.msk.bf16.vlgmr.msra.gmra.mxu0 %vm3528_vm0, %v605_v3  ;;  %vm763_vm4 = vcmp.gt.s32.totalorder %v762_v62, 4294967289  ;;  %vm1669_vm0 = vcmask 113664  }
  0x2b   : > { %v764_v63 = vsel %vm763_vm4, %v762_v62, 4294967289 }
  0x2c   : > { %vm765_vm5 = vcmp.lt.s32.totalorder %v764_v63, 7 }
  0x2d   : > { %v766_v2 = vsel %vm765_vm5, %v764_v63, 7 }
  0x2e   : > { %v2866_v3 = vadd.s32 7, %v766_v2 }
  0x30   : > { %vm799_vm6 = vcmp.eq.s32.totalorder %v2866_v3, 1  ;;  %vm768_vm7 = vcmp.eq.s32.totalorder %v2866_v3, 0  ;;  %vm826_vm8 = vcmp.eq.s32.totalorder %v2866_v3, 2  ;;  %vm853_vm9 = vcmp.eq.s32.totalorder %v2866_v3, 3 }
  0x31   : > { %vm880_vm10 = vcmp.eq.s32.totalorder %v2866_v3, 4  ;;  %vm907_vm11 = vcmp.eq.s32.totalorder %v2866_v3, 5  ;;  %vm934_vm12 = vcmp.eq.s32.totalorder %v2866_v3, 6  ;;  %vm961_vm13 = vcmp.eq.s32.totalorder %v2866_v3, 7 }
  0x32   : > { %vm988_vm14 = vcmp.eq.s32.totalorder %v2866_v3, 8  ;;  %vm1015_vm15 = vcmp.eq.s32.totalorder %v2866_v3, 9  ;;  %vm1042_vm4 = vcmp.eq.s32.totalorder %v2866_v3, 10  ;;  %vm1069_vm5 = vcmp.eq.s32.totalorder %v2866_v3, 11 }
  0xa7   : > { %v639_v5 = vpop.f32.mrf.mxu0 }
  0xa8   : > { %v640_v6 = vadd.f32 %v2443_v4, %v639_v5 }
  0xaa   : > { %650 = vrot.lane.b32.xlu1 %v640_v6, %s2587_s18  ;;  %644 = vrot.lane.b32.xlu0 %v640_v6, %s2588_s30  ;;  %v653_v7 = vpack.c.bf16 %v640_v6, %v640_v6  ;;  %s2188_s18 = sshll.u32 %s3075_s0, 5 }
  0xab   : > { %s3080_s30 = scalar_lea.vmem [#allocation7], %s2188_s18 }
  0xac   : > { %658 = vst.msk [vmem:[#allocation2] sm:$0xf] %vm657_vm1, %v653_v7  ;;  %s2056_s3 = sshll.u32 %s3080_s30, 4  ;;  %s2057_s3 = int_to_ptr.vmem [resolvable:$true] %s2056_s3 }
  0xaf   : > { %v641_v8 = vpop.f32.mrf.mxu0 }
  0xb2   : > { %647 = vrot.lane.b32.xlu0 %v640_v6, %s2589_s26  ;;  %666 = vrot.lane.b32.xlu1 %v653_v7, %s2590_s28 }
  0xb3   : > { %v703_v22 = vld [vmem:[#allocation2] sm:$0xf] }
  0xba   : > { %682 = vrot.lane.b32.xlu1 %v653_v7, %s2591_s21  ;;  %v2607_v7 = vmov 0.0  }
  0xbb   : > { %v2874_v8 = vsel %vm799_vm6, 1.0, %v2607_v7  ;;  %v2880_v9 = vsel %vm768_vm7, 1.0, %v2607_v7  ;;  %v2933_v61 = vsel %vm1015_vm15, 1.0, %v2607_v7  ;;  %v2941_v2 = vsel %vm1042_vm4, 1.0, %v2607_v7 }
  0xbc   : > { %vm1096_vm6 = vcmp.eq.s32.totalorder %v2866_v3, 12  ;;  %vm1123_vm7 = vcmp.eq.s32.totalorder %v2866_v3, 13 }
 0x11c   : > { %v651_v11 = vpop.permute.xlu1 %650  ;;  %v645_v12 = vpop.permute.xlu0 %644 }
 0x11d   : > { %v2785_v13 = vpack.c.bf16 %v651_v11, %v651_v11  ;;  %v2787_v14 = vpack.c.bf16 %v645_v12, %v645_v12 }
 0x11f   : > { %661 = vst.msk [vmem:[#allocation2 + $0xc] sm:$0xf] %vm657_vm1, %v2785_v13  ;;  %668 = vrot.lane.b32.xlu2 %v2787_v14, %s2590_s28 }
 0x120   : > { %659 = vst.msk [vmem:[#allocation2 + $0x4] sm:$0xf] %vm657_vm1, %v2787_v14 }
 0x124   : > { %v648_v15 = vpop.permute.xlu0 %647  ;;  %v667_v16 = vpop.permute.xlu1 %666 }
 0x125   : > { %v2794_v17 = vpack.c.bf16 %v648_v15, %v648_v15  ;;  %678 = vst.msk [vmem:[#allocation3] sm:$0xf] %vm657_vm1, %v667_v16  ;;  %v2886_v15 = vsel %vm826_vm8, 1.0, %v2607_v7  ;;  %vm1150_vm8 = vcmp.eq.s32.totalorder %v2866_v3, 14 }
 0x126   : > { %v706_v36 = vld [vmem:[#allocation2 + $0xc] sm:$0xf] }
 0x127   : > { %660 = vst.msk [vmem:[#allocation2 + $0x8] sm:$0xf] %vm657_vm1, %v2794_v17  ;;  %672 = vrot.lane.b32.xlu2 %v2785_v13, %s2590_s28  ;;  %670 = vrot.lane.b32.xlu0 %v2794_v17, %s2590_s28  ;;  %v2283_v18 = vld [vmem:[#allocation2] sm:$0xff] }
 0x128   : > { %2208 = vmatmul.msk.bf16.vlgmr.msra.gmra.mxu1 %vm726_vm3, %v2283_v18  ;;  %v704_v33 = vld [vmem:[#allocation2 + $0x4] sm:$0xf] }
 0x12c   : > { %v683_v19 = vpop.permute.xlu1 %682  ;;  %v707_v20 = vld [vmem:[#allocation3] sm:$0xf] }
 0x12d   : > { %694 = vst.msk [vmem:[#allocation4] sm:$0xf] %vm657_vm1, %v683_v19  ;;  %v1181_v21 = vsel %vm726_vm3, %v707_v20, 0 }
 0x12e   : > { %1190 = vmatpush.bf16.xpose.msra.mxu2 %v1181_v21  ;;  %v2284_v25 = vld [vmem:[#allocation2 + $0x8] sm:$0xff] }
 0x12f   : > { %v705_v41 = vld [vmem:[#allocation2 + $0x8] sm:$0xf] }
 0x134   : > { %v711_v23 = vld [vmem:[#allocation4] sm:$0xf] }
 0x135   : > { %2225 = vmatmul.msk.bf16.vlgmr.msra.gmra.mxu2 %vm726_vm3, %v703_v22  ;;  %v1720_v24 = vsel %vm3529_vm2, %v711_v23, 0  ;;  %v2893_v22 = vsel %vm853_vm9, 1.0, %v2607_v7  ;;  %vm3530_vm2 = vcmask 121856  }
 0x136   : > { %1729 = vmatpush.bf16.msrb.mxu1 %v1720_v24  ;;  %v2899_v24 = vsel %vm880_vm10, 1.0, %v2607_v7 }
 0x138   : > { %2209 = vmatmul.msk.bf16.gmra.mxu1 %vm726_vm3, %v2284_v25 }
 0x179   : > { %v669_v26 = vpop.permute.xlu2 %668 }
 0x17a   : > { %679 = vst.msk [vmem:[#allocation3 + $0x4] sm:$0xf] %vm657_vm1, %v669_v26 }
 0x181   : > { %v673_v27 = vpop.permute.xlu2 %672  ;;  %v708_v28 = vld [vmem:[#allocation3 + $0x4] sm:$0xf] }
 0x182   : > { %681 = vst.msk [vmem:[#allocation3 + $0xc] sm:$0xf] %vm657_vm1, %v673_v27  ;;  %v1200_v29 = vsel %vm726_vm3, %v708_v28, 0 }
 0x183   : > { %1209 = vmatpush.bf16.xpose.msra.mxu3 %v1200_v29 }
 0x189   : > { %v710_v34 = vld [vmem:[#allocation3 + $0xc] sm:$0xf] }
 0x18a   : > { %2226 = vmatmul.msk.bf16.vlgmr.msra.gmra.mxu3 %vm726_vm3, %v704_v33  ;;  %v1238_v35 = vsel %vm726_vm3, %v710_v34, 0 }
 0x18b   : > { %1247 = vmatpush.bf16.xpose.msrb.mxu2 %v1238_v35 }
 0x192   : > { %2228 = vmatmul.msk.bf16.vlgmr.msrb.gmra.mxu2 %vm726_vm3, %v706_v36  ;;  %v2913_v36 = vsel %vm907_vm11, 1.0, %v2607_v7 }
 0x199   : > { %v671_v37 = vpop.permute.xlu0 %670 }
 0x19a   : > { %680 = vst.msk [vmem:[#allocation3 + $0x8] sm:$0xf] %vm657_vm1, %v671_v37  ;;  %v2917_v37 = vsel %vm934_vm12, 1.0, %v2607_v7 }
 0x1a1   : > { %v709_v38 = vld [vmem:[#allocation3 + $0x8] sm:$0xf] }
 0x1a2   : > { %v1219_v39 = vsel %vm726_vm3, %v709_v38, 0 }
 0x1a3   : > { %1228 = vmatpush.bf16.xpose.msrb.mxu0 %v1219_v39 }
 0x1a5   : > { %v746_v40 = vpop.f32.mrf.mxu1 }
 0x1a6   : > { %830 = vperm.xlu2 %2384, %v746_v40   ;;  %803 = vperm.xlu0 %2383, %v746_v40  }
 0x1a7   : > { %773 = vperm.xlu1 %2382, %v746_v40  }
 0x1aa   : > { %2227 = vmatmul.msk.bf16.vlgmr.msrb.gmra.mxu0 %vm726_vm3, %v705_v41 }
 0x1ad   : > { %v748_v55 = vpop.f32.mrf.mxu1 }
 0x1ae   : > { %2385 = vset.pattern.permute.xlu2 %v2595_v42  ;;  %2388 = vset.pattern.permute.xlu0 %v2596_v43 }
 0x1af   : > { %2386 = vset.pattern.permute.xlu1 %v2597_v44  ;;  %857 = vperm.xlu2 %2385, %v746_v40  }
 0x1b0   : > { %938 = vperm.xlu0 %2388, %v746_v40   ;;  %884 = vperm.xlu1 %2386, %v746_v40  }
 0x1b5   : > { %v2841_v57 = vpop.f32.mrf.mxu1 }
 0x1b7   : > { %2389 = vset.pattern.permute.xlu2 %v2598_v45 }
 0x1b8   : > { %v2823_v46 = vpop.f32.mrf.mxu2  ;;  %2391 = vset.pattern.permute.xlu0 %v2599_v47  ;;  %2387 = vset.pattern.permute.xlu1 %v2600_v48 }
 0x1b9   : > { %965 = vperm.xlu2 %2389, %v746_v40   ;;  %1019 = vperm.xlu0 %2391, %v746_v40  }
 0x1ba   : > { %911 = vperm.xlu1 %2387, %v746_v40  }
 0x1bd   : > { %v2851_v59 = vpop.f32.mrf.mxu1 }
 0x1c0   : > { %v1194_v49 = vpop.f32.mrf.mxu2 }
 0x1c1   : > { %2390 = vset.pattern.permute.xlu2 %v2601_v50  ;;  %2396 = vset.pattern.permute.xlu0 %v2602_v51 }
 0x1c2   : > { %2393 = vset.pattern.permute.xlu1 %v2603_v52  ;;  %992 = vperm.xlu2 %2390, %v746_v40  }
 0x1c3   : > { %1154 = vperm.xlu0 %2396, %v746_v40   ;;  %1073 = vperm.xlu1 %2393, %v746_v40  }
 0x1ca   : > { %2392 = vset.pattern.permute.xlu2 %v2604_v53 }
 0x1cb   : > { %2400 = vset.pattern.permute.xlu0 %v2595_v42  ;;  %2395 = vset.pattern.permute.xlu1 %v2605_v54 }
 0x1cc   : > { %1046 = vperm.xlu2 %2392, %v746_v40   ;;  %1127 = vperm.xlu1 %2395, %v746_v40  }
 0x1cd   : > { %861 = vperm.xlu0 %2400, %v748_v55  }
 0x1d4   : > { %2394 = vset.pattern.permute.xlu2 %v2606_v56  ;;  %2398 = vset.pattern.permute.xlu1 %v2593_v31 }
 0x1d5   : > { %2405 = vset.pattern.permute.xlu0 %v2601_v50  ;;  %1100 = vperm.xlu2 %2394, %v746_v40   ;;  %v2922_v40 = vsel %vm961_vm13, 1.0, %v2607_v7 }
 0x1d6   : > { %996 = vperm.xlu0 %2405, %v748_v55   ;;  %807 = vperm.xlu1 %2398, %v748_v55  }
 0x1dd   : > { %2397 = vset.pattern.permute.xlu2 %v2594_v32 }
 0x1de   : > { %2407 = vset.pattern.permute.xlu0 %v2604_v53  ;;  %2399 = vset.pattern.permute.xlu1 %v2592_v30 }
 0x1df   : > { %1050 = vperm.xlu0 %2407, %v748_v55   ;;  %834 = vperm.xlu1 %2399, %v748_v55  }
 0x1e0   : > { %778 = vperm.xlu2 %2397, %v748_v55  }
 0x1e7   : > { %2416 = vset.pattern.permute.xlu0 %v2597_v44  ;;  %2403 = vset.pattern.permute.xlu1 %v2596_v43 }
 0x1e8   : > { %2401 = vset.pattern.permute.xlu2 %v2597_v44  ;;  %942 = vperm.xlu1 %2403, %v748_v55  }
 0x1e9   : > { %888 = vperm.xlu2 %2401, %v748_v55   ;;  %892 = vperm.xlu0 %2416, %v2841_v57  }
 0x1f0   : > { %2404 = vset.pattern.permute.xlu1 %v2598_v45 }
 0x1f1   : > { %2402 = vset.pattern.permute.xlu2 %v2600_v48  ;;  %2423 = vset.pattern.permute.xlu0 %v2603_v52 }
 0x1f2   : > { %969 = vperm.xlu1 %2404, %v748_v55   ;;  %915 = vperm.xlu2 %2402, %v748_v55  }
 0x1f3   : > { %1081 = vperm.xlu0 %2423, %v2841_v57  }
 0x1fa   : > { %2406 = vset.pattern.permute.xlu1 %v2599_v47  ;;  %2408 = vset.pattern.permute.xlu2 %v2603_v52 }
 0x1fb   : > { %2432 = vset.pattern.permute.xlu0 %v2600_v48  ;;  %1023 = vperm.xlu1 %2406, %v748_v55  }
 0x1fc   : > { %1077 = vperm.xlu2 %2408, %v748_v55   ;;  %923 = vperm.xlu0 %2432, %v2851_v59  }
 0x200   : > { %v831_v0 = vpop.permute.xlu2 %830 }
 0x201   : > { %v845_v21 = vmul.f32 %v2886_v15, %v831_v0 }
 0x203   : > { %2409 = vset.pattern.permute.xlu1 %v2606_v56 }
 0x204   : > { %2410 = vset.pattern.permute.xlu2 %v2605_v54  ;;  %2435 = vset.pattern.permute.xlu0 %v2601_v50 }
 0x205   : > { %1104 = vperm.xlu1 %2409, %v748_v55   ;;  %1131 = vperm.xlu2 %2410, %v748_v55  }
 0x206   : > { %1004 = vperm.xlu0 %2435, %v2851_v59  }
 0x209   : > { %v858_v4 = vpop.permute.xlu2 %857 }
 0x20a   : > { %v872_v25 = vmul.f32 %v2893_v22, %v858_v4 }
 0x20d   : > { %v2859_v1 = vpop.f32.mrf.mxu3  ;;  %2411 = vset.pattern.permute.xlu1 %v2602_v51  ;;  %2414 = vset.pattern.permute.xlu2 %v2592_v30 }
 0x20e   : > { %2440 = vset.pattern.permute.xlu0 %v2605_v54  ;;  %1158 = vperm.xlu1 %2411, %v748_v55  }
 0x20f   : > { %838 = vperm.xlu2 %2414, %v2841_v57   ;;  %1139 = vperm.xlu0 %2440, %v2851_v59  }
 0x213   : > { %v966_v18 = vpop.permute.xlu2 %965 }
 0x214   : > { %v980_v58 = vmul.f32 %v2922_v40, %v966_v18 }
 0x215   : > { %v1213_v5 = vpop.f32.mrf.mxu3  ;;  %v2869_v6 = vpop.f32.mrf.mxu2 }
 0x216   : > { %2412 = vset.pattern.permute.xlu1 %v2594_v32 }
 0x217   : > { %2417 = vset.pattern.permute.xlu2 %v2600_v48  ;;  %783 = vperm.xlu1 %2412, %v2841_v57  }
 0x218   : > { %919 = vperm.xlu2 %2417, %v2841_v57   ;;  %v804_v10 = vpop.permute.xlu0 %803  ;;  %2442 = vset.pattern.permute.xlu0 %v2602_v51 }
 0x219   : > { %v818_v11 = vmul.f32 %v2874_v8, %v804_v10  ;;  %v774_v12 = vpop.permute.xlu1 %773 }
 0x21a   : > { %v791_v16 = vmul.f32 %v2880_v9, %v774_v12 }
 0x21c   : > { %v822_v19 = vadd.f32 %v818_v11, %v791_v16  ;;  %v993_v33 = vpop.permute.xlu2 %992  ;;  %v2945_v11 = vsel %vm1069_vm5, 1.0, %v2607_v7 }
 0x21d   : > { %v1251_v20 = vpop.f32.mrf.mxu2 }
 0x21e   : > { %v849_v23 = vadd.f32 %v845_v21, %v822_v19  ;;  %v2952_v20 = vsel %vm1096_vm6, 1.0, %v2607_v7 }
 0x21f   : > { %2413 = vset.pattern.permute.xlu1 %v2593_v31 }
 0x220   : > { %2419 = vset.pattern.permute.xlu2 %v2598_v45  ;;  %811 = vperm.xlu1 %2413, %v2841_v57   ;;  %v876_v27 = vadd.f32 %v872_v25, %v849_v23  ;;  %v2959_v25 = vsel %vm1123_vm7, 1.0, %v2607_v7 }
 0x221   : > { %973 = vperm.xlu2 %2419, %v2841_v57  }
 0x222   : > { %v885_v26 = vpop.permute.xlu1 %884  ;;  %v939_v35 = vpop.permute.xlu0 %938 }
 0x223   : > { %v899_v28 = vmul.f32 %v2899_v24, %v885_v26  ;;  %v953_v48 = vmul.f32 %v2917_v37, %v939_v35 }
 0x225   : > { %v903_v29 = vadd.f32 %v899_v28, %v876_v27 }
 0x226   : > { %v1047_v55 = vpop.permute.xlu2 %1046 }
 0x227   : > { %v2904_v34 = vpop.f32.mrf.mxu0  ;;  %v1061_v12 = vmul.f32 %v2941_v2, %v1047_v55 }
 0x228   : > { %2415 = vset.pattern.permute.xlu1 %v2595_v42 }
 0x229   : > { %2420 = vset.pattern.permute.xlu2 %v2601_v50  ;;  %865 = vperm.xlu1 %2415, %v2841_v57   ;;  %v2927_v50 = vsel %vm988_vm14, 1.0, %v2607_v7 }
 0x22a   : > { %1000 = vperm.xlu2 %2420, %v2841_v57   ;;  %v1007_v63 = vmul.f32 %v2927_v50, %v993_v33 }
 0x22b   : > { %v1020_v62 = vpop.permute.xlu0 %1019 }
 0x22c   : > { %v912_v38 = vpop.permute.xlu1 %911  ;;  %v1034_v4 = vmul.f32 %v2933_v61, %v1020_v62 }
 0x22d   : > { %v926_v39 = vmul.f32 %v2913_v36, %v912_v38 }
 0x22f   : > { %v1232_v41 = vpop.f32.mrf.mxu0  ;;  %v930_v49 = vadd.f32 %v926_v39, %v903_v29  ;;  %v1101_v21 = vpop.permute.xlu2 %1100 }
 0x230   : > { %v1115_v26 = vmul.f32 %v2952_v20, %v1101_v21 }
 0x231   : > { %v957_v60 = vadd.f32 %v953_v48, %v930_v49  ;;  %2418 = vset.pattern.permute.xlu1 %v2596_v43 }
 0x232   : > { %2424 = vset.pattern.permute.xlu2 %v2606_v56  ;;  %946 = vperm.xlu1 %2418, %v2841_v57  }
 0x233   : > { %v984_v0 = vadd.f32 %v980_v58, %v957_v60  ;;  %1108 = vperm.xlu2 %2424, %v2841_v57  }
 0x235   : > { %v1011_v5 = vadd.f32 %v1007_v63, %v984_v0  ;;  %v1074_v10 = vpop.permute.xlu1 %1073 }
 0x236   : > { %v1088_v19 = vmul.f32 %v2945_v11, %v1074_v10 }
 0x237   : > { %v1038_v16 = vadd.f32 %v1034_v4, %v1011_v5 }
 0x239   : > { %v1065_v18 = vadd.f32 %v1061_v12, %v1038_v16 }
 0x23a   : > { %2421 = vset.pattern.permute.xlu1 %v2599_v47  ;;  %v779_v35 = vpop.permute.xlu2 %778 }
 0x23b   : > { %v1092_v23 = vadd.f32 %v1088_v19, %v1065_v18  ;;  %2425 = vset.pattern.permute.xlu2 %v2605_v54  ;;  %1027 = vperm.xlu1 %2421, %v2841_v57  }
 0x23c   : > { %1135 = vperm.xlu2 %2425, %v2841_v57  }
 0x23d   : > { %v1119_v28 = vadd.f32 %v1115_v26, %v1092_v23 }
 0x23e   : > { %v1128_v27 = vpop.permute.xlu1 %1127 }
 0x23f   : > { %v1142_v29 = vmul.f32 %v2959_v25, %v1128_v27 }
 0x241   : > { %v2963_v33 = vadd.f32 %v1142_v29, %v1119_v28 }
 0x243   : > { %2422 = vset.pattern.permute.xlu1 %v2604_v53  ;;  %v889_v38 = vpop.permute.xlu2 %888 }
 0x244   : > { %2427 = vset.pattern.permute.xlu2 %v2594_v32  ;;  %1054 = vperm.xlu1 %2422, %v2841_v57   ;;  %v900_v62 = vmul.f32 %v2899_v24, %v889_v38 }
 0x245   : > { %788 = vperm.xlu2 %2427, %v2851_v59  }
 0x248   : > { %v808_v54 = vpop.permute.xlu1 %807 }
 0x24c   : > { %2426 = vset.pattern.permute.xlu1 %v2602_v51  ;;  %v916_v32 = vpop.permute.xlu2 %915 }
 0x24d   : > { %2428 = vset.pattern.permute.xlu2 %v2593_v31  ;;  %1162 = vperm.xlu1 %2426, %v2841_v57   ;;  %v1155_v57 = vpop.permute.xlu0 %1154  ;;  %v927_v5 = vmul.f32 %v2913_v36, %v916_v32 }
 0x24e   : > { %815 = vperm.xlu2 %2428, %v2851_v59  }
 0x251   : > { %v835_v39 = vpop.permute.xlu1 %834 }
 0x255   : > { %2429 = vset.pattern.permute.xlu1 %v2592_v30  ;;  %v819_v30 = vmul.f32 %v2874_v8, %v808_v54  ;;  %v862_v58 = vpop.permute.xlu0 %861 }
 0x256   : > { %2430 = vset.pattern.permute.xlu2 %v2595_v42  ;;  %842 = vperm.xlu1 %2429, %v2851_v59   ;;  %v1078_v31 = vpop.permute.xlu2 %1077  ;;  %v792_v42 = vmul.f32 %v2880_v9, %v779_v35 }
 0x257   : > { %869 = vperm.xlu2 %2430, %v2851_v59  }
 0x258   : > { %v823_v49 = vadd.f32 %v819_v30, %v792_v42 }
 0x25a   : > { %v943_v41 = vpop.permute.xlu1 %942 }
 0x25d   : > { %v997_v10 = vpop.permute.xlu0 %996 }
 0x25e   : > { %2431 = vset.pattern.permute.xlu1 %v2597_v44  ;;  %v1008_v23 = vmul.f32 %v2927_v50, %v997_v10 }
 0x25f   : > { %2433 = vset.pattern.permute.xlu2 %v2596_v43  ;;  %896 = vperm.xlu1 %2431, %v2851_v59   ;;  %v846_v43 = vmul.f32 %v2886_v15, %v835_v39  ;;  %v1132_v44 = vpop.permute.xlu2 %1131 }
 0x260   : > { %950 = vperm.xlu2 %2433, %v2851_v59   ;;  %v1143_v30 = vmul.f32 %v2959_v25, %v1132_v44 }
 0x261   : > { %v850_v60 = vadd.f32 %v846_v43, %v823_v49 }
 0x264   : > { %v970_v48 = vpop.permute.xlu1 %969 }
 0x265   : > { %v981_v12 = vmul.f32 %v2922_v40, %v970_v48 }
 0x267   : > { %2434 = vset.pattern.permute.xlu1 %v2598_v45  ;;  %v873_v45 = vmul.f32 %v2893_v22, %v862_v58 }
 0x268   : > { %2436 = vset.pattern.permute.xlu2 %v2599_v47  ;;  %977 = vperm.xlu1 %2434, %v2851_v59  }
 0x269   : > { %1031 = vperm.xlu2 %2436, %v2851_v59   ;;  %v877_v47 = vadd.f32 %v873_v45, %v850_v60  ;;  %v839_v63 = vpop.permute.xlu2 %838 }
 0x26b   : > { %v904_v0 = vadd.f32 %v900_v62, %v877_v47 }
 0x26d   : > { %v1024_v55 = vpop.permute.xlu1 %1023 }
 0x270   : > { %2438 = vset.pattern.permute.xlu1 %v2603_v52  ;;  %v931_v52 = vadd.f32 %v927_v5, %v904_v0  ;;  %v847_v0 = vmul.f32 %v2886_v15, %v839_v63 }
 0x271   : > { %2437 = vset.pattern.permute.xlu2 %v2604_v53  ;;  %1085 = vperm.xlu1 %2438, %v2851_v59   ;;  %v954_v53 = vmul.f32 %v2917_v37, %v943_v41  ;;  %v3008_v41 = vsel %vm1150_vm8, 1.0, %v2607_v7 }
 0x272   : > { %1058 = vperm.xlu2 %2437, %v2851_v59   ;;  %v920_v18 = vpop.permute.xlu2 %919  ;;  %v1169_v49 = vmul.f32 %v3008_v41, %v1155_v57 }
 0x273   : > { %v958_v16 = vadd.f32 %v954_v53, %v931_v52 }
 0x275   : > { %v985_v21 = vadd.f32 %v981_v12, %v958_v16 }
 0x277   : > { %v1105_v4 = vpop.permute.xlu1 %1104  ;;  %v1012_v26 = vadd.f32 %v1008_v23, %v985_v21 }
 0x278   : > { %v1116_v38 = vmul.f32 %v2952_v20, %v1105_v4 }
 0x279   : > { %2439 = vset.pattern.permute.xlu1 %v2606_v56  ;;  %v1035_v56 = vmul.f32 %v2933_v61, %v1024_v55 }
 0x27a   : > { %2441 = vset.pattern.permute.xlu2 %v2602_v51  ;;  %1112 = vperm.xlu1 %2439, %v2851_v59   ;;  %v1051_v51 = vpop.permute.xlu0 %1050 }
 0x27b   : > { %1166 = vperm.xlu2 %2441, %v2851_v59   ;;  %v1039_v27 = vadd.f32 %v1035_v56, %v1012_v26  ;;  %v1062_v28 = vmul.f32 %v2941_v2, %v1051_v51  ;;  %v974_v35 = vpop.permute.xlu2 %973  ;;  %v1089_v59 = vmul.f32 %v2945_v11, %v1078_v31  ;;  %v1173_v31 = vadd.f32 %v1169_v49, %v2963_v33 }
 0x27c   : > { %v982_v51 = vmul.f32 %v2922_v40, %v974_v35 }
 0x27d   : > { %v1066_v54 = vadd.f32 %v1062_v28, %v1039_v27  ;;  %v1193_v47 = vadd.f32 %v2823_v46, %v1173_v31 }
 0x27f   : > { %v1093_v39 = vadd.f32 %v1089_v59, %v1066_v54  ;;  %v3022_v5 = vmul.f32 0.35355338, %v1193_v47 }
 0x280   : > { %v1159_v19 = vpop.permute.xlu1 %1158 }
 0x281   : > { %v1120_v32 = vadd.f32 %v1116_v38, %v1093_v39  ;;  %v1170_v42 = vmul.f32 %v3008_v41, %v1159_v19  ;;  %v928_v19 = vmul.f32 %v2913_v36, %v920_v18 }
 0x282   : > { %v893_v52 = vpop.permute.xlu0 %892 }
 0x283   : > { %v1147_v55 = vadd.f32 %v1143_v30, %v1120_v32  ;;  %v901_v63 = vmul.f32 %v2899_v24, %v893_v52 }
 0x284   : > { %v1001_v43 = vpop.permute.xlu2 %1000 }
 0x285   : > { %v1174_v58 = vadd.f32 %v1170_v42, %v1147_v55 }
 0x287   : > { %v1212_v7 = vadd.f32 %v2859_v1, %v1174_v58  ;;  %v1257_v1 = vsel %vm726_vm3, %v3022_v5, -inf }
 0x289   : > { %v784_v29 = vpop.permute.xlu1 %783  ;;  %v3020_v57 = vmul.f32 0.35355338, %v1212_v7 }
 0x28a   : > { %v793_v3 = vmul.f32 %v2880_v9, %v784_v29  ;;  %v1009_v29 = vmul.f32 %v2927_v50, %v1001_v43  ;;  %v1082_v38 = vpop.permute.xlu0 %1081 }
 0x28b   : > { %v1260_v10 = vsel %vm726_vm3, %v3020_v57, -inf  ;;  %v1090_v18 = vmul.f32 %v2945_v11, %v1082_v38 }
 0x28d   : > { %v1109_v44 = vpop.permute.xlu2 %1108 }
 0x28e   : > { %v1117_v42 = vmul.f32 %v2952_v20, %v1109_v44 }
 0x292   : > { %v812_v48 = vpop.permute.xlu1 %811 }
 0x293   : > { %v820_v60 = vmul.f32 %v2874_v8, %v812_v48 }
 0x295   : > { %v824_v62 = vadd.f32 %v820_v60, %v793_v3 }
 0x296   : > { %v1136_v16 = vpop.permute.xlu2 %1135 }
 0x297   : > { %v851_v33 = vadd.f32 %v847_v0, %v824_v62  ;;  %v1144_v35 = vmul.f32 %v2959_v25, %v1136_v16 }
 0x29b   : > { %v866_v45 = vpop.permute.xlu1 %865 }
 0x29c   : > { %v874_v4 = vmul.f32 %v2893_v22, %v866_v45 }
 0x29e   : > { %v878_v53 = vadd.f32 %v874_v4, %v851_v33 }
 0x29f   : > { %v789_v28 = vpop.permute.xlu2 %788 }
 0x2a0   : > { %v905_v12 = vadd.f32 %v901_v63, %v878_v53  ;;  %v794_v4 = vmul.f32 %v2880_v9, %v789_v28 }
 0x2a2   : > { %v932_v23 = vadd.f32 %v928_v19, %v905_v12 }
 0x2a4   : > { %1261 = vmax.xlane.f32.xlu2 %v1260_v10  ;;  %v947_v46 = vpop.permute.xlu1 %946  ;;  %1258 = vmax.xlane.f32.xlu1 %v1257_v1 }
 0x2a5   : > { %v955_v21 = vmul.f32 %v2917_v37, %v947_v46  ;;  %v924_v46 = vpop.permute.xlu0 %923 }
 0x2a6   : > { %v929_v19 = vmul.f32 %v2913_v36, %v924_v46 }
 0x2a7   : > { %v959_v56 = vadd.f32 %v955_v21, %v932_v23 }
 0x2a8   : > { %v816_v55 = vpop.permute.xlu2 %815 }
 0x2a9   : > { %v986_v27 = vadd.f32 %v982_v51, %v959_v56  ;;  %v821_v62 = vmul.f32 %v2874_v8, %v816_v55 }
 0x2ab   : > { %v1013_v59 = vadd.f32 %v1009_v29, %v986_v27  ;;  %v825_v52 = vadd.f32 %v821_v62, %v794_v4 }
 0x2ad   : > { %v1028_v26 = vpop.permute.xlu1 %1027  ;;  %v1005_v28 = vpop.permute.xlu0 %1004 }
 0x2ae   : > { %v1036_v54 = vmul.f32 %v2933_v61, %v1028_v26 }
 0x2b0   : > { %v1040_v32 = vadd.f32 %v1036_v54, %v1013_v59  ;;  %v1010_v54 = vmul.f32 %v2927_v50, %v1005_v28 }
 0x2b1   : > { %v870_v7 = vpop.permute.xlu2 %869 }
 0x2b2   : > { %v875_v10 = vmul.f32 %v2893_v22, %v870_v7 }
 0x2b6   : > { %v1055_v39 = vpop.permute.xlu1 %1054 }
 0x2b7   : > { %v1063_v48 = vmul.f32 %v2941_v2, %v1055_v39 }
 0x2b9   : > { %v1067_v30 = vadd.f32 %v1063_v48, %v1040_v32 }
 0x2ba   : > { %v951_v1 = vpop.permute.xlu2 %950 }
 0x2bb   : > { %v1094_v49 = vadd.f32 %v1090_v18, %v1067_v30  ;;  %v956_v23 = vmul.f32 %v2917_v37, %v951_v1 }
 0x2bd   : > { %v1121_v31 = vadd.f32 %v1117_v42, %v1094_v49  ;;  %v1140_v49 = vpop.permute.xlu0 %1139 }
 0x2bf   : > { %v1148_v58 = vadd.f32 %v1144_v35, %v1121_v31  ;;  %v1163_v43 = vpop.permute.xlu1 %1162 }
 0x2c0   : > { %v1171_v60 = vmul.f32 %v3008_v41, %v1163_v43  ;;  %v1145_v43 = vmul.f32 %v2959_v25, %v1140_v49 }
 0x2c2   : > { %v1175_v3 = vadd.f32 %v1171_v60, %v1148_v58 }
 0x2c3   : > { %v1032_v56 = vpop.permute.xlu2 %1031 }
 0x2c4   : > { %v1231_v45 = vadd.f32 %v2904_v34, %v1175_v3  ;;  %v1037_v38 = vmul.f32 %v2933_v61, %v1032_v56 }
 0x2c6   : > { %v3040_v47 = vmul.f32 0.35355338, %v1231_v45 }
 0x2c8   : > { %v843_v0 = vpop.permute.xlu1 %842  ;;  %v1263_v44 = vsel %vm726_vm3, %v3040_v47, -inf }
 0x2c9   : > { %1264 = vmax.xlane.f32.xlu0 %v1263_v44  ;;  %v848_v33 = vmul.f32 %v2886_v15, %v843_v0 }
 0x2cb   : > { %v852_v53 = vadd.f32 %v848_v33, %v825_v52 }
 0x2cc   : > { %v1059_v32 = vpop.permute.xlu2 %1058 }
 0x2cd   : > { %v879_v63 = vadd.f32 %v875_v10, %v852_v53  ;;  %v1064_v18 = vmul.f32 %v2941_v2, %v1059_v32 }
 0x2d1   : > { %v897_v34 = vpop.permute.xlu1 %896 }
 0x2d2   : > { %v902_v12 = vmul.f32 %v2899_v24, %v897_v34 }
 0x2d4   : > { %v906_v16 = vadd.f32 %v902_v12, %v879_v63 }
 0x2d5   : > { %v1167_v58 = vpop.permute.xlu2 %1166 }
 0x2d6   : > { %v933_v21 = vadd.f32 %v929_v19, %v906_v16  ;;  %v1172_v3 = vmul.f32 %v3008_v41, %v1167_v58 }
 0x2d8   : > { %v960_v51 = vadd.f32 %v956_v23, %v933_v21 }
 0x2da   : > { %v978_v26 = vpop.permute.xlu1 %977 }
 0x2db   : > { %v983_v27 = vmul.f32 %v2922_v40, %v978_v26 }
 0x2dd   : > { %v987_v29 = vadd.f32 %v983_v27, %v960_v51 }
 0x2df   : > { %v1014_v59 = vadd.f32 %v1010_v54, %v987_v29 }
 0x2e1   : > { %v1041_v48 = vadd.f32 %v1037_v38, %v1014_v59 }
 0x2e3   : > { %v1086_v39 = vpop.permute.xlu1 %1085  ;;  %v1068_v30 = vadd.f32 %v1064_v18, %v1041_v48 }
 0x2e4   : > { %v1091_v42 = vmul.f32 %v2945_v11, %v1086_v39 }
 0x2e6   : > { %v1095_v35 = vadd.f32 %v1091_v42, %v1068_v30 }
 0x2ec   : > { %v1113_v55 = vpop.permute.xlu1 %1112 }
 0x2ed   : > { %v1118_v31 = vmul.f32 %v2952_v20, %v1113_v55 }
 0x2ef   : > { %v1122_v60 = vadd.f32 %v1118_v31, %v1095_v35 }
 0x2f1   : > { %v1149_v45 = vadd.f32 %v1145_v43, %v1122_v60 }
 0x2f3   : > { %v1176_v7 = vadd.f32 %v1172_v3, %v1149_v45 }
 0x2f5   : > { %v1250_v62 = vadd.f32 %v2869_v6, %v1176_v7 }
 0x2f7   : > { %v1256_v0 = vmul.f32 0.35355338, %v1250_v62 }
 0x2f9   : > { %v1266_v44 = vsel %vm726_vm3, %v1256_v0, -inf }
 0x2fa   : > { %1267 = vmax.xlane.f32.xlu2 %v1266_v44 }
 0x317   : > { %v1262_v4 = vpop.xlane.xlu2 %1261  ;;  %v1259_v33 = vpop.xlane.xlu1 %1258 }
 0x318   : > { %v1270_v52 = vsub.f32 %v3020_v57, %v1262_v4  ;;  %v1269_v53 = vsub.f32 %v3022_v5, %v1259_v33 }
 0x31a   : > { %v1275_v10 = vmul.f32 1.442695, %v1270_v52  ;;  %v1273_v1 = vmul.f32 1.442695, %v1269_v53 }
 0x31c   : > { %2451 = vpow2.f32 %v1275_v10 }
 0x31d   : > { %2453 = vpow2.f32 %v1273_v1 }
 0x322   : > { %v2452_v34 = vpop.eup %2451 }
 0x323   : > { %v2454_v46 = vpop.eup %2453  ;;  %v1284_v63 = vsel %vm726_vm3, %v2452_v34, 0.0 }
 0x324   : > { %1285 = vadd.xlane.f32.xlu2 %v1284_v63  ;;  %v1281_v6 = vsel %vm726_vm3, %v2454_v46, 0.0 }
 0x325   : > { %1282 = vadd.xlane.f32.xlu1 %v1281_v6 }
 0x33c   : > { %v1265_v12 = vpop.xlane.xlu0 %1264 }
 0x33d   : > { %v1271_v16 = vsub.f32 %v3040_v47, %v1265_v12 }
 0x33f   : > { %v1277_v19 = vmul.f32 1.442695, %v1271_v16 }
 0x341   : > { %2455 = vpow2.f32 %v1277_v19 }
 0x347   : > { %v3066_v57 = vpop.eup %2455 }
 0x348   : > { %v1287_v5 = vsel %vm726_vm3, %v3066_v57, 0.0 }
 0x349   : > { %1288 = vadd.xlane.f32.xlu0 %v1287_v5 }
 0x36d   : > { %v1268_v21 = vpop.xlane.xlu2 %1267 }
 0x36e   : > { %v1272_v23 = vsub.f32 %v1256_v0, %v1268_v21 }
 0x370   : > { %v1279_v56 = vmul.f32 1.442695, %v1272_v23 }
 0x372   : > { %2457 = vpow2.f32 %v1279_v56 }
 0x378   : > { %v3070_v26 = vpop.eup %2457 }
 0x379   : > { %v1290_v51 = vsel %vm726_vm3, %v3070_v26, 0.0 }
 0x37a   : > { %1291 = vadd.xlane.f32.xlu1 %v1290_v51 }
 0x397   : > { %v1286_v47 = vpop.xlane.xlu2 %1285 }
 0x398   : > { %2459 = vrcp.f32 %v1286_v47  ;;  %v1283_v27 = vpop.xlane.xlu1 %1282  ;;  %v1319_v39 = vand.u32 2147483648, %v1286_v47  ;;  %v1317_v18 = vand.u32 2147483647, %v1286_v47  ;;  %vm1313_vm11 = vweird.f32 %v1286_v47 }
 0x399   : > { %2461 = vrcp.f32 %v1283_v27  ;;  %v1304_v30 = vand.u32 2147483648, %v1283_v27  ;;  %v1302_v49 = vand.u32 2147483647, %v1283_v27  ;;  %vm1298_vm13 = vweird.f32 %v1283_v27 }
 0x39a   : > { %v1320_v35 = vor.u32 1.1754944e-38, %v1319_v39  ;;  %vm1318_vm14 = vcmp.eq.f32.partialorder %v1317_v18, 8.507059e+37 }
 0x39b   : > { %v1305_v43 = vor.u32 1.1754944e-38, %v1304_v30  ;;  %vm1303_vm4 = vcmp.eq.f32.partialorder %v1302_v49, 8.507059e+37 }
 0x39e   : > { %v2460_v28 = vpop.eup %2459 }
 0x39f   : > { %v2462_v29 = vpop.eup %2461  ;;  %v1309_v54 = vmul.f32 %v2460_v28, %v1286_v47  ;;  %vm1314_vm9 = vweird.f32 %v2460_v28 }
 0x3a0   : > { %v1294_v59 = vmul.f32 %v2462_v29, %v1283_v27  ;;  %vm1299_vm10 = vweird.f32 %v2462_v29  ;;  %vm1315_vm12 = vmor %vm1313_vm11, %vm1314_vm9 }
 0x3a1   : > { %v1310_v38 = vsub.f32 1.0, %v1309_v54  ;;  %vm1300_vm15 = vmor %vm1298_vm13, %vm1299_vm10  ;;  %vm1605_vm13 = vcmask 7168  }
 0x3a2   : > { %v1295_v32 = vsub.f32 1.0, %v1294_v59 }
 0x3a3   : > { %v1311_v48 = vmul.f32 %v2460_v28, %v1310_v38 }
 0x3a4   : > { %v1296_v42 = vmul.f32 %v2462_v29, %v1295_v32 }
 0x3a5   : > { %v1312_v55 = vadd.f32 %v2460_v28, %v1311_v48 }
 0x3a6   : > { %v1297_v31 = vadd.f32 %v2462_v29, %v1296_v42 }
 0x3a7   : > { %v1316_v58 = vsel %vm1315_vm12, %v2460_v28, %v1312_v55 }
 0x3a8   : > { %v1321_v60 = vsel %vm1318_vm14, %v1320_v35, %v1316_v58  ;;  %v1301_v3 = vsel %vm1300_vm15, %v2462_v29, %v1297_v31  ;;  %vm1610_vm14 = vcmask 15360   ;;  %vm1690_vm15 = vcmask 1046528  }
 0x3a9   : > { %v3078_v45 = vmul.f32 %v2452_v34, %v1321_v60  ;;  %v1306_v7 = vsel %vm1303_vm4, %v1305_v43, %v1301_v3  ;;  %vm1691_vm4 = vcmask 1047552  }
 0x3aa   : > { %v1353_v62 = vmul.f32 %v2454_v46, %v1306_v7 }
 0x3ab   : > { %1358 = vst.msk [vmem:[%s3080_s30 + $0x8] sm:$0xff] %vm726_vm3, %v3078_v45 }
 0x3ac   : > { %v1361_v0 = vpack.c.bf16 %v1353_v62, %v1353_v62  ;;  %v1397_v44 = vmul.f32 %v2886_v15, %v1353_v62  ;;  %v1381_v4 = vmul.f32 %v2874_v8, %v1353_v62  ;;  %v1365_v33 = vmul.f32 %v2880_v9, %v1353_v62  ;;  %1357 = vst.msk [vmem:[%s3080_s30] sm:$0xff] %vm726_vm3, %v1353_v62 }
 0x3ad   : > { %v1445_v1 = vmul.f32 %v2913_v36, %v1353_v62  ;;  %v1429_v34 = vmul.f32 %v2899_v24, %v1353_v62  ;;  %v1413_v46 = vmul.f32 %v2893_v22, %v1353_v62  ;;  %v1493_v16 = vmul.f32 %v2927_v50, %v1353_v62 }
 0x3ae   : > { %2235 = vmatmul.msk.bf16.vlgmr.msrb.gmra.mxu1 %vm726_vm3, %v1361_v0  ;;  %v1401_v52 = vsel %vm726_vm3, %v1397_v44, 0.0  ;;  %v1385_v53 = vsel %vm726_vm3, %v1381_v4, 0.0  ;;  %v1369_v10 = vsel %vm726_vm3, %v1365_v33, 0.0  ;;  %v1477_v19 = vmul.f32 %v2922_v40, %v1353_v62 }
 0x3af   : > { %1402 = vadd.xlane.f32.xlu0 %v1401_v52  ;;  %1386 = vadd.xlane.f32.xlu1 %v1385_v53  ;;  %v1449_v63 = vsel %vm726_vm3, %v1445_v1, 0.0  ;;  %v1433_v6 = vsel %vm726_vm3, %v1429_v34, 0.0  ;;  %v1417_v12 = vsel %vm726_vm3, %v1413_v46, 0.0  ;;  %v1461_v5 = vmul.f32 %v2917_v37, %v1353_v62 }
 0x3b0   : > { %1370 = vadd.xlane.f32.xlu2 %v1369_v10  ;;  %v1497_v23 = vsel %vm726_vm3, %v1493_v16, 0.0  ;;  %v1481_v56 = vsel %vm726_vm3, %v1477_v19, 0.0  ;;  %v1541_v47 = vmul.f32 %v2945_v11, %v1353_v62  ;;  %v1525_v27 = vmul.f32 %v2941_v2, %v1353_v62 }
 0x3b1   : > { %v1465_v51 = vsel %vm726_vm3, %v1461_v5, 0.0  ;;  %v1509_v29 = vmul.f32 %v2933_v61, %v1353_v62  ;;  %v1589_v49 = vmul.f32 %v3008_v41, %v1353_v62  ;;  %v1573_v55 = vmul.f32 %v2959_v25, %v1353_v62 }
 0x3b2   : > { %v1545_v38 = vsel %vm726_vm3, %v1541_v47, 0.0  ;;  %v1529_v39 = vsel %vm726_vm3, %v1525_v27, 0.0  ;;  %v1557_v31 = vmul.f32 %v2952_v20, %v1353_v62  ;;  %v1366_v62 = vmul.f32 %v2880_v9, %v3078_v45 }
 0x3b3   : > { %v1513_v48 = vsel %vm726_vm3, %v1509_v29, 0.0  ;;  %v1593_v3 = vsel %vm726_vm3, %v1589_v49, 0.0  ;;  %v1577_v7 = vsel %vm726_vm3, %v1573_v55, 0.0  ;;  %v1398_v44 = vmul.f32 %v2886_v15, %v3078_v45 }
 0x3b4   : > { %v1561_v0 = vsel %vm726_vm3, %v1557_v31, 0.0  ;;  %v1372_v4 = vsel %vm726_vm3, %v1366_v62, 0.0  ;;  %v1414_v53 = vmul.f32 %v2893_v22, %v3078_v45  ;;  %v1446_v10 = vmul.f32 %v2913_v36, %v3078_v45 }
 0x3b5   : > { %v1404_v33 = vsel %vm726_vm3, %v1398_v44, 0.0  ;;  %v1430_v1 = vmul.f32 %v2899_v24, %v3078_v45  ;;  %v1478_v16 = vmul.f32 %v2922_v40, %v3078_v45 }
 0x3b6   : > { %v1420_v34 = vsel %vm726_vm3, %v1414_v53, 0.0  ;;  %v1452_v46 = vsel %vm726_vm3, %v1446_v10, 0.0 }
 0x3b7   : > { %1450 = vadd.xlane.f32.xlu0 %v1449_v63  ;;  %1434 = vadd.xlane.f32.xlu1 %v1433_v6  ;;  %v1436_v63 = vsel %vm726_vm3, %v1430_v1, 0.0  ;;  %v1462_v6 = vmul.f32 %v2917_v37, %v3078_v45 }
 0x3b8   : > { %1418 = vadd.xlane.f32.xlu2 %v1417_v12  ;;  %v1494_v12 = vmul.f32 %v2927_v50, %v3078_v45 }
 0x3b9   : > { %v1468_v19 = vsel %vm726_vm3, %v1462_v6, 0.0 }
 0x3ba   : > { %v1500_v5 = vsel %vm726_vm3, %v1494_v12, 0.0 }
 0x3bc   : > { %v1289_v21 = vpop.xlane.xlu0 %1288 }
 0x3bd   : > { %2463 = vrcp.f32 %v1289_v21  ;;  %v1334_v32 = vand.u32 2147483648, %v1289_v21  ;;  %v1332_v30 = vand.u32 2147483647, %v1289_v21  ;;  %vm1328_vm6 = vweird.f32 %v1289_v21 }
 0x3bf   : > { %1498 = vadd.xlane.f32.xlu0 %v1497_v23  ;;  %1482 = vadd.xlane.f32.xlu1 %v1481_v56  ;;  %v1335_v35 = vor.u32 1.1754944e-38, %v1334_v32  ;;  %vm1333_vm8 = vcmp.eq.f32.partialorder %v1332_v30, 8.507059e+37  ;;  %v1510_v23 = vmul.f32 %v2933_v61, %v3078_v45  ;;  %v1542_v56 = vmul.f32 %v2945_v11, %v3078_v45 }
 0x3c0   : > { %1466 = vadd.xlane.f32.xlu2 %v1465_v51  ;;  %v1526_v51 = vmul.f32 %v2941_v2, %v3078_v45 }
 0x3c1   : > { %v1516_v27 = vsel %vm726_vm3, %v1510_v23, 0.0 }
 0x3c2   : > { %v1532_v29 = vsel %vm726_vm3, %v1526_v51, 0.0 }
 0x3c3   : > { %v2464_v28 = vpop.eup %2463 }
 0x3c4   : > { %v1324_v54 = vmul.f32 %v2464_v28, %v1289_v21  ;;  %vm1329_vm5 = vweird.f32 %v2464_v28  ;;  %v1484_v21 = vsel %vm726_vm3, %v1478_v16, 0.0 }
 0x3c5   : > { %vm1330_vm7 = vmor %vm1328_vm6, %vm1329_vm5  ;;  %vm1615_vm5 = vcmask 23552   ;;  %vm1620_vm6 = vcmask 31744  }
 0x3c6   : > { %v1325_v59 = vsub.f32 1.0, %v1324_v54  ;;  %v1558_v54 = vmul.f32 %v2952_v20, %v3078_v45 }
 0x3c7   : > { %1546 = vadd.xlane.f32.xlu0 %v1545_v38  ;;  %1530 = vadd.xlane.f32.xlu1 %v1529_v39  ;;  %v1574_v38 = vmul.f32 %v2959_v25, %v3078_v45 }
 0x3c8   : > { %v1326_v18 = vmul.f32 %v2464_v28, %v1325_v59  ;;  %1514 = vadd.xlane.f32.xlu2 %v1513_v48  ;;  %v1590_v59 = vmul.f32 %v3008_v41, %v3078_v45  ;;  %v1564_v48 = vsel %vm726_vm3, %v1558_v54, 0.0 }
 0x3ca   : > { %v1327_v42 = vadd.f32 %v2464_v28, %v1326_v18  ;;  %v1596_v18 = vsel %vm726_vm3, %v1590_v59, 0.0 }
 0x3cc   : > { %v1331_v58 = vsel %vm1330_vm7, %v2464_v28, %v1327_v42  ;;  %v1548_v28 = vsel %vm726_vm3, %v1542_v56, 0.0  ;;  %v1580_v42 = vsel %vm726_vm3, %v1574_v38, 0.0  ;;  %vm1625_vm7 = vcmask 39936  }
 0x3cd   : > { %v1336_v43 = vsel %vm1333_vm8, %v1335_v35, %v1331_v58  ;;  %vm1630_vm8 = vcmask 48128  }
 0x3ce   : > { %v3116_v60 = vmul.f32 %v3066_v57, %v1336_v43  ;;  %v1382_v57 = vmul.f32 %v2874_v8, %v3078_v45 }
 0x3cf   : > { %1594 = vadd.xlane.f32.xlu0 %v1593_v3  ;;  %1578 = vadd.xlane.f32.xlu1 %v1577_v7 }
 0x3d0   : > { %1562 = vadd.xlane.f32.xlu2 %v1561_v0  ;;  %1359 = vst.msk [vmem:[%s3080_s30 + $0x10] sm:$0xff] %vm726_vm3, %v3116_v60  ;;  %v1388_v52 = vsel %vm726_vm3, %v1382_v57, 0.0  ;;  %v1399_v31 = vmul.f32 %v2886_v15, %v3116_v60  ;;  %v1383_v58 = vmul.f32 %v2874_v8, %v3116_v60  ;;  %v1367_v3 = vmul.f32 %v2880_v9, %v3116_v60 }
 0x3d1   : > { %v1479_v53 = vmul.f32 %v2922_v40, %v3116_v60  ;;  %v1415_v10 = vmul.f32 %v2893_v22, %v3116_v60  ;;  %v1431_v6 = vmul.f32 %v2899_v24, %v3116_v60 }
 0x3d2   : > { %v1407_v44 = vsel %vm726_vm3, %v1399_v31, 0.0  ;;  %v1391_v57 = vsel %vm726_vm3, %v1383_v58, 0.0 }
 0x3d3   : > { %v1487_v1 = vsel %vm726_vm3, %v1479_v53, 0.0 }
 0x3d7   : > { %1373 = vadd.xlane.f32.xlu0 %v1372_v4  ;;  %1405 = vadd.xlane.f32.xlu1 %v1404_v33  ;;  %v1375_v33 = vsel %vm726_vm3, %v1367_v3, 0.0 }
 0x3d8   : > { %1389 = vadd.xlane.f32.xlu2 %v1388_v52  ;;  %v1495_v52 = vmul.f32 %v2927_v50, %v3116_v60 }
 0x3df   : > { %1421 = vadd.xlane.f32.xlu0 %v1420_v34  ;;  %1453 = vadd.xlane.f32.xlu1 %v1452_v46  ;;  %v1423_v34 = vsel %vm726_vm3, %v1415_v10, 0.0  ;;  %v1511_v46 = vmul.f32 %v2933_v61, %v3116_v60 }
 0x3e0   : > { %1437 = vadd.xlane.f32.xlu2 %v1436_v63 }
 0x3e1   : > { %v1519_v12 = vsel %vm726_vm3, %v1511_v46, 0.0 }
 0x3e7   : > { %1469 = vadd.xlane.f32.xlu0 %v1468_v19  ;;  %1501 = vadd.xlane.f32.xlu1 %v1500_v5  ;;  %v1439_v19 = vsel %vm726_vm3, %v1431_v6, 0.0  ;;  %v1527_v5 = vmul.f32 %v2941_v2, %v3116_v60 }
 0x3e8   : > { %1485 = vadd.xlane.f32.xlu2 %v1484_v21 }
 0x3e9   : > { %v1535_v23 = vsel %vm726_vm3, %v1527_v5, 0.0 }
 0x3ed   : > { %v1292_v47 = vpop.xlane.xlu1 %1291 }
 0x3ee   : > { %2465 = vrcp.f32 %v1292_v47  ;;  %v1349_v49 = vand.u32 2147483648, %v1292_v47  ;;  %v1347_v35 = vand.u32 2147483647, %v1292_v47  ;;  %vm1343_vm10 = vweird.f32 %v1292_v47 }
 0x3ef   : > { %1517 = vadd.xlane.f32.xlu0 %v1516_v27  ;;  %1549 = vadd.xlane.f32.xlu1 %v1548_v28  ;;  %v1463_v28 = vmul.f32 %v2917_v37, %v3116_v60 }
 0x3f0   : > { %1533 = vadd.xlane.f32.xlu2 %v1532_v29  ;;  %v1350_v7 = vor.u32 1.1754944e-38, %v1349_v49  ;;  %vm1348_vm12 = vcmp.eq.f32.partialorder %v1347_v35, 8.507059e+37 }
 0x3f1   : > { %v1471_v59 = vsel %vm726_vm3, %v1463_v28, 0.0 }
 0x3f4   : > { %v2466_v39 = vpop.eup %2465 }
 0x3f5   : > { %v1339_v32 = vmul.f32 %v2466_v39, %v1292_v47  ;;  %vm1344_vm9 = vweird.f32 %v2466_v39  ;;  %v1543_v47 = vmul.f32 %v2945_v11, %v3116_v60 }
 0x3f6   : > { %vm1345_vm11 = vmor %vm1343_vm10, %vm1344_vm9  ;;  %vm1635_vm9 = vcmask 56320   ;;  %vm1644_vm10 = vcmask 72704  }
 0x3f7   : > { %v1340_v30 = vsub.f32 1.0, %v1339_v32  ;;  %1565 = vadd.xlane.f32.xlu0 %v1564_v48  ;;  %1597 = vadd.xlane.f32.xlu1 %v1596_v18  ;;  %v1551_v29 = vsel %vm726_vm3, %v1543_v47, 0.0  ;;  %v1559_v32 = vmul.f32 %v2952_v20, %v3116_v60 }
 0x3f8   : > { %1581 = vadd.xlane.f32.xlu2 %v1580_v42 }
 0x3f9   : > { %v1341_v55 = vmul.f32 %v2466_v39, %v1340_v30  ;;  %v1567_v42 = vsel %vm726_vm3, %v1559_v32, 0.0 }
 0x3fb   : > { %v1342_v43 = vadd.f32 %v2466_v39, %v1341_v55 }
 0x3fd   : > { %v1346_v0 = vsel %vm1345_vm11, %v2466_v39, %v1342_v43  ;;  %vm1649_vm11 = vcmask 80896  }
 0x3fe   : > { %v1351_v62 = vsel %vm1348_vm12, %v1350_v7, %v1346_v0  ;;  %vm1654_vm12 = vcmask 89088  }
 0x3ff   : > { %v3178_v4 = vmul.f32 %v3070_v26, %v1351_v62  ;;  %1408 = vadd.xlane.f32.xlu0 %v1407_v44  ;;  %1392 = vadd.xlane.f32.xlu1 %v1391_v57  ;;  %v1503_v26 = vsel %vm726_vm3, %v1495_v52, 0.0 }
 0x400   : > { %1376 = vadd.xlane.f32.xlu2 %v1375_v33 }
 0x401   : > { %1360 = vst.msk [vmem:[%s3080_s30 + $0x18] sm:$0xff] %vm726_vm3, %v3178_v4  ;;  %v1400_v63 = vmul.f32 %v2886_v15, %v3178_v4  ;;  %v1560_v21 = vmul.f32 %v2952_v20, %v3178_v4  ;;  %v1447_v15 = vmul.f32 %v2913_v36, %v3116_v60  ;;  %v1576_v27 = vmul.f32 %v2959_v25, %v3178_v4  ;;  %s2495_s30 = scalar_lea.hbm %s3523_s17, 64 }
 0x402   : > { %v1592_v48 = vmul.f32 %v3008_v41, %v3178_v4  ;;  %v1384_v30 = vmul.f32 %v2874_v8, %v3178_v4  ;;  %v1368_v20 = vmul.f32 %v2880_v9, %v3178_v4  ;;  %v1480_v8 = vmul.f32 %v2922_v40, %v3178_v4 }
 0x403   : > { %v1410_v16 = vsel %vm726_vm3, %v1400_v63, 0.0  ;;  %v1570_v56 = vsel %vm726_vm3, %v1560_v21, 0.0  ;;  %v1455_v51 = vsel %vm726_vm3, %v1447_v15, 0.0  ;;  %v1586_v54 = vsel %vm726_vm3, %v1576_v27, 0.0 }
 0x404   : > { %v1602_v49 = vsel %vm726_vm3, %v1592_v48, 0.0  ;;  %v1394_v55 = vsel %vm726_vm3, %v1384_v30, 0.0  ;;  %v1378_v3 = vsel %vm726_vm3, %v1368_v20, 0.0  ;;  %v1490_v7 = vsel %vm726_vm3, %v1480_v8, 0.0 }
 0x405   : > { %v1416_v44 = vmul.f32 %v2893_v22, %v3178_v4  ;;  %v1496_v33 = vmul.f32 %v2927_v50, %v3178_v4  ;;  %v1591_v20 = vmul.f32 %v3008_v41, %v3116_v60 }
 0x407   : > { %1504 = vadd.xlane.f32.xlu0 %v1503_v26  ;;  %1488 = vadd.xlane.f32.xlu1 %v1487_v1  ;;  %v1426_v40 = vsel %vm726_vm3, %v1416_v44, 0.0  ;;  %v1506_v52 = vsel %vm726_vm3, %v1496_v33, 0.0  ;;  %v1432_v26 = vmul.f32 %v2899_v24, %v3178_v4  ;;  %v1512_v1 = vmul.f32 %v2933_v61, %v3178_v4 }
 0x408   : > { %1424 = vadd.xlane.f32.xlu2 %v1423_v34  ;;  %v1448_v24 = vmul.f32 %v2913_v36, %v3178_v4  ;;  %v1528_v61 = vmul.f32 %v2941_v2, %v3178_v4  ;;  %v1544_v36 = vmul.f32 %v2945_v11, %v3178_v4 }
 0x409   : > { %v1442_v50 = vsel %vm726_vm3, %v1432_v26, 0.0  ;;  %v1522_v34 = vsel %vm726_vm3, %v1512_v1, 0.0 }
 0x40f   : > { %1520 = vadd.xlane.f32.xlu0 %v1519_v12  ;;  %1411 = vadd.xlane.f32.xlu1 %v1410_v16  ;;  %v1458_v12 = vsel %vm726_vm3, %v1448_v24, 0.0  ;;  %v1538_v16 = vsel %vm726_vm3, %v1528_v61, 0.0 }
 0x410   : > { %1440 = vadd.xlane.f32.xlu2 %v1439_v19 }
 0x417   : > { %1536 = vadd.xlane.f32.xlu0 %v1535_v23  ;;  %1571 = vadd.xlane.f32.xlu1 %v1570_v56  ;;  %v2285_v23 = vld [vmem:[%s3551_s5] sm:$0xff]  ;;  %v2608_v56 = vmov 65535  }
 0x418   : > { %1456 = vadd.xlane.f32.xlu2 %v1455_v51  ;;  %v1692_v51 = vsel %vm1690_vm15, 4294967295, %v2608_v56  ;;  %vm1659_vm15 = vcmask 97280  }
 0x419   : > { %v1693_v47 = vsel %vm1691_vm4, %v1692_v51, 0  ;;  %vm1664_vm4 = vcmask 105472  }
 0x41a   : > { %v1695_v27 = vand.u32 %v2285_v23, %v1693_v47 }
 0x41c   : > { %1704 = vmatpush.bf16.msrb.mxu3 %v1695_v27 }
 0x41f   : > { %1552 = vadd.xlane.f32.xlu0 %v1551_v29  ;;  %1587 = vadd.xlane.f32.xlu1 %v1586_v54 }
 0x420   : > { %1472 = vadd.xlane.f32.xlu2 %v1471_v59 }
 0x422   : > { %v3220_v38 = vpop.xlane.xlu0 %1402  ;;  %v1387_v39 = vpop.xlane.xlu1 %1386 }
 0x423   : > { %v1371_v18 = vpop.xlane.xlu2 %1370 }
 0x424   : > { %v1606_v2 = vsel %vm1605_vm13, %v1371_v18, %v1387_v39  ;;  %v1575_v39 = vmul.f32 %v2959_v25, %v3116_v60 }
 0x425   : > { %v1611_v11 = vsel %vm1610_vm14, %v1606_v2, %v3220_v38 }
 0x426   : > { %v1583_v30 = vsel %vm726_vm3, %v1575_v39, 0.0 }
 0x427   : > { %1568 = vadd.xlane.f32.xlu0 %v1567_v42  ;;  %1603 = vadd.xlane.f32.xlu1 %v1602_v49 }
 0x428   : > { %1395 = vadd.xlane.f32.xlu2 %v1394_v55 }
 0x42a   : > { %v3231_v35 = vpop.xlane.xlu0 %1450  ;;  %v3233_v31 = vpop.xlane.xlu1 %1434 }
 0x42b   : > { %v1419_v58 = vpop.xlane.xlu2 %1418  ;;  %v3237_v43 = vpop.f32.mrf.mxu1 }
 0x42c   : > { %v1616_v28 = vsel %vm1615_vm5, %v1611_v11, %v1419_v58 }
 0x42d   : > { %v1621_v48 = vsel %vm1620_vm6, %v1616_v28, %v3233_v31 }
 0x42e   : > { %v1626_v42 = vsel %vm1625_vm7, %v1621_v48, %v3231_v35 }
 0x42f   : > { %1379 = vadd.xlane.f32.xlu0 %v1378_v3 }
 0x430   : > { %1491 = vadd.xlane.f32.xlu2 %v1490_v7  ;;  %v1599_v7 = vsel %vm726_vm3, %v1591_v20, 0.0 }
 0x432   : > { %v3243_v0 = vpop.xlane.xlu0 %1498  ;;  %v3245_v62 = vpop.xlane.xlu1 %1482 }
 0x433   : > { %v3249_v9 = vpop.xlane.xlu2 %1466  ;;  %v1733_v57 = vpop.f32.mrf.mxu1 }
 0x434   : > { %v1631_v25 = vsel %vm1630_vm8, %v1626_v42, %v3249_v9 }
 0x435   : > { %v1636_v8 = vsel %vm1635_vm9, %v1631_v25, %v3245_v62 }
 0x436   : > { %v1640_v44 = vsel %vm726_vm3, %v1636_v8, %v3243_v0 }
 0x437   : > { %1427 = vadd.xlane.f32.xlu0 %v1426_v40 }
 0x438   : > { %1507 = vadd.xlane.f32.xlu2 %v1506_v52 }
 0x43a   : > { %v3255_v53 = vpop.xlane.xlu0 %1546  ;;  %v3257_v10 = vpop.xlane.xlu1 %1530 }
 0x43b   : > { %v3261_v22 = vpop.xlane.xlu2 %1514 }
 0x43c   : > { %v1645_v9 = vsel %vm1644_vm10, %v1640_v44, %v3261_v22 }
 0x43d   : > { %v1650_v62 = vsel %vm1649_vm11, %v1645_v9, %v3257_v10 }
 0x43e   : > { %v1655_v0 = vsel %vm1654_vm12, %v1650_v62, %v3255_v53 }
 0x43f   : > { %1443 = vadd.xlane.f32.xlu0 %v1442_v50 }
 0x440   : > { %1523 = vadd.xlane.f32.xlu2 %v1522_v34  ;;  %688 = vrot.lane.b32.xlu1 %v2785_v13, %s2591_s21  ;;  %v1464_v13 = vmul.f32 %v2917_v37, %v3178_v4  ;;  %v1554_v37 = vsel %vm726_vm3, %v1544_v36, 0.0 }
 0x442   : > { %v3269_v46 = vpop.xlane.xlu0 %1594  ;;  %v3271_v63 = vpop.xlane.xlu1 %1578  ;;  %v1474_v15 = vsel %vm726_vm3, %v1464_v13, 0.0 }
 0x443   : > { %v3275_v6 = vpop.xlane.xlu2 %1562 }
 0x444   : > { %v1660_v22 = vsel %vm1659_vm15, %v1655_v0, %v3275_v6 }
 0x445   : > { %v1665_v10 = vsel %vm1664_vm4, %v1660_v22, %v3271_v63 }
 0x446   : > { %v1670_v6 = vsel %vm1669_vm0, %v1665_v10, %v3269_v46 }
 0x447   : > { %1459 = vadd.xlane.f32.xlu0 %v1458_v12 }
 0x448   : > { %1539 = vadd.xlane.f32.xlu2 %v1538_v16 }
 0x44a   : > { %v1374_v19 = vpop.xlane.xlu0 %1373  ;;  %v1406_v5 = vpop.xlane.xlu1 %1405 }
 0x44b   : > { %v1390_v21 = vpop.xlane.xlu2 %1389 }
 0x44c   : > { %v1607_v29 = vsel %vm1605_vm13, %v1374_v19, %v1390_v21 }
 0x44d   : > { %v1612_v18 = vsel %vm1610_vm14, %v1607_v29, %v1406_v5 }
 0x44f   : > { %1475 = vadd.xlane.f32.xlu0 %v1474_v15 }
 0x450   : > { %1555 = vadd.xlane.f32.xlu2 %v1554_v37 }
 0x452   : > { %v1422_v54 = vpop.xlane.xlu0 %1421  ;;  %v1454_v59 = vpop.xlane.xlu1 %1453 }
 0x453   : > { %v1438_v32 = vpop.xlane.xlu2 %1437  ;;  %v1617_v38 = vsel %vm1615_vm5, %v1612_v18, %v1422_v54 }
 0x454   : > { %v1622_v49 = vsel %vm1620_vm6, %v1617_v38, %v1438_v32 }
 0x455   : > { %v1627_v3 = vsel %vm1625_vm7, %v1622_v49, %v1454_v59 }
 0x457   : > { %1584 = vadd.xlane.f32.xlu0 %v1583_v30 }
 0x45a   : > { %v1470_v55 = vpop.xlane.xlu0 %1469  ;;  %v1502_v31 = vpop.xlane.xlu1 %1501 }
 0x45b   : > { %v1486_v58 = vpop.xlane.xlu2 %1485  ;;  %v1632_v35 = vsel %vm1630_vm8, %v1627_v3, %v1470_v55 }
 0x45c   : > { %v1637_v41 = vsel %vm1635_vm9, %v1632_v35, %v1486_v58 }
 0x45d   : > { %v1641_v40 = vsel %vm726_vm3, %v1637_v41, %v1502_v31  ;;  %v1364_v41 = vpack.c.bf16 %v3178_v4, %v3178_v4 }
 0x45f   : > { %1600 = vadd.xlane.f32.xlu0 %v1599_v7 }
 0x462   : > { %v1518_v57 = vpop.xlane.xlu0 %1517  ;;  %v1550_v33 = vpop.xlane.xlu1 %1549 }
 0x463   : > { %v1534_v52 = vpop.xlane.xlu2 %1533  ;;  %v1646_v26 = vsel %vm1644_vm10, %v1641_v40, %v1518_v57 }
 0x464   : > { %v1651_v1 = vsel %vm1649_vm11, %v1646_v26, %v1534_v52 }
 0x465   : > { %v1656_v50 = vsel %vm1654_vm12, %v1651_v1, %v1550_v33 }
 0x468   : > { %686 = vrot.lane.b32.xlu2 %v2794_v17, %s2591_s21 }
 0x46a   : > { %v1566_v34 = vpop.xlane.xlu0 %1565  ;;  %v1598_v24 = vpop.xlane.xlu1 %1597 }
 0x46b   : > { %v1661_v61 = vsel %vm1659_vm15, %v1656_v50, %v1566_v34  ;;  %v1582_v53 = vpop.xlane.xlu2 %1581 }
 0x46c   : > { %v1666_v12 = vsel %vm1664_vm4, %v1661_v61, %v1582_v53 }
 0x46d   : > { %v1671_v16 = vsel %vm1669_vm0, %v1666_v12, %v1598_v24 }
 0x46e   : > { %v1674_v17 = vpack.c.bf16 %v1671_v16, %v1670_v6 }
 0x470   : > { %2233 = vmatmul.msk.bf16.vlgmr.msrb.gmra.mxu3 %vm3530_vm2, %v1674_v17  ;;  %vm3552_vm2 = vcmask 1043456  }
 0x472   : > { %v1409_v63 = vpop.xlane.xlu0 %1408  ;;  %v1393_v13 = vpop.xlane.xlu1 %1392 }
 0x473   : > { %v1377_v19 = vpop.xlane.xlu2 %1376  ;;  %684 = vrot.lane.b32.xlu0 %v2787_v14, %s2591_s21  ;;  %s2609_s21 = smov 24  }
 0x474   : > { %v1608_v5 = vsel %vm1605_vm13, %v1377_v19, %v1393_v13 }
 0x475   : > { %v1613_v21 = vsel %vm1610_vm14, %v1608_v5, %v1409_v63 }
 0x47a   : > { %v1505_v36 = vpop.xlane.xlu0 %1504  ;;  %v1489_v2 = vpop.xlane.xlu1 %1488 }
 0x47b   : > { %v1425_v15 = vpop.xlane.xlu2 %1424 }
 0x47c   : > { %v1618_v46 = vsel %vm1615_vm5, %v1613_v21, %v1425_v15 }
 0x482   : > { %v1521_v23 = vpop.xlane.xlu0 %1520  ;;  %v1412_v11 = vpop.xlane.xlu1 %1411 }
 0x483   : > { %v1441_v37 = vpop.xlane.xlu2 %1440 }
 0x484   : > { %v1623_v56 = vsel %vm1620_vm6, %v1618_v46, %v1441_v37 }
 0x48a   : > { %v1537_v51 = vpop.xlane.xlu0 %1536  ;;  %v1572_v59 = vpop.xlane.xlu1 %1571 }
 0x48b   : > { %v1457_v47 = vpop.xlane.xlu2 %1456 }
 0x48c   : > { %v1628_v28 = vsel %vm1625_vm7, %v1623_v56, %v1457_v47 }
 0x492   : > { %v1553_v27 = vpop.xlane.xlu0 %1552  ;;  %v1588_v30 = vpop.xlane.xlu1 %1587 }
 0x493   : > { %v1473_v14 = vpop.xlane.xlu2 %1472 }
 0x494   : > { %v1633_v29 = vsel %vm1630_vm8, %v1628_v28, %v1473_v14 }
 0x495   : > { %v1638_v54 = vsel %vm1635_vm9, %v1633_v29, %v1489_v2 }
 0x496   : > { %v1642_v39 = vsel %vm726_vm3, %v1638_v54, %v1505_v36  ;;  %v1363_v36 = vpack.c.bf16 %v3116_v60, %v3116_v60 }
 0x497   : > { %v1647_v32 = vsel %vm1644_vm10, %v1642_v39, %v1521_v23  ;;  %v1362_v23 = vpack.c.bf16 %v3078_v45, %v3078_v45  ;;  %v2287_v39 = vld [vmem:[%s3555_s6 + $0x8] sm:$0xff] }
 0x498   : > { %v1652_v48 = vsel %vm1649_vm11, %v1647_v32, %v1537_v51  ;;  %v2286_v32 = vld [vmem:[%s3555_s6] sm:$0xff] }
 0x499   : > { %v1657_v53 = vsel %vm1654_vm12, %v1652_v48, %v1553_v27 }
 0x49a   : > { %v1569_v18 = vpop.xlane.xlu0 %1568  ;;  %v1604_v49 = vpop.xlane.xlu1 %1603 }
 0x49b   : > { %v1396_v38 = vpop.xlane.xlu2 %1395  ;;  %v1662_v6 = vsel %vm1659_vm15, %v1657_v53, %v1569_v18 }
 0x4a2   : > { %v1380_v42 = vpop.xlane.xlu0 %1379 }
 0x4a3   : > { %v1492_v25 = vpop.xlane.xlu2 %1491  ;;  %v1609_v9 = vsel %vm1605_vm13, %v1380_v42, %v1396_v38  ;;  %vm3553_vm13 = vcmask 121856  }
 0x4a4   : > { %v1614_v57 = vsel %vm1610_vm14, %v1609_v9, %v1412_v11  ;;  %vm3554_vm14 = vmmov %vm3552_vm2 }
 0x4aa   : > { %v1428_v55 = vpop.xlane.xlu0 %1427 }
 0x4ab   : > { %v1508_v31 = vpop.xlane.xlu2 %1507  ;;  %v1619_v33 = vsel %vm1615_vm5, %v1614_v57, %v1428_v55  ;;  %vm3556_vm5 = vcmask 261120  }
 0x4b2   : > { %v1444_v20 = vpop.xlane.xlu0 %1443  ;;  %v689_v58 = vpop.permute.xlu1 %688 }
 0x4b3   : > { %v1524_v8 = vpop.xlane.xlu2 %1523  ;;  %697 = vst.msk [vmem:[#allocation4 + $0xc] sm:$0xf] %vm657_vm1, %v689_v58  ;;  %v1624_v62 = vsel %vm1620_vm6, %v1619_v33, %v1444_v20 }
 0x4ba   : > { %v1460_v3 = vpop.xlane.xlu0 %1459  ;;  %v714_v35 = vld [vmem:[#allocation4 + $0xc] sm:$0xf] }
 0x4bb   : > { %v1540_v7 = vpop.xlane.xlu2 %1539  ;;  %v1777_v44 = vsel %vm3552_vm2, %v714_v35, 0  ;;  %v1629_v40 = vsel %vm1625_vm7, %v1624_v62, %v1460_v3 }
 0x4bc   : > { %1786 = vmatpush.bf16.msra.mxu1 %v1777_v44 }
 0x4bf   : > { %2238 = vmatmul.msk.bf16.vlgmr.msra.gmra.mxu1 %vm726_vm3, %v1364_v41 }
 0x4c2   : > { %v1476_v52 = vpop.xlane.xlu0 %1475 }
 0x4c3   : > { %v1556_v26 = vpop.xlane.xlu2 %1555  ;;  %v1634_v0 = vsel %vm1630_vm8, %v1629_v40, %v1476_v52 }
 0x4c4   : > { %v1639_v22 = vsel %vm1635_vm9, %v1634_v0, %v1492_v25 }
 0x4c5   : > { %v1643_v1 = vsel %vm726_vm3, %v1639_v22, %v1508_v31 }
 0x4c6   : > { %v1648_v4 = vsel %vm1644_vm10, %v1643_v1, %v1524_v8  ;;  %v2289_v1 = vld [vmem:[%s3516_s10 + $0x8] sm:$0xff] }
 0x4c7   : > { %v1653_v10 = vsel %vm1649_vm11, %v1648_v4, %v1540_v7  ;;  %v2612_v7 = vmov 32.0   ;;  %v2288_v4 = vld [vmem:[%s3516_s10] sm:$0xff] }
 0x4c8   : > { %v1658_v34 = vsel %vm1654_vm12, %v1653_v10, %v1556_v26  ;;  %2467 = vrcp.f32 %v2612_v7  ;;  %vm1971_vm12 = vcmask 523264  }
 0x4c9   : > { %v1663_v61 = vsel %vm1659_vm15, %v1658_v34, %v1572_v59 }
 0x4ca   : > { %v1585_v50 = vpop.xlane.xlu0 %1584  ;;  %v1668_v12 = vsel %vm1664_vm4, %v1663_v61, %v1588_v30 }
 0x4cb   : > { %v687_v24 = vpop.permute.xlu2 %686  ;;  %v1667_v16 = vsel %vm1664_vm4, %v1662_v6, %v1585_v50  ;;  %v1673_v13 = vsel %vm1669_vm0, %v1668_v12, %v1604_v49 }
 0x4cc   : > { %696 = vst.msk [vmem:[#allocation4 + $0x8] sm:$0xf] %vm657_vm1, %v687_v24 }
 0x4ce   : > { %v2468_v44 = vpop.eup %2467 }
 0x4cf   : > { %v1855_v9 = vmul.f32 32.0, %v2468_v44  ;;  %vm1859_vm6 = vweird.f32 %v2468_v44 }
 0x4d1   : > { %v1856_v41 = vsub.f32 1.0, %v1855_v9 }
 0x4d2   : > { %v1601_v17 = vpop.xlane.xlu0 %1600 }
 0x4d3   : > { %v1672_v63 = vsel %vm1669_vm0, %v1667_v16, %v1601_v17  ;;  %v713_v19 = vld [vmem:[#allocation4 + $0x8] sm:$0xf]  ;;  %vm1805_vm0 = vcmask 130048   ;;  %v1857_v57 = vmul.f32 %v2468_v44, %v1856_v41  ;;  %v2445_v17 = vld [vmem:[%s3514_s8] ss:$0 sm:$0xff] }
 0x4d4   : > { %v1675_v5 = vpack.c.bf16 %v1673_v13, %v1672_v63  ;;  %v1758_v21 = vsel %vm3552_vm2, %v713_v19, 0  ;;  %v2446_v13 = vld [vmem:[%s3515_s9] ss:$0 sm:$0xff] }
 0x4d5   : > { %1767 = vmatpush.bf16.msra.mxu2 %v1758_v21  ;;  %v1858_v33 = vadd.f32 %v2468_v44, %v1857_v57 }
 0x4d6   : > { %2234 = vmatmul.msk.bf16.gmra.mxu3 %vm3553_vm13, %v1675_v5 }
 0x4d7   : > { %v3404_v62 = vsel %vm1859_vm6, %v2468_v44, %v1858_v33 }
 0x4d8   : > { %2237 = vmatmul.msk.bf16.vlgmr.msra.gmra.mxu2 %vm726_vm3, %v1363_v36 }
 0x4d9   : > { %1918 = vmatpush.bf16.msrb.mxu2 %v2289_v1 }
 0x4dd   : > { %1919 = vmatpush.bf16.msrb.mxu2 %v2288_v4 }
 0x4e5   : > { %v685_v15 = vpop.permute.xlu0 %684 }
 0x4e6   : > { %695 = vst.msk [vmem:[#allocation4 + $0x4] sm:$0xf] %vm657_vm1, %v685_v15  ;;  %vm1807_vm1 = vcmask 195584   ;;  %v2293_v15 = vld [vmem:[%s3518_s12 + $0x18] sm:$0xff] }
 0x4e7   : > { %1979 = vmatpush.bf16.msra.mxu3 %v2293_v15 }
 0x4ed   : > { %v712_v46 = vld [vmem:[#allocation4 + $0x4] sm:$0xf] }
 0x4ee   : > { %v1739_v2 = vsel %vm3554_vm14, %v712_v46, 0  ;;  %v2292_v46 = vld [vmem:[%s3518_s12 + $0x10] sm:$0xff] }
 0x4ef   : > { %1748 = vmatpush.bf16.msra.mxu0 %v1739_v2  ;;  %1980 = vmatpush.bf16.msra.mxu3 %v2292_v46  ;;  %v2291_v2 = vld [vmem:[%s3518_s12 + $0x8] sm:$0xff] }
 0x4f2   : > { %2236 = vmatmul.msk.bf16.vlgmr.msra.gmra.mxu0 %vm726_vm3, %v1362_v23  ;;  %v2290_v23 = vld [vmem:[%s3518_s12] sm:$0xff] }
 0x4f3   : > { %v1706_v51 = vpop.f32.mrf.mxu3  ;;  %1840 = vmatpush.bf16.msrb.mxu0 %v2287_v39  ;;  %1981 = vmatpush.bf16.msra.mxu3 %v2291_v2 }
 0x4f4   : > { %v1732_v18 = vadd.f32 %v3237_v43, %v1706_v51  ;;  %v2444_v43 = vld [vmem:[%s3513_s7] ss:$0 sm:$0xff] }
 0x4f7   : > { %1841 = vmatpush.bf16.msrb.mxu0 %v2286_v32  ;;  %1982 = vmatpush.bf16.msra.mxu3 %v2290_v23  ;;  %v2448_v32 = vld [vmem:[%s3519_s13] ss:$0 sm:$0xff] }
 0x4fb   : > { %v1708_v47 = vpop.f32.mrf.mxu3 }
 0x53c   : > { %v1788_v37 = vpop.f32.mrf.mxu1 }
 0x544   : > { %v1790_v56 = vpop.f32.mrf.mxu1 }
 0x559   : > { %v1711_v11 = vpop.f32.mrf.mxu3 }
 0x55b   : > { %v1769_v60 = vpop.f32.mrf.mxu2 }
 0x55c   : > { %v1770_v45 = vadd.f32 %v1769_v60, %v1711_v11 }
 0x561   : > { %v1713_v27 = vpop.f32.mrf.mxu3 }
 0x562   : > { %v1789_v28 = vadd.f32 %v1788_v37, %v1713_v27  ;;  %v2447_v37 = vld [vmem:[%s3517_s11] ss:$0 sm:$0xff] }
 0x563   : > { %v1771_v14 = vpop.f32.mrf.mxu2 }
 0x564   : > { %1801 = vrot.lane.b32.xlu0 %v1789_v28, %s2609_s21  ;;  %s3557_s21 = sshll.u32 %s2767_s20, 3 }
 0x565   : > { %s594_s26 = scalar_lea.vmem %s3558_s19, %s3557_s21 }
 0x566   : > { %v1847_v20 = vld [vmem:[%s594_s26] sm:$0xff]  ;;  %s2028_s26 = scalar_lea.sflag [#allocation8], %s3075_s0 }
 0x56f   : > { %v1750_v29 = vpop.f32.mrf.mxu0 }
 0x570   : > { %v1751_v54 = vadd.f32 %v1750_v29, %v1708_v47 }
 0x572   : > { %1793 = vrot.lane.b32.xlu2 %v1751_v54, %s3532_s22  ;;  %s2294_s22 = sshll.u32 %s2577_s27, 5 }
 0x573   : > { %s2055_s18 = scalar_lea.hbm %s3523_s17, %s2294_s22 }
 0x574   : > { %s2058_s19 = sshll.u32 %s2055_s18, 4  ;;  %s2059_s19 = int_to_ptr.hbm [resolvable:$true] %s2058_s19 }
 0x575   : > { %s2489_s28 = sshra.s32 %s2059_s19, 4  ;;  %s2490_s28 = int_to_ptr.hbm [resolvable:$true] %s2489_s28 }
 0x576   : > { %s2491_s20 = scalar_lea.hbm %s2490_s28, 32  ;;  %p2496_p1 = scmp.lt.s32.totalorder %s2490_s28, %s3523_s17 }
 0x577   : > { %v1752_v59 = vpop.f32.mrf.mxu0  ;;  %p2492_p12 = scmp.ne.s32.totalorder %s2490_s28, %s2491_s20  ;;  %p2497_p2 = scmp.lt.s32.totalorder %s2495_s30, %s2491_s20 }
 0x579   : > { %p2493_p13 = pnand %p2492_p12, %p2744_p4  ;;  %p2498_p3 = por %p2497_p2, %p2496_p1 }
 0x57a   : > { %1797 = vrot.lane.b32.xlu2 %v1770_v45, %s2611_s23 }
 0x57b   : > { %p2494_p0 = pneg %p2493_p13 }
 0x57d   : > { %p2499_p5 = pnand %p2498_p3, %p2494_p0 }
 0x5cc   : > { %v1794_v48 = vpop.permute.xlu2 %1793 }
 0x5cd   : > { %v1804_v38 = vsel %vm726_vm3, %v1732_v18, %v1794_v48  ;;  %vm3559_vm3 = vmmov %vm3556_vm5 }
 0x5ce   : > { %vm3560_vm7 = vmmov %vm3559_vm3 }
 0x5cf   : > { %vm3561_vm11 = vmmov %vm3559_vm3 }
 0x5d0   : > { %vm3562_vm15 = vmmov %vm3559_vm3 }
 0x5d1   : > { %vm3563_vm4 = vmmov %vm3559_vm3 }
 0x5d4   : > { %v1798_v30 = vpop.permute.xlu2 %1797 }
 0x5d5   : > { %v1806_v42 = vsel %vm1805_vm0, %v1804_v38, %v1798_v30 }
 0x5d6   : > { %v1802_v25 = vpop.permute.xlu0 %1801 }
 0x5d7   : > { %v1808_v49 = vsel %vm1807_vm1, %v1806_v42, %v1802_v25 }
 0x5d8   : > { %v1809_v55 = vpack.c.bf16 %v1808_v49, %v1808_v49 }
 0x5da   : > { %2247 = vmatmul.msk.bf16.vlgmr.msrb.gmra.mxu0 %vm3556_vm5, %v1809_v55 }
 0x657   : > { %v1843_v31 = vpop.f32.mrf.mxu0 }
 0x658   : > { %v1844_v58 = vadd.f32 %v2444_v43, %v1843_v31 }
 0x65a   : > { %v1848_v8 = vadd.f32 %v1847_v20, %v1844_v58 }
 0x65c   : > { %v1851_v3 = vsel %vm3559_vm3, %v1848_v8, 0.0 }
 0x65d   : > { %1852 = vadd.xlane.f32.xlu2 %v1851_v3 }
 0x65f   : > { %v1845_v35 = vpop.f32.mrf.mxu0 }
 0x6d0   : > { %v1853_v40 = vpop.xlane.xlu2 %1852 }
 0x6d1   : > { %v1861_v52 = vmul.f32 %v3404_v62, %v1853_v40 }
 0x6d3   : > { %v1862_v26 = vsub.f32 %v1848_v8, %v1861_v52 }
 0x6d5   : > { %v1863_v0 = vmul.f32 %v1862_v26, %v1862_v26 }
 0x6d7   : > { %v1864_v22 = vsel %vm3560_vm7, %v1863_v0, 0.0 }
 0x6d8   : > { %1865 = vadd.xlane.f32.xlu0 %v1864_v22 }
 0x74b   : > { %v1866_v10 = vpop.xlane.xlu0 %1865 }
 0x74c   : > { %v1867_v50 = vmul.f32 %v1866_v10, %v3404_v62 }
 0x74e   : > { %v1868_v34 = vadd.f32 1e-05, %v1867_v50 }
 0x750   : > { %2469 = vrsqrt.f32 %v1868_v34  ;;  %vm1875_vm9 = vweird.f32 %v1868_v34 }
 0x756   : > { %v2470_v24 = vpop.eup %2469 }
 0x757   : > { %v1870_v61 = vmul.f32 %v2470_v24, %v1868_v34  ;;  %vm1876_vm8 = vweird.f32 %v2470_v24 }
 0x758   : > { %vm1877_vm10 = vmor %vm1875_vm9, %vm1876_vm8 }
 0x759   : > { %v1871_v53 = vmul.f32 %v2470_v24, %v1870_v61 }
 0x75b   : > { %v1872_v12 = vmul.f32 0.5, %v1871_v53 }
 0x75d   : > { %v1873_v6 = vsub.f32 1.5, %v1872_v12 }
 0x75f   : > { %v1874_v16 = vmul.f32 %v2470_v24, %v1873_v6 }
 0x761   : > { %v1878_v63 = vsel %vm1877_vm10, %v2470_v24, %v1874_v16 }
 0x762   : > { %v1879_v19 = vmul.f32 %v1878_v63, %v1862_v26 }
 0x764   : > { %v1883_v5 = vmul.f32 %v2445_v17, %v1879_v19 }
 0x766   : > { %v1887_v21 = vadd.f32 %v2446_v13, %v1883_v5 }
 0x768   : > { %v1888_v36 = vpack.c.bf16 %v1887_v21, %v1887_v21 }
 0x76a   : > { %2256 = vmatmul.msk.bf16.vlgmr.msrb.gmra.mxu2 %vm3561_vm11, %v1888_v36 }
 0x7ed   : > { %v1921_v56 = vpop.f32.mrf.mxu2 }
 0x7ee   : > { %v1922_v51 = vadd.f32 %v2447_v37, %v1921_v56 }
 0x7f0   : > { %v1926_v47 = vmul.f32 0.044715, %v1922_v51  ;;  %v1925_v54 = vmul.f32 0.5, %v1922_v51 }
 0x7f2   : > { %v1927_v11 = vmul.f32 %v1926_v47, %v1922_v51 }
 0x7f4   : > { %v1928_v60 = vmul.f32 %v1927_v11, %v1922_v51 }
 0x7f5   : > { %v1923_v27 = vpop.f32.mrf.mxu2 }
 0x7f6   : > { %v1929_v28 = vadd.f32 %v1928_v60, %v1922_v51 }
 0x7f8   : > { %v1930_v14 = vmul.f32 0.7978846, %v1929_v28 }
 0x7fa   : > { %2471 = vtanh.f32 %v1930_v14 }
 0x800   : > { %v2472_v29 = vpop.eup %2471 }
 0x801   : > { %v1932_v59 = vadd.f32 1.0, %v2472_v29 }
 0x803   : > { %v1933_v45 = vmul.f32 %v1932_v59, %v1925_v54 }
 0x805   : > { %v1934_v39 = vpack.c.bf16 %v1933_v45, %v1933_v45 }
 0x807   : > { %2273 = vmatmul.msk.bf16.vlgmr.msra.gmra.mxu3 %vm1971_vm12, %v1934_v39 }
 0x88a   : > { %v1984_v48 = vpop.f32.mrf.mxu3 }
 0x88b   : > { %v1985_v18 = vadd.f32 %v2448_v32, %v1984_v48 }
 0x88d   : > { %v1988_v38 = vadd.f32 %v1985_v18, %v1887_v21 }
 0x88f   : > { %v1991_v30 = vsel %vm3562_vm15, %v1988_v38, 0.0 }
 0x890   : > { %1992 = vadd.xlane.f32.xlu1 %v1991_v30 }
 0x892   : > { %v1986_v42 = vpop.f32.mrf.mxu3 }
 0x903   : > { %v1993_v25 = vpop.xlane.xlu1 %1992 }
 0x904   : > { %v1994_v49 = vmul.f32 %v1993_v25, %v3404_v62 }
 0x906   : > { %v1995_v55 = vsub.f32 %v1988_v38, %v1994_v49 }
 0x908   : > { %v1996_v43 = vmul.f32 %v1995_v55, %v1995_v55 }
 0x90a   : > { %v1997_v31 = vsel %vm3563_vm4, %v1996_v43, 0.0 }
 0x90b   : > { %1998 = vadd.xlane.f32.xlu2 %v1997_v31 }
 0x90c   : > { %2502 = shalt.err (!%p2499_p5)
}
 0x90d   : > { %s2613_s22 = smov 128   ;;  %s3564_s21 = smov 8   ;;  %v2449_v57 = vld [vmem:[%s3520_s14] ss:$0 sm:$0xff]  ;;  %vm3565_vm0 = vmmov %vm3559_vm3 }
 0x90e   : > { %2296 = dma.vmem_to_hbm [thread:$0]  (%p2744_p4), %s2057_s3, 512, %s2059_s19, %s2028_s26, %s2613_s22, %s2613_s22, %s3564_s21  }
 0x90f   : > { %s2187_s4 = sshll.u32 %s3075_s0, 3  ;;  %s2276_s5 = sshll.u32 %s2577_s27, 3  ;;  %v2450_v40 = vld [vmem:[%s3521_s15] ss:$0 sm:$0xff] }
 0x910   : > { %s2039_s19 = scalar_lea.hbm %s3522_s16, %s2276_s5  ;;  %s580_s27 = scalar_lea.vmem [#allocation5], %s2187_s4 }
 0x911   : > { %s2041_s20 = sshll.u32 %s580_s27, 4  ;;  %s2043_s2 = sshll.u32 %s2039_s19, 4  ;;  %s2042_s20 = int_to_ptr.vmem [resolvable:$true] %s2041_s20  ;;  %s2044_s2 = int_to_ptr.hbm [resolvable:$true] %s2043_s2 }
 0x912   : > { %s2023_s30 = scalar_lea.sflag [#allocation6], %s3075_s0  ;;  %s2517_s22 = sshra.s32 %s2044_s2, 4  ;;  %s2518_s22 = int_to_ptr.hbm [resolvable:$true] %s2517_s22 }
 0x913   : > { %s2519_s21 = scalar_lea.hbm %s2518_s22, 8  ;;  %s2523_s4 = scalar_lea.hbm %s3522_s16, 16 }
 0x914   : > { %p2520_p6 = scmp.ne.s32.totalorder %s2518_s22, %s2519_s21  ;;  %p2524_p10 = scmp.lt.s32.totalorder %s2518_s22, %s3522_s16 }
 0x915   : > { %p2525_p11 = scmp.lt.s32.totalorder %s2523_s4, %s2519_s21 }
 0x916   : > { %p2521_p7 = pnand %p2520_p6, %p2744_p4 }
 0x917   : > { %p2526_p12 = por %p2525_p11, %p2524_p10 }
 0x918   : > { %p2522_p9 = pneg %p2521_p7 }
 0x91a   : > { %p2527_p13 = pnand %p2526_p12, %p2522_p9 }
 0x97e   : > { %v1999_v20 = vpop.xlane.xlu2 %1998 }
 0x97f   : > { %v2000_v58 = vmul.f32 %v1999_v20, %v3404_v62 }
 0x981   : > { %v2001_v8 = vadd.f32 1e-05, %v2000_v58 }
 0x983   : > { %2473 = vrsqrt.f32 %v2001_v8  ;;  %vm2008_vm13 = vweird.f32 %v2001_v8 }
 0x989   : > { %v2474_v3 = vpop.eup %2473 }
 0x98a   : > { %v2003_v35 = vmul.f32 %v2474_v3, %v2001_v8  ;;  %vm2009_vm2 = vweird.f32 %v2474_v3 }
 0x98b   : > { %vm2010_vm14 = vmor %vm2008_vm13, %vm2009_vm2 }
 0x98c   : > { %v2004_v7 = vmul.f32 %v2474_v3, %v2003_v35 }
 0x98e   : > { %v2005_v44 = vmul.f32 0.5, %v2004_v7 }
 0x990   : > { %v2006_v9 = vsub.f32 1.5, %v2005_v44 }
 0x992   : > { %v2007_v41 = vmul.f32 %v2474_v3, %v2006_v9 }
 0x994   : > { %v2011_v33 = vsel %vm2010_vm14, %v2474_v3, %v2007_v41 }
 0x995   : > { %v2012_v62 = vmul.f32 %v2011_v33, %v1995_v55 }
 0x997   : > { %v2016_v52 = vmul.f32 %v2449_v57, %v2012_v62 }
 0x999   : > { %v2020_v26 = vadd.f32 %v2450_v40, %v2016_v52 }
 0x99b   : > { %2021 = vst.msk [vmem:[%s580_s27] sm:$0xff] %vm3565_vm0, %v2020_v26 }
 0x99c   : > { %2530 = shalt.err (!%p2527_p13)
}
 0x99d   : > { %2295 = dma.vmem_to_hbm [thread:$0]  (%p2744_p4), %s2042_s20, 128, %s2044_s2, %s2023_s30  }
 0x99e PF: > { %p2306_p0 = scmp.ge.s32.totalorder %s2585_s29, 2  ;;  %s2073_s18 = sand.u32 1, %s2565_s24  }
 0x99f   : > { %s2074_s19 = scalar_lea.sflag [#allocation6], %s2073_s18 }
 0x9a0   : > { %p2300_p1 = pnand %p2306_p0, %p2751_p8 }
 0x9a2   : > { %p2301_p2 = pneg %p2300_p1 }
 0x9a4   : > { %2556 = dma.done.wait (%p2301_p2), %s2074_s19, 128  }
 0x9a5   : > { %2558 = vsyncadd (%p2301_p2), %s2074_s19, 4294967168  ;;  %s2084_s26 = scalar_lea.sflag [#allocation8], %s2073_s18 }
 0x9a6   : > { %2560 = dma.done.wait (%p2301_p2), %s2084_s26, 512  }
 0x9a7   : > { %2562 = vsyncadd (%p2301_p2), %s2084_s26, 4294966784  ;;  %s34_s29 = sadd.s32 1, %s2585_s29   ;;  %s3567_s1 = sld [smem:[#allocation11_spill]] }
 0x9a8   : > { %p31_p3 = scmp.ge.s32.totalorder %s34_s29, 4   ;;  %s3568_s26 = sld [smem:[#allocation15_spill]] }
 0x9a9   : > { %s3569_s27 = sld [smem:[#allocation12_spill]]  ;;  %s3571_s24 = smov %s2569_s25 }
 0x9aa   : > { %s3570_s28 = sld [smem:[#allocation13_spill]]  ;;  %33 = sbr.rel (!%p31_p3) target bundleno = 14 (0xe), region = 144 }
 0x9ad   : > { %s3572_s25 = smov %s3567_s1 }
 0x9af   :  { %2090 = vsyncpa [#allocation6], 1 }
 0x9b0   :  { %2092 = vsyncpa [#allocation6 + $0x1], 1 }
 0x9b1   :  { %2093 = vsyncpa [#allocation8], 1 }
 0x9b2   :  { %2095 = vsyncpa [#allocation8 + $0x1], 1 }

</bundles_post_ra>
